<compile_context>
chip_gen: v7x
topology: tpu7x:2x2x1
jax: 0.10.0
libtpu: 0.0.40
codegen_flags: <defaults>
</compile_context>

<pallas_src>
import functools
import math

import jax
import jax.numpy as jnp
from jax.experimental import pallas as pl
from jax.experimental.pallas import tpu as pltpu


# ----------------------------------------------------------------------------- #
# Kernel
# ----------------------------------------------------------------------------- #
def _layernorm(x, w, b, eps):
    # Two independent reductions (pipeline on the XLU) instead of mean -> centered mean.
    n = x.shape[-1]
    s1 = jnp.sum(x, axis=-1, keepdims=True)
    s2 = jnp.sum(x * x, axis=-1, keepdims=True)
    mean = s1 * (1.0 / n)
    var = jnp.maximum(s2 * (1.0 / n) - mean * mean, 0.0)
    return (x - mean) * jax.lax.rsqrt(var + eps) * w + b


def _fused_encoder_kernel(
    # inputs (all VMEM-resident, no grid)
    x_ref, pw_ref, pb_ref,
    wqkv_ref, bqkv_ref, wo_ref, w1_ref, b1_ref, w2_ref, vec_ref,
    hw_ref, hb_ref,
    # output
    o_ref,
    # scratch: concatenated per-head attention outputs, heads contiguous in lanes
    attn_scr,
    *, num_layers, nhead, batch, seq, eps,
):
    R, D = attn_scr.shape                     # R = B*S rows, D = projection dim
    hd = D // nhead

    # ---- input projection (E*E -> D); residual stream stays in vregs/VMEM ----
    x = (
        jnp.dot(x_ref[...].astype(jnp.bfloat16), pw_ref[...],
                preferred_element_type=jnp.float32)
        + pb_ref[...]
    )                                         # (R, D) f32

    for l in range(num_layers):               # static unroll; all weights already resident
        vec = vec_ref[l]                      # (6, D) f32: [out_b, ln1_w, ln1_b, lin2_b, ln2_w, ln2_b]
        xb = x.astype(jnp.bfloat16)           # single bf16 cast of the residual stream

        # ---- merged QKV GEMM (1/sqrt(hd) pre-folded into the Q third of wqkv/bqkv) ----
        qkv = (
            jnp.dot(xb, wqkv_ref[l], preferred_element_type=jnp.float32)
            + bqkv_ref[l]
        )                                     # (R, 3D) f32

        # ---- per-head attention core (scores/softmax/PV), batched over the batch dim ----
        for h in range(nhead):
            q = qkv[:, h * hd:(h + 1) * hd].reshape(batch, seq, hd).astype(jnp.bfloat16)
            k = qkv[:, D + h * hd:D + (h + 1) * hd].reshape(batch, seq, hd).astype(jnp.bfloat16)
            v = qkv[:, 2 * D + h * hd:2 * D + (h + 1) * hd].reshape(batch, seq, hd).astype(jnp.bfloat16)
            s = jnp.einsum("bqd,bkd->bqk", q, k, preferred_element_type=jnp.float32)
            s = s - jnp.max(s, axis=-1, keepdims=True)
            p = jnp.exp(s)
            p = p * pl.reciprocal(jnp.sum(p, axis=-1, keepdims=True), approx=True)
            oh = jnp.einsum("bqk,bkd->bqd", p.astype(jnp.bfloat16), v,
                            preferred_element_type=jnp.float32)
            # lay head h contiguously in lanes of the scratch slab
            attn_scr[:, h * hd:(h + 1) * hd] = oh.reshape(R, hd)

        # ---- single out-projection GEMM on the concatenated head outputs ----
        attn = (
            jnp.dot(attn_scr[...].astype(jnp.bfloat16), wo_ref[l],
                    preferred_element_type=jnp.float32)
            + vec[0:1, :]
        )

        x1 = _layernorm(x + attn, vec[1:2, :], vec[2:3, :], eps)

        # ---- feed forward: Linear -> ReLU -> Linear ----
        h1 = jnp.dot(x1.astype(jnp.bfloat16), w1_ref[l],
                     preferred_element_type=jnp.float32) + b1_ref[l]
        h1 = jnp.maximum(h1, 0.0)
        h2 = jnp.dot(h1.astype(jnp.bfloat16), w2_ref[l],
                     preferred_element_type=jnp.float32) + vec[3:4, :]

        x = _layernorm(x1 + h2, vec[4:5, :], vec[5:6, :], eps)

    # ---- max over the sequence + classification head ----
    m = jnp.max(x.reshape(batch, seq, D), axis=1)                      # (B, D)
    o_ref[...] = (
        jnp.dot(m.astype(jnp.bfloat16), hw_ref[...],
                preferred_element_type=jnp.float32)
        + hb_ref[...]
    )


# ----------------------------------------------------------------------------- #
# Wrapper
# ----------------------------------------------------------------------------- #
def transformer_encoder_forward(x, packed, *, nhead, eps=1e-5):
    """x: (B, S, E, E) float32 -> (B, num_classes) float32."""
    B, S = x.shape[0], x.shape[1]
    R = B * S
    x2 = x.reshape(R, -1).astype(jnp.float32)

    L, D, _ = packed["wqkv"].shape
    C = packed["head_w"].shape[1]

    # Resident-weight budget guard (trivially satisfied here).
    resident_bytes = x2.size * 4 + sum(
        a.size * a.dtype.itemsize for a in jax.tree_util.tree_leaves(packed)
    )
    if resident_bytes > 40 * 1024 * 1024:
        # TODO(synk): fall back to a per-layer streaming grid for large configs (v7x: 64 MiB VMEM).
        raise NotImplementedError("weights too large for the VMEM-resident variant")

    kernel = functools.partial(
        _fused_encoder_kernel,
        num_layers=L, nhead=nhead, batch=B, seq=S, eps=eps,
    )

    return pl.pallas_call(
        kernel,
        out_shape=jax.ShapeDtypeStruct((B, C), jnp.float32),
        # no grid: whole arrays are resident in VMEM, kernel runs once
        scratch_shapes=[pltpu.VMEM((R, D), jnp.float32)],
        compiler_params=pltpu.CompilerParams(
            vmem_limit_bytes=48 * 1024 * 1024,   # explicit headroom; within v7x's 64 MiB
        ),
    )(
        x2, packed["proj_w"], packed["proj_b"],
        packed["wqkv"], packed["bqkv"], packed["wo"],
        packed["w1"], packed["b1"], packed["w2"], packed["vec"],
        packed["head_w"], packed["head_b"],
    )


# ----------------------------------------------------------------------------- #
# Parameter construction (PyTorch-shaped raw params) + packing for the kernel
# ----------------------------------------------------------------------------- #
def make_raw_params(key, embedding_dim, projection_dim, nhead, num_layers,
                    num_classes, ffn_dim):
    def nrm(k, shape, scale=0.02):
        return (scale * jax.random.normal(k, shape)).astype(jnp.float32)

    P, F = projection_dim, ffn_dim
    keys = jax.random.split(key, 2 + num_layers)
    k0 = jax.random.split(keys[0], 2)
    raw = {
        "proj": {"w": nrm(k0[0], (P, embedding_dim * embedding_dim)),
                 "b": nrm(k0[1], (P,))},
        "layers": [],
    }
    for i in range(num_layers):
        ks = jax.random.split(keys[1 + i], 8)
        raw["layers"].append({
            "in_w": nrm(ks[0], (3 * P, P)), "in_b": nrm(ks[1], (3 * P,)),
            "out_w": nrm(ks[2], (P, P)),    "out_b": nrm(ks[3], (P,)),
            "ln1_w": jnp.ones((P,), jnp.float32), "ln1_b": jnp.zeros((P,), jnp.float32),
            "lin1_w": nrm(ks[4], (F, P)),   "lin1_b": nrm(ks[5], (F,)),
            "lin2_w": nrm(ks[6], (P, F)),   "lin2_b": nrm(ks[7], (P,)),
            "ln2_w": jnp.ones((P,), jnp.float32), "ln2_b": jnp.zeros((P,), jnp.float32),
        })
    kf = jax.random.split(keys[-1], 2)
    raw["final"] = {"w": nrm(kf[0], (num_classes, P)), "b": nrm(kf[1], (num_classes,))}
    return raw


def pack_params(raw, nhead):
    """Transpose to (in, out) x-form, merge Q|K|V into one (L, D, 3D) weight with the softmax
    1/sqrt(hd) scale folded into the Q third (note: bf16 quantization therefore applies to the
    *scaled* Wq/bq — do not re-apply the scale in the kernel), stack per-layer tensors along a
    leading layer axis, pack small per-layer f32 vectors into one (L, 6, D) buffer, and cast
    matmul weights to bf16."""
    D = raw["proj"]["w"].shape[0]
    hd = D // nhead
    scale = 1.0 / math.sqrt(hd)
    bf, f32 = jnp.bfloat16, jnp.float32
    layers = raw["layers"]

    def qkv_w(L):                      # (3D, D) torch-form -> (D, 3D) x-form, Q third scaled
        w = L["in_w"].T
        return jnp.concatenate([w[:, :D] * scale, w[:, D:]], axis=1)

    def qkv_b(L):
        b = L["in_b"]
        return jnp.concatenate([b[:D] * scale, b[D:]]).reshape(1, -1)

    def vecs(L):                       # rows: out_b, ln1_w, ln1_b, lin2_b, ln2_w, ln2_b
        return jnp.stack([L["out_b"], L["ln1_w"], L["ln1_b"],
                          L["lin2_b"], L["ln2_w"], L["ln2_b"]], axis=0)

    def stack(fn):
        return jnp.stack([fn(L) for L in layers], axis=0)

    return {
        "proj_w": raw["proj"]["w"].T.astype(bf),
        "proj_b": raw["proj"]["b"].reshape(1, -1).astype(f32),
        "wqkv": stack(qkv_w).astype(bf),                       # (L, D, 3D)
        "bqkv": stack(qkv_b).astype(f32),                      # (L, 1, 3D)
        "wo":   stack(lambda L: L["out_w"].T).astype(bf),      # (L, D, D)
        "w1":   stack(lambda L: L["lin1_w"].T).astype(bf),     # (L, D, F)
        "b1":   stack(lambda L: L["lin1_b"].reshape(1, -1)).astype(f32),   # (L, 1, F)
        "w2":   stack(lambda L: L["lin2_w"].T).astype(bf),     # (L, F, D)
        "vec":  stack(vecs).astype(f32),                       # (L, 6, D)
        "head_w": raw["final"]["w"].T.astype(bf),
        "head_b": raw["final"]["b"].reshape(1, -1).astype(f32),
    }


# ----------------------------------------------------------------------------- #
# Pure-JAX f32 reference (PyTorch module semantics) for verification
# ----------------------------------------------------------------------------- #
def reference_forward(x, raw, nhead, eps=1e-5):
    B, S = x.shape[0], x.shape[1]
    x = x.reshape(B, S, -1)
    x = x @ raw["proj"]["w"].T + raw["proj"]["b"]

    def ln(t, w, b):
        m = jnp.mean(t, -1, keepdims=True)
        v = jnp.mean((t - m) ** 2, -1, keepdims=True)
        return (t - m) * jax.lax.rsqrt(v + eps) * w + b

    for L in raw["layers"]:
        D = x.shape[-1]
        hd = D // nhead
        qkv = x @ L["in_w"].T + L["in_b"]
        q, k, v = qkv[..., :D], qkv[..., D:2 * D], qkv[..., 2 * D:]

        def split(t):
            return t.reshape(B, S, nhead, hd).transpose(0, 2, 1, 3)

        qh, kh, vh = split(q), split(k), split(v)
        s = (qh / math.sqrt(hd)) @ kh.transpose(0, 1, 3, 2)
        p = jax.nn.softmax(s, axis=-1)
        a = (p @ vh).transpose(0, 2, 1, 3).reshape(B, S, D)
        a = a @ L["out_w"].T + L["out_b"]

        x = ln(x + a, L["ln1_w"], L["ln1_b"])
        h = jnp.maximum(x @ L["lin1_w"].T + L["lin1_b"], 0.0)
        h = h @ L["lin2_w"].T + L["lin2_b"]
        x = ln(x + h, L["ln2_w"], L["ln2_b"])

    x = jnp.max(x, axis=1)
    return x @ raw["final"]["w"].T + raw["final"]["b"]


# ----------------------------------------------------------------------------- #
if __name__ == "__main__":
    # Small config consistent with the module's forward:
    #   x: (B, S, E, E) -> reshape (B, S, E*E) -> project to P -> encoder stack -> max -> classes
    B, S = 2, 8
    EMBEDDING_DIM = 4          # so E*E = 16 input features per token
    PROJECTION_DIM = 32
    NHEAD = 4
    NUM_LAYERS = 2             # module default is 8; kept small for the demo
    NUM_CLASSES = 10
    FFN_DIM = 2048             # nn.TransformerEncoderLayer default dim_feedforward

    key = jax.random.PRNGKey(0)
    kx, kp = jax.random.split(key)
    x = jax.random.normal(kx, (B, S, EMBEDDING_DIM, EMBEDDING_DIM), dtype=jnp.float32)

    raw = make_raw_params(kp, EMBEDDING_DIM, PROJECTION_DIM, NHEAD,
                          NUM_LAYERS, NUM_CLASSES, FFN_DIM)
    packed = pack_params(raw, NHEAD)

    fwd = jax.jit(functools.partial(transformer_encoder_forward, nhead=NHEAD))
    out = jax.block_until_ready(fwd(x, packed))

    ref = jax.block_until_ready(reference_forward(x, raw, NHEAD))
    assert out.shape == (B, NUM_CLASSES)
    max_err = float(jnp.max(jnp.abs(out - ref)))
    # bf16 matmuls + approx reciprocal vs f32 reference -> loose-ish tolerance
    assert jnp.allclose(out, ref, atol=2e-2, rtol=2e-2), f"mismatch vs reference: {max_err}"

    print("KERNEL_OK")
</pallas_src>

<mosaic_0001>
module attributes {stable_mosaic.version = 11 : i64} {
  func.func @_fused_encoder_kernel(%arg0: memref<16x16xf32, #tpu.memory_space<vmem>>, %arg1: memref<16x32xbf16, #tpu.memory_space<vmem>>, %arg2: memref<1x32xf32, #tpu.memory_space<vmem>>, %arg3: memref<2x32x96xbf16, #tpu.memory_space<vmem>>, %arg4: memref<2x1x96xf32, #tpu.memory_space<vmem>>, %arg5: memref<2x32x32xbf16, #tpu.memory_space<vmem>>, %arg6: memref<2x32x2048xbf16, #tpu.memory_space<vmem>>, %arg7: memref<2x1x2048xf32, #tpu.memory_space<vmem>>, %arg8: memref<2x2048x32xbf16, #tpu.memory_space<vmem>>, %arg9: memref<2x6x32xf32, #tpu.memory_space<vmem>>, %arg10: memref<32x10xbf16, #tpu.memory_space<vmem>>, %arg11: memref<1x10xf32, #tpu.memory_space<vmem>>, %arg12: memref<2x10xf32, #tpu.memory_space<vmem>>, %arg13: memref<16x32xf32, #tpu.memory_space<vmem>>) attributes {dimension_semantics = [], scalar_prefetch = 0 : i64, scratch_operands = 1 : i64, tpu.core_type = #tpu.core_type<tc>} {
    %c0 = arith.constant 0 : index
    %c0_0 = arith.constant 0 : index
    %0 = vector.load %arg0[%c0, %c0_0] : memref<16x16xf32, #tpu.memory_space<vmem>>, vector<16x16xf32>
    %1 = arith.truncf %0 : vector<16x16xf32> to vector<16x16xbf16>
    %c0_1 = arith.constant 0 : index
    %c0_2 = arith.constant 0 : index
    %2 = vector.load %arg1[%c0_1, %c0_2] : memref<16x32xbf16, #tpu.memory_space<vmem>>, vector<16x32xbf16>
    %cst = arith.constant dense<0.000000e+00> : vector<16x32xf32>
    %3 = tpu.matmul %1, %2, %cst {dimension_numbers = #tpu.dot_dimension_numbers<[1], [0], [0], [1], [0, 0, 1, 1], [], []>} : vector<16x16xbf16>, vector<16x32xbf16>, vector<16x32xf32> -> vector<16x32xf32>
    %c0_3 = arith.constant 0 : index
    %c0_4 = arith.constant 0 : index
    %4 = vector.load %arg2[%c0_3, %c0_4] : memref<1x32xf32, #tpu.memory_space<vmem>>, vector<1x32xf32>
    %5 = vector.broadcast %4 : vector<1x32xf32> to vector<16x32xf32>
    %6 = arith.addf %3, %5 : vector<16x32xf32>
    %c0_5 = arith.constant 0 : index
    %c0_6 = arith.constant 0 : index
    %c0_7 = arith.constant 0 : index
    %7 = vector.load %arg9[%c0_5, %c0_6, %c0_7] : memref<2x6x32xf32, #tpu.memory_space<vmem>>, vector<1x6x32xf32>
    %8 = vector.shape_cast %7 : vector<1x6x32xf32> to vector<6x32xf32>
    %9 = arith.truncf %6 : vector<16x32xf32> to vector<16x32xbf16>
    %c0_8 = arith.constant 0 : index
    %c0_9 = arith.constant 0 : index
    %c0_10 = arith.constant 0 : index
    %10 = vector.load %arg3[%c0_8, %c0_9, %c0_10] : memref<2x32x96xbf16, #tpu.memory_space<vmem>>, vector<1x32x96xbf16>
    %11 = vector.shape_cast %10 : vector<1x32x96xbf16> to vector<32x96xbf16>
    %cst_11 = arith.constant dense<0.000000e+00> : vector<16x96xf32>
    %12 = tpu.matmul %9, %11, %cst_11 {dimension_numbers = #tpu.dot_dimension_numbers<[1], [0], [0], [1], [0, 0, 1, 1], [], []>} : vector<16x32xbf16>, vector<32x96xbf16>, vector<16x96xf32> -> vector<16x96xf32>
    %c0_12 = arith.constant 0 : index
    %c0_13 = arith.constant 0 : index
    %c0_14 = arith.constant 0 : index
    %13 = vector.load %arg4[%c0_12, %c0_13, %c0_14] : memref<2x1x96xf32, #tpu.memory_space<vmem>>, vector<1x1x96xf32>
    %14 = vector.shape_cast %13 : vector<1x1x96xf32> to vector<1x96xf32>
    %15 = vector.broadcast %14 : vector<1x96xf32> to vector<16x96xf32>
    %16 = arith.addf %12, %15 : vector<16x96xf32>
    %17 = vector.extract_strided_slice %16 {offsets = [0, 0], sizes = [16, 8], strides = [1, 1]} : vector<16x96xf32> to vector<16x8xf32>
    %18 = vector.shape_cast %17 : vector<16x8xf32> to vector<2x8x8xf32>
    %19 = arith.truncf %18 : vector<2x8x8xf32> to vector<2x8x8xbf16>
    %20 = vector.extract_strided_slice %16 {offsets = [0, 32], sizes = [16, 8], strides = [1, 1]} : vector<16x96xf32> to vector<16x8xf32>
    %21 = vector.shape_cast %20 : vector<16x8xf32> to vector<2x8x8xf32>
    %22 = arith.truncf %21 : vector<2x8x8xf32> to vector<2x8x8xbf16>
    %23 = vector.extract_strided_slice %16 {offsets = [0, 64], sizes = [16, 8], strides = [1, 1]} : vector<16x96xf32> to vector<16x8xf32>
    %24 = vector.shape_cast %23 : vector<16x8xf32> to vector<2x8x8xf32>
    %25 = arith.truncf %24 : vector<2x8x8xf32> to vector<2x8x8xbf16>
    "tpu.trace_start"() <{level = 10 : i32, message = "bqd,bkd->bqk"}> : () -> ()
    %cst_15 = arith.constant dense<0.000000e+00> : vector<2x8x8xf32>
    %26 = tpu.matmul %19, %22, %cst_15 {dimension_numbers = #tpu.dot_dimension_numbers<[2], [2], [1], [1], [0, 0, 0, 1, 1, 1], [0], [0]>} : vector<2x8x8xbf16>, vector<2x8x8xbf16>, vector<2x8x8xf32> -> vector<2x8x8xf32>
    "tpu.trace_stop"() : () -> ()
    %cst_16 = arith.constant dense<0xFF800000> : vector<2x8xf32>
    %27 = vector.multi_reduction <maximumf>, %26, %cst_16 [2] : vector<2x8x8xf32> to vector<2x8xf32>
    %28 = vector.shape_cast %27 : vector<2x8xf32> to vector<2x8x1xf32>
    %29 = vector.broadcast %28 : vector<2x8x1xf32> to vector<2x8x8xf32>
    %30 = arith.subf %26, %29 : vector<2x8x8xf32>
    %31 = math.exp %30 : vector<2x8x8xf32>
    %cst_17 = arith.constant dense<0.000000e+00> : vector<2x8xf32>
    %32 = vector.multi_reduction <add>, %31, %cst_17 [2] : vector<2x8x8xf32> to vector<2x8xf32>
    %33 = vector.shape_cast %32 : vector<2x8xf32> to vector<2x8x1xf32>
    %34 = tpu.reciprocal %33 {approx = true} : vector<2x8x1xf32> -> vector<2x8x1xf32>
    %35 = vector.broadcast %34 : vector<2x8x1xf32> to vector<2x8x8xf32>
    %36 = arith.mulf %31, %35 : vector<2x8x8xf32>
    %37 = arith.truncf %36 : vector<2x8x8xf32> to vector<2x8x8xbf16>
    "tpu.trace_start"() <{level = 10 : i32, message = "bqk,bkd->bqd"}> : () -> ()
    %cst_18 = arith.constant dense<0.000000e+00> : vector<2x8x8xf32>
    %38 = tpu.matmul %37, %25, %cst_18 {dimension_numbers = #tpu.dot_dimension_numbers<[2], [1], [1], [2], [0, 0, 0, 1, 1, 2], [0], [0]>} : vector<2x8x8xbf16>, vector<2x8x8xbf16>, vector<2x8x8xf32> -> vector<2x8x8xf32>
    "tpu.trace_stop"() : () -> ()
    %39 = vector.shape_cast %38 : vector<2x8x8xf32> to vector<16x8xf32>
    %c0_19 = arith.constant 0 : index
    %c0_20 = arith.constant 0 : index
    %40 = vector.load %arg13[%c0_19, %c0_20] : memref<16x32xf32, #tpu.memory_space<vmem>>, vector<16x8xf32>
    tpu.vector_store %arg13[%c0_19, %c0_20], %39 {strides = array<i32>} : memref<16x32xf32, #tpu.memory_space<vmem>>, vector<16x8xf32>,
    %41 = vector.extract_strided_slice %16 {offsets = [0, 8], sizes = [16, 8], strides = [1, 1]} : vector<16x96xf32> to vector<16x8xf32>
    %42 = vector.shape_cast %41 : vector<16x8xf32> to vector<2x8x8xf32>
    %43 = arith.truncf %42 : vector<2x8x8xf32> to vector<2x8x8xbf16>
    %44 = vector.extract_strided_slice %16 {offsets = [0, 40], sizes = [16, 8], strides = [1, 1]} : vector<16x96xf32> to vector<16x8xf32>
    %45 = vector.shape_cast %44 : vector<16x8xf32> to vector<2x8x8xf32>
    %46 = arith.truncf %45 : vector<2x8x8xf32> to vector<2x8x8xbf16>
    %47 = vector.extract_strided_slice %16 {offsets = [0, 72], sizes = [16, 8], strides = [1, 1]} : vector<16x96xf32> to vector<16x8xf32>
    %48 = vector.shape_cast %47 : vector<16x8xf32> to vector<2x8x8xf32>
    %49 = arith.truncf %48 : vector<2x8x8xf32> to vector<2x8x8xbf16>
    "tpu.trace_start"() <{level = 10 : i32, message = "bqd,bkd->bqk"}> : () -> ()
    %cst_21 = arith.constant dense<0.000000e+00> : vector<2x8x8xf32>
    %50 = tpu.matmul %43, %46, %cst_21 {dimension_numbers = #tpu.dot_dimension_numbers<[2], [2], [1], [1], [0, 0, 0, 1, 1, 1], [0], [0]>} : vector<2x8x8xbf16>, vector<2x8x8xbf16>, vector<2x8x8xf32> -> vector<2x8x8xf32>
    "tpu.trace_stop"() : () -> ()
    %cst_22 = arith.constant dense<0xFF800000> : vector<2x8xf32>
    %51 = vector.multi_reduction <maximumf>, %50, %cst_22 [2] : vector<2x8x8xf32> to vector<2x8xf32>
    %52 = vector.shape_cast %51 : vector<2x8xf32> to vector<2x8x1xf32>
    %53 = vector.broadcast %52 : vector<2x8x1xf32> to vector<2x8x8xf32>
    %54 = arith.subf %50, %53 : vector<2x8x8xf32>
    %55 = math.exp %54 : vector<2x8x8xf32>
    %cst_23 = arith.constant dense<0.000000e+00> : vector<2x8xf32>
    %56 = vector.multi_reduction <add>, %55, %cst_23 [2] : vector<2x8x8xf32> to vector<2x8xf32>
    %57 = vector.shape_cast %56 : vector<2x8xf32> to vector<2x8x1xf32>
    %58 = tpu.reciprocal %57 {approx = true} : vector<2x8x1xf32> -> vector<2x8x1xf32>
    %59 = vector.broadcast %58 : vector<2x8x1xf32> to vector<2x8x8xf32>
    %60 = arith.mulf %55, %59 : vector<2x8x8xf32>
    %61 = arith.truncf %60 : vector<2x8x8xf32> to vector<2x8x8xbf16>
    "tpu.trace_start"() <{level = 10 : i32, message = "bqk,bkd->bqd"}> : () -> ()
    %cst_24 = arith.constant dense<0.000000e+00> : vector<2x8x8xf32>
    %62 = tpu.matmul %61, %49, %cst_24 {dimension_numbers = #tpu.dot_dimension_numbers<[2], [1], [1], [2], [0, 0, 0, 1, 1, 2], [0], [0]>} : vector<2x8x8xbf16>, vector<2x8x8xbf16>, vector<2x8x8xf32> -> vector<2x8x8xf32>
    "tpu.trace_stop"() : () -> ()
    %63 = vector.shape_cast %62 : vector<2x8x8xf32> to vector<16x8xf32>
    %c0_25 = arith.constant 0 : index
    %c8 = arith.constant 8 : index
    %64 = vector.load %arg13[%c0_25, %c8] : memref<16x32xf32, #tpu.memory_space<vmem>>, vector<16x8xf32>
    tpu.vector_store %arg13[%c0_25, %c8], %63 {strides = array<i32>} : memref<16x32xf32, #tpu.memory_space<vmem>>, vector<16x8xf32>,
    %65 = vector.extract_strided_slice %16 {offsets = [0, 16], sizes = [16, 8], strides = [1, 1]} : vector<16x96xf32> to vector<16x8xf32>
    %66 = vector.shape_cast %65 : vector<16x8xf32> to vector<2x8x8xf32>
    %67 = arith.truncf %66 : vector<2x8x8xf32> to vector<2x8x8xbf16>
    %68 = vector.extract_strided_slice %16 {offsets = [0, 48], sizes = [16, 8], strides = [1, 1]} : vector<16x96xf32> to vector<16x8xf32>
    %69 = vector.shape_cast %68 : vector<16x8xf32> to vector<2x8x8xf32>
    %70 = arith.truncf %69 : vector<2x8x8xf32> to vector<2x8x8xbf16>
    %71 = vector.extract_strided_slice %16 {offsets = [0, 80], sizes = [16, 8], strides = [1, 1]} : vector<16x96xf32> to vector<16x8xf32>
    %72 = vector.shape_cast %71 : vector<16x8xf32> to vector<2x8x8xf32>
    %73 = arith.truncf %72 : vector<2x8x8xf32> to vector<2x8x8xbf16>
    "tpu.trace_start"() <{level = 10 : i32, message = "bqd,bkd->bqk"}> : () -> ()
    %cst_26 = arith.constant dense<0.000000e+00> : vector<2x8x8xf32>
    %74 = tpu.matmul %67, %70, %cst_26 {dimension_numbers = #tpu.dot_dimension_numbers<[2], [2], [1], [1], [0, 0, 0, 1, 1, 1], [0], [0]>} : vector<2x8x8xbf16>, vector<2x8x8xbf16>, vector<2x8x8xf32> -> vector<2x8x8xf32>
    "tpu.trace_stop"() : () -> ()
    %cst_27 = arith.constant dense<0xFF800000> : vector<2x8xf32>
    %75 = vector.multi_reduction <maximumf>, %74, %cst_27 [2] : vector<2x8x8xf32> to vector<2x8xf32>
    %76 = vector.shape_cast %75 : vector<2x8xf32> to vector<2x8x1xf32>
    %77 = vector.broadcast %76 : vector<2x8x1xf32> to vector<2x8x8xf32>
    %78 = arith.subf %74, %77 : vector<2x8x8xf32>
    %79 = math.exp %78 : vector<2x8x8xf32>
    %cst_28 = arith.constant dense<0.000000e+00> : vector<2x8xf32>
    %80 = vector.multi_reduction <add>, %79, %cst_28 [2] : vector<2x8x8xf32> to vector<2x8xf32>
    %81 = vector.shape_cast %80 : vector<2x8xf32> to vector<2x8x1xf32>
    %82 = tpu.reciprocal %81 {approx = true} : vector<2x8x1xf32> -> vector<2x8x1xf32>
    %83 = vector.broadcast %82 : vector<2x8x1xf32> to vector<2x8x8xf32>
    %84 = arith.mulf %79, %83 : vector<2x8x8xf32>
    %85 = arith.truncf %84 : vector<2x8x8xf32> to vector<2x8x8xbf16>
    "tpu.trace_start"() <{level = 10 : i32, message = "bqk,bkd->bqd"}> : () -> ()
    %cst_29 = arith.constant dense<0.000000e+00> : vector<2x8x8xf32>
    %86 = tpu.matmul %85, %73, %cst_29 {dimension_numbers = #tpu.dot_dimension_numbers<[2], [1], [1], [2], [0, 0, 0, 1, 1, 2], [0], [0]>} : vector<2x8x8xbf16>, vector<2x8x8xbf16>, vector<2x8x8xf32> -> vector<2x8x8xf32>
    "tpu.trace_stop"() : () -> ()
    %87 = vector.shape_cast %86 : vector<2x8x8xf32> to vector<16x8xf32>
    %c0_30 = arith.constant 0 : index
    %c16 = arith.constant 16 : index
    %88 = vector.load %arg13[%c0_30, %c16] : memref<16x32xf32, #tpu.memory_space<vmem>>, vector<16x8xf32>
    tpu.vector_store %arg13[%c0_30, %c16], %87 {strides = array<i32>} : memref<16x32xf32, #tpu.memory_space<vmem>>, vector<16x8xf32>,
    %89 = vector.extract_strided_slice %16 {offsets = [0, 24], sizes = [16, 8], strides = [1, 1]} : vector<16x96xf32> to vector<16x8xf32>
    %90 = vector.shape_cast %89 : vector<16x8xf32> to vector<2x8x8xf32>
    %91 = arith.truncf %90 : vector<2x8x8xf32> to vector<2x8x8xbf16>
    %92 = vector.extract_strided_slice %16 {offsets = [0, 56], sizes = [16, 8], strides = [1, 1]} : vector<16x96xf32> to vector<16x8xf32>
    %93 = vector.shape_cast %92 : vector<16x8xf32> to vector<2x8x8xf32>
    %94 = arith.truncf %93 : vector<2x8x8xf32> to vector<2x8x8xbf16>
    %95 = vector.extract_strided_slice %16 {offsets = [0, 88], sizes = [16, 8], strides = [1, 1]} : vector<16x96xf32> to vector<16x8xf32>
    %96 = vector.shape_cast %95 : vector<16x8xf32> to vector<2x8x8xf32>
    %97 = arith.truncf %96 : vector<2x8x8xf32> to vector<2x8x8xbf16>
    "tpu.trace_start"() <{level = 10 : i32, message = "bqd,bkd->bqk"}> : () -> ()
    %cst_31 = arith.constant dense<0.000000e+00> : vector<2x8x8xf32>
    %98 = tpu.matmul %91, %94, %cst_31 {dimension_numbers = #tpu.dot_dimension_numbers<[2], [2], [1], [1], [0, 0, 0, 1, 1, 1], [0], [0]>} : vector<2x8x8xbf16>, vector<2x8x8xbf16>, vector<2x8x8xf32> -> vector<2x8x8xf32>
    "tpu.trace_stop"() : () -> ()
    %cst_32 = arith.constant dense<0xFF800000> : vector<2x8xf32>
    %99 = vector.multi_reduction <maximumf>, %98, %cst_32 [2] : vector<2x8x8xf32> to vector<2x8xf32>
    %100 = vector.shape_cast %99 : vector<2x8xf32> to vector<2x8x1xf32>
    %101 = vector.broadcast %100 : vector<2x8x1xf32> to vector<2x8x8xf32>
    %102 = arith.subf %98, %101 : vector<2x8x8xf32>
    %103 = math.exp %102 : vector<2x8x8xf32>
    %cst_33 = arith.constant dense<0.000000e+00> : vector<2x8xf32>
    %104 = vector.multi_reduction <add>, %103, %cst_33 [2] : vector<2x8x8xf32> to vector<2x8xf32>
    %105 = vector.shape_cast %104 : vector<2x8xf32> to vector<2x8x1xf32>
    %106 = tpu.reciprocal %105 {approx = true} : vector<2x8x1xf32> -> vector<2x8x1xf32>
    %107 = vector.broadcast %106 : vector<2x8x1xf32> to vector<2x8x8xf32>
    %108 = arith.mulf %103, %107 : vector<2x8x8xf32>
    %109 = arith.truncf %108 : vector<2x8x8xf32> to vector<2x8x8xbf16>
    "tpu.trace_start"() <{level = 10 : i32, message = "bqk,bkd->bqd"}> : () -> ()
    %cst_34 = arith.constant dense<0.000000e+00> : vector<2x8x8xf32>
    %110 = tpu.matmul %109, %97, %cst_34 {dimension_numbers = #tpu.dot_dimension_numbers<[2], [1], [1], [2], [0, 0, 0, 1, 1, 2], [0], [0]>} : vector<2x8x8xbf16>, vector<2x8x8xbf16>, vector<2x8x8xf32> -> vector<2x8x8xf32>
    "tpu.trace_stop"() : () -> ()
    %111 = vector.shape_cast %110 : vector<2x8x8xf32> to vector<16x8xf32>
    %c0_35 = arith.constant 0 : index
    %c24 = arith.constant 24 : index
    %112 = vector.load %arg13[%c0_35, %c24] : memref<16x32xf32, #tpu.memory_space<vmem>>, vector<16x8xf32>
    tpu.vector_store %arg13[%c0_35, %c24], %111 {strides = array<i32>} : memref<16x32xf32, #tpu.memory_space<vmem>>, vector<16x8xf32>,
    %c0_36 = arith.constant 0 : index
    %c0_37 = arith.constant 0 : index
    %113 = vector.load %arg13[%c0_36, %c0_37] : memref<16x32xf32, #tpu.memory_space<vmem>>, vector<16x32xf32>
    %114 = arith.truncf %113 : vector<16x32xf32> to vector<16x32xbf16>
    %c0_38 = arith.constant 0 : index
    %c0_39 = arith.constant 0 : index
    %c0_40 = arith.constant 0 : index
    %115 = vector.load %arg5[%c0_38, %c0_39, %c0_40] : memref<2x32x32xbf16, #tpu.memory_space<vmem>>, vector<1x32x32xbf16>
    %116 = vector.shape_cast %115 : vector<1x32x32xbf16> to vector<32x32xbf16>
    %cst_41 = arith.constant dense<0.000000e+00> : vector<16x32xf32>
    %117 = tpu.matmul %114, %116, %cst_41 {dimension_numbers = #tpu.dot_dimension_numbers<[1], [0], [0], [1], [0, 0, 1, 1], [], []>} : vector<16x32xbf16>, vector<32x32xbf16>, vector<16x32xf32> -> vector<16x32xf32>
    %118 = vector.extract_strided_slice %8 {offsets = [0, 0], sizes = [1, 32], strides = [1, 1]} : vector<6x32xf32> to vector<1x32xf32>
    %119 = vector.broadcast %118 : vector<1x32xf32> to vector<16x32xf32>
    %120 = arith.addf %117, %119 : vector<16x32xf32>
    %121 = arith.addf %6, %120 : vector<16x32xf32>
    %122 = vector.extract_strided_slice %8 {offsets = [1, 0], sizes = [1, 32], strides = [1, 1]} : vector<6x32xf32> to vector<1x32xf32>
    %123 = vector.extract_strided_slice %8 {offsets = [2, 0], sizes = [1, 32], strides = [1, 1]} : vector<6x32xf32> to vector<1x32xf32>
    %cst_42 = arith.constant dense<0.000000e+00> : vector<16xf32>
    %124 = vector.multi_reduction <add>, %121, %cst_42 [1] : vector<16x32xf32> to vector<16xf32>
    %125 = vector.shape_cast %124 : vector<16xf32> to vector<16x1xf32>
    %126 = arith.mulf %121, %121 : vector<16x32xf32>
    %cst_43 = arith.constant dense<0.000000e+00> : vector<16xf32>
    %127 = vector.multi_reduction <add>, %126, %cst_43 [1] : vector<16x32xf32> to vector<16xf32>
    %128 = vector.shape_cast %127 : vector<16xf32> to vector<16x1xf32>
    %cst_44 = arith.constant 3.125000e-02 : f32
    %129 = vector.broadcast %cst_44 : f32 to vector<16x1xf32>
    %130 = arith.mulf %125, %129 : vector<16x1xf32>
    %cst_45 = arith.constant 3.125000e-02 : f32
    %131 = vector.broadcast %cst_45 : f32 to vector<16x1xf32>
    %132 = arith.mulf %128, %131 : vector<16x1xf32>
    %133 = arith.mulf %130, %130 : vector<16x1xf32>
    %134 = arith.subf %132, %133 : vector<16x1xf32>
    %cst_46 = arith.constant 0.000000e+00 : f32
    %135 = vector.broadcast %cst_46 : f32 to vector<16x1xf32>
    %136 = arith.maximumf %134, %135 : vector<16x1xf32>
    %137 = vector.broadcast %130 : vector<16x1xf32> to vector<16x32xf32>
    %138 = arith.subf %121, %137 : vector<16x32xf32>
    %cst_47 = arith.constant 9.99999974E-6 : f32
    %139 = vector.broadcast %cst_47 : f32 to vector<16x1xf32>
    %140 = arith.addf %136, %139 : vector<16x1xf32>
    %141 = math.rsqrt %140 : vector<16x1xf32>
    %142 = vector.broadcast %141 : vector<16x1xf32> to vector<16x32xf32>
    %143 = arith.mulf %138, %142 : vector<16x32xf32>
    %144 = vector.broadcast %122 : vector<1x32xf32> to vector<16x32xf32>
    %145 = arith.mulf %143, %144 : vector<16x32xf32>
    %146 = vector.broadcast %123 : vector<1x32xf32> to vector<16x32xf32>
    %147 = arith.addf %145, %146 : vector<16x32xf32>
    %148 = arith.truncf %147 : vector<16x32xf32> to vector<16x32xbf16>
    %c0_48 = arith.constant 0 : index
    %c0_49 = arith.constant 0 : index
    %c0_50 = arith.constant 0 : index
    %149 = vector.load %arg6[%c0_48, %c0_49, %c0_50] : memref<2x32x2048xbf16, #tpu.memory_space<vmem>>, vector<1x32x2048xbf16>
    %150 = vector.shape_cast %149 : vector<1x32x2048xbf16> to vector<32x2048xbf16>
    %cst_51 = arith.constant dense<0.000000e+00> : vector<16x2048xf32>
    %151 = tpu.matmul %148, %150, %cst_51 {dimension_numbers = #tpu.dot_dimension_numbers<[1], [0], [0], [1], [0, 0, 1, 1], [], []>} : vector<16x32xbf16>, vector<32x2048xbf16>, vector<16x2048xf32> -> vector<16x2048xf32>
    %c0_52 = arith.constant 0 : index
    %c0_53 = arith.constant 0 : index
    %c0_54 = arith.constant 0 : index
    %152 = vector.load %arg7[%c0_52, %c0_53, %c0_54] : memref<2x1x2048xf32, #tpu.memory_space<vmem>>, vector<1x1x2048xf32>
    %153 = vector.shape_cast %152 : vector<1x1x2048xf32> to vector<1x2048xf32>
    %154 = vector.broadcast %153 : vector<1x2048xf32> to vector<16x2048xf32>
    %155 = arith.addf %151, %154 : vector<16x2048xf32>
    %cst_55 = arith.constant 0.000000e+00 : f32
    %156 = vector.broadcast %cst_55 : f32 to vector<16x2048xf32>
    %157 = arith.maximumf %155, %156 : vector<16x2048xf32>
    %158 = arith.truncf %157 : vector<16x2048xf32> to vector<16x2048xbf16>
    %c0_56 = arith.constant 0 : index
    %c0_57 = arith.constant 0 : index
    %c0_58 = arith.constant 0 : index
    %159 = vector.load %arg8[%c0_56, %c0_57, %c0_58] : memref<2x2048x32xbf16, #tpu.memory_space<vmem>>, vector<1x2048x32xbf16>
    %160 = vector.shape_cast %159 : vector<1x2048x32xbf16> to vector<2048x32xbf16>
    %cst_59 = arith.constant dense<0.000000e+00> : vector<16x32xf32>
    %161 = tpu.matmul %158, %160, %cst_59 {dimension_numbers = #tpu.dot_dimension_numbers<[1], [0], [0], [1], [0, 0, 1, 1], [], []>} : vector<16x2048xbf16>, vector<2048x32xbf16>, vector<16x32xf32> -> vector<16x32xf32>
    %162 = vector.extract_strided_slice %8 {offsets = [3, 0], sizes = [1, 32], strides = [1, 1]} : vector<6x32xf32> to vector<1x32xf32>
    %163 = vector.broadcast %162 : vector<1x32xf32> to vector<16x32xf32>
    %164 = arith.addf %161, %163 : vector<16x32xf32>
    %165 = arith.addf %147, %164 : vector<16x32xf32>
    %166 = vector.extract_strided_slice %8 {offsets = [4, 0], sizes = [1, 32], strides = [1, 1]} : vector<6x32xf32> to vector<1x32xf32>
    %167 = vector.extract_strided_slice %8 {offsets = [5, 0], sizes = [1, 32], strides = [1, 1]} : vector<6x32xf32> to vector<1x32xf32>
    %cst_60 = arith.constant dense<0.000000e+00> : vector<16xf32>
    %168 = vector.multi_reduction <add>, %165, %cst_60 [1] : vector<16x32xf32> to vector<16xf32>
    %169 = vector.shape_cast %168 : vector<16xf32> to vector<16x1xf32>
    %170 = arith.mulf %165, %165 : vector<16x32xf32>
    %cst_61 = arith.constant dense<0.000000e+00> : vector<16xf32>
    %171 = vector.multi_reduction <add>, %170, %cst_61 [1] : vector<16x32xf32> to vector<16xf32>
    %172 = vector.shape_cast %171 : vector<16xf32> to vector<16x1xf32>
    %cst_62 = arith.constant 3.125000e-02 : f32
    %173 = vector.broadcast %cst_62 : f32 to vector<16x1xf32>
    %174 = arith.mulf %169, %173 : vector<16x1xf32>
    %cst_63 = arith.constant 3.125000e-02 : f32
    %175 = vector.broadcast %cst_63 : f32 to vector<16x1xf32>
    %176 = arith.mulf %172, %175 : vector<16x1xf32>
    %177 = arith.mulf %174, %174 : vector<16x1xf32>
    %178 = arith.subf %176, %177 : vector<16x1xf32>
    %cst_64 = arith.constant 0.000000e+00 : f32
    %179 = vector.broadcast %cst_64 : f32 to vector<16x1xf32>
    %180 = arith.maximumf %178, %179 : vector<16x1xf32>
    %181 = vector.broadcast %174 : vector<16x1xf32> to vector<16x32xf32>
    %182 = arith.subf %165, %181 : vector<16x32xf32>
    %cst_65 = arith.constant 9.99999974E-6 : f32
    %183 = vector.broadcast %cst_65 : f32 to vector<16x1xf32>
    %184 = arith.addf %180, %183 : vector<16x1xf32>
    %185 = math.rsqrt %184 : vector<16x1xf32>
    %186 = vector.broadcast %185 : vector<16x1xf32> to vector<16x32xf32>
    %187 = arith.mulf %182, %186 : vector<16x32xf32>
    %188 = vector.broadcast %166 : vector<1x32xf32> to vector<16x32xf32>
    %189 = arith.mulf %187, %188 : vector<16x32xf32>
    %190 = vector.broadcast %167 : vector<1x32xf32> to vector<16x32xf32>
    %191 = arith.addf %189, %190 : vector<16x32xf32>
    %c1 = arith.constant 1 : index
    %c0_66 = arith.constant 0 : index
    %c0_67 = arith.constant 0 : index
    %192 = vector.load %arg9[%c1, %c0_66, %c0_67] : memref<2x6x32xf32, #tpu.memory_space<vmem>>, vector<1x6x32xf32>
    %193 = vector.shape_cast %192 : vector<1x6x32xf32> to vector<6x32xf32>
    %194 = arith.truncf %191 : vector<16x32xf32> to vector<16x32xbf16>
    %c1_68 = arith.constant 1 : index
    %c0_69 = arith.constant 0 : index
    %c0_70 = arith.constant 0 : index
    %195 = vector.load %arg3[%c1_68, %c0_69, %c0_70] : memref<2x32x96xbf16, #tpu.memory_space<vmem>>, vector<1x32x96xbf16>
    %196 = vector.shape_cast %195 : vector<1x32x96xbf16> to vector<32x96xbf16>
    %cst_71 = arith.constant dense<0.000000e+00> : vector<16x96xf32>
    %197 = tpu.matmul %194, %196, %cst_71 {dimension_numbers = #tpu.dot_dimension_numbers<[1], [0], [0], [1], [0, 0, 1, 1], [], []>} : vector<16x32xbf16>, vector<32x96xbf16>, vector<16x96xf32> -> vector<16x96xf32>
    %c1_72 = arith.constant 1 : index
    %c0_73 = arith.constant 0 : index
    %c0_74 = arith.constant 0 : index
    %198 = vector.load %arg4[%c1_72, %c0_73, %c0_74] : memref<2x1x96xf32, #tpu.memory_space<vmem>>, vector<1x1x96xf32>
    %199 = vector.shape_cast %198 : vector<1x1x96xf32> to vector<1x96xf32>
    %200 = vector.broadcast %199 : vector<1x96xf32> to vector<16x96xf32>
    %201 = arith.addf %197, %200 : vector<16x96xf32>
    %202 = vector.extract_strided_slice %201 {offsets = [0, 0], sizes = [16, 8], strides = [1, 1]} : vector<16x96xf32> to vector<16x8xf32>
    %203 = vector.shape_cast %202 : vector<16x8xf32> to vector<2x8x8xf32>
    %204 = arith.truncf %203 : vector<2x8x8xf32> to vector<2x8x8xbf16>
    %205 = vector.extract_strided_slice %201 {offsets = [0, 32], sizes = [16, 8], strides = [1, 1]} : vector<16x96xf32> to vector<16x8xf32>
    %206 = vector.shape_cast %205 : vector<16x8xf32> to vector<2x8x8xf32>
    %207 = arith.truncf %206 : vector<2x8x8xf32> to vector<2x8x8xbf16>
    %208 = vector.extract_strided_slice %201 {offsets = [0, 64], sizes = [16, 8], strides = [1, 1]} : vector<16x96xf32> to vector<16x8xf32>
    %209 = vector.shape_cast %208 : vector<16x8xf32> to vector<2x8x8xf32>
    %210 = arith.truncf %209 : vector<2x8x8xf32> to vector<2x8x8xbf16>
    "tpu.trace_start"() <{level = 10 : i32, message = "bqd,bkd->bqk"}> : () -> ()
    %cst_75 = arith.constant dense<0.000000e+00> : vector<2x8x8xf32>
    %211 = tpu.matmul %204, %207, %cst_75 {dimension_numbers = #tpu.dot_dimension_numbers<[2], [2], [1], [1], [0, 0, 0, 1, 1, 1], [0], [0]>} : vector<2x8x8xbf16>, vector<2x8x8xbf16>, vector<2x8x8xf32> -> vector<2x8x8xf32>
    "tpu.trace_stop"() : () -> ()
    %cst_76 = arith.constant dense<0xFF800000> : vector<2x8xf32>
    %212 = vector.multi_reduction <maximumf>, %211, %cst_76 [2] : vector<2x8x8xf32> to vector<2x8xf32>
    %213 = vector.shape_cast %212 : vector<2x8xf32> to vector<2x8x1xf32>
    %214 = vector.broadcast %213 : vector<2x8x1xf32> to vector<2x8x8xf32>
    %215 = arith.subf %211, %214 : vector<2x8x8xf32>
    %216 = math.exp %215 : vector<2x8x8xf32>
    %cst_77 = arith.constant dense<0.000000e+00> : vector<2x8xf32>
    %217 = vector.multi_reduction <add>, %216, %cst_77 [2] : vector<2x8x8xf32> to vector<2x8xf32>
    %218 = vector.shape_cast %217 : vector<2x8xf32> to vector<2x8x1xf32>
    %219 = tpu.reciprocal %218 {approx = true} : vector<2x8x1xf32> -> vector<2x8x1xf32>
    %220 = vector.broadcast %219 : vector<2x8x1xf32> to vector<2x8x8xf32>
    %221 = arith.mulf %216, %220 : vector<2x8x8xf32>
    %222 = arith.truncf %221 : vector<2x8x8xf32> to vector<2x8x8xbf16>
    "tpu.trace_start"() <{level = 10 : i32, message = "bqk,bkd->bqd"}> : () -> ()
    %cst_78 = arith.constant dense<0.000000e+00> : vector<2x8x8xf32>
    %223 = tpu.matmul %222, %210, %cst_78 {dimension_numbers = #tpu.dot_dimension_numbers<[2], [1], [1], [2], [0, 0, 0, 1, 1, 2], [0], [0]>} : vector<2x8x8xbf16>, vector<2x8x8xbf16>, vector<2x8x8xf32> -> vector<2x8x8xf32>
    "tpu.trace_stop"() : () -> ()
    %224 = vector.shape_cast %223 : vector<2x8x8xf32> to vector<16x8xf32>
    %c0_79 = arith.constant 0 : index
    %c0_80 = arith.constant 0 : index
    %225 = vector.load %arg13[%c0_79, %c0_80] : memref<16x32xf32, #tpu.memory_space<vmem>>, vector<16x8xf32>
    tpu.vector_store %arg13[%c0_79, %c0_80], %224 {strides = array<i32>} : memref<16x32xf32, #tpu.memory_space<vmem>>, vector<16x8xf32>,
    %226 = vector.extract_strided_slice %201 {offsets = [0, 8], sizes = [16, 8], strides = [1, 1]} : vector<16x96xf32> to vector<16x8xf32>
    %227 = vector.shape_cast %226 : vector<16x8xf32> to vector<2x8x8xf32>
    %228 = arith.truncf %227 : vector<2x8x8xf32> to vector<2x8x8xbf16>
    %229 = vector.extract_strided_slice %201 {offsets = [0, 40], sizes = [16, 8], strides = [1, 1]} : vector<16x96xf32> to vector<16x8xf32>
    %230 = vector.shape_cast %229 : vector<16x8xf32> to vector<2x8x8xf32>
    %231 = arith.truncf %230 : vector<2x8x8xf32> to vector<2x8x8xbf16>
    %232 = vector.extract_strided_slice %201 {offsets = [0, 72], sizes = [16, 8], strides = [1, 1]} : vector<16x96xf32> to vector<16x8xf32>
    %233 = vector.shape_cast %232 : vector<16x8xf32> to vector<2x8x8xf32>
    %234 = arith.truncf %233 : vector<2x8x8xf32> to vector<2x8x8xbf16>
    "tpu.trace_start"() <{level = 10 : i32, message = "bqd,bkd->bqk"}> : () -> ()
    %cst_81 = arith.constant dense<0.000000e+00> : vector<2x8x8xf32>
    %235 = tpu.matmul %228, %231, %cst_81 {dimension_numbers = #tpu.dot_dimension_numbers<[2], [2], [1], [1], [0, 0, 0, 1, 1, 1], [0], [0]>} : vector<2x8x8xbf16>, vector<2x8x8xbf16>, vector<2x8x8xf32> -> vector<2x8x8xf32>
    "tpu.trace_stop"() : () -> ()
    %cst_82 = arith.constant dense<0xFF800000> : vector<2x8xf32>
    %236 = vector.multi_reduction <maximumf>, %235, %cst_82 [2] : vector<2x8x8xf32> to vector<2x8xf32>
    %237 = vector.shape_cast %236 : vector<2x8xf32> to vector<2x8x1xf32>
    %238 = vector.broadcast %237 : vector<2x8x1xf32> to vector<2x8x8xf32>
    %239 = arith.subf %235, %238 : vector<2x8x8xf32>
    %240 = math.exp %239 : vector<2x8x8xf32>
    %cst_83 = arith.constant dense<0.000000e+00> : vector<2x8xf32>
    %241 = vector.multi_reduction <add>, %240, %cst_83 [2] : vector<2x8x8xf32> to vector<2x8xf32>
    %242 = vector.shape_cast %241 : vector<2x8xf32> to vector<2x8x1xf32>
    %243 = tpu.reciprocal %242 {approx = true} : vector<2x8x1xf32> -> vector<2x8x1xf32>
    %244 = vector.broadcast %243 : vector<2x8x1xf32> to vector<2x8x8xf32>
    %245 = arith.mulf %240, %244 : vector<2x8x8xf32>
    %246 = arith.truncf %245 : vector<2x8x8xf32> to vector<2x8x8xbf16>
    "tpu.trace_start"() <{level = 10 : i32, message = "bqk,bkd->bqd"}> : () -> ()
    %cst_84 = arith.constant dense<0.000000e+00> : vector<2x8x8xf32>
    %247 = tpu.matmul %246, %234, %cst_84 {dimension_numbers = #tpu.dot_dimension_numbers<[2], [1], [1], [2], [0, 0, 0, 1, 1, 2], [0], [0]>} : vector<2x8x8xbf16>, vector<2x8x8xbf16>, vector<2x8x8xf32> -> vector<2x8x8xf32>
    "tpu.trace_stop"() : () -> ()
    %248 = vector.shape_cast %247 : vector<2x8x8xf32> to vector<16x8xf32>
    %c0_85 = arith.constant 0 : index
    %c8_86 = arith.constant 8 : index
    %249 = vector.load %arg13[%c0_85, %c8_86] : memref<16x32xf32, #tpu.memory_space<vmem>>, vector<16x8xf32>
    tpu.vector_store %arg13[%c0_85, %c8_86], %248 {strides = array<i32>} : memref<16x32xf32, #tpu.memory_space<vmem>>, vector<16x8xf32>,
    %250 = vector.extract_strided_slice %201 {offsets = [0, 16], sizes = [16, 8], strides = [1, 1]} : vector<16x96xf32> to vector<16x8xf32>
    %251 = vector.shape_cast %250 : vector<16x8xf32> to vector<2x8x8xf32>
    %252 = arith.truncf %251 : vector<2x8x8xf32> to vector<2x8x8xbf16>
    %253 = vector.extract_strided_slice %201 {offsets = [0, 48], sizes = [16, 8], strides = [1, 1]} : vector<16x96xf32> to vector<16x8xf32>
    %254 = vector.shape_cast %253 : vector<16x8xf32> to vector<2x8x8xf32>
    %255 = arith.truncf %254 : vector<2x8x8xf32> to vector<2x8x8xbf16>
    %256 = vector.extract_strided_slice %201 {offsets = [0, 80], sizes = [16, 8], strides = [1, 1]} : vector<16x96xf32> to vector<16x8xf32>
    %257 = vector.shape_cast %256 : vector<16x8xf32> to vector<2x8x8xf32>
    %258 = arith.truncf %257 : vector<2x8x8xf32> to vector<2x8x8xbf16>
    "tpu.trace_start"() <{level = 10 : i32, message = "bqd,bkd->bqk"}> : () -> ()
    %cst_87 = arith.constant dense<0.000000e+00> : vector<2x8x8xf32>
    %259 = tpu.matmul %252, %255, %cst_87 {dimension_numbers = #tpu.dot_dimension_numbers<[2], [2], [1], [1], [0, 0, 0, 1, 1, 1], [0], [0]>} : vector<2x8x8xbf16>, vector<2x8x8xbf16>, vector<2x8x8xf32> -> vector<2x8x8xf32>
    "tpu.trace_stop"() : () -> ()
    %cst_88 = arith.constant dense<0xFF800000> : vector<2x8xf32>
    %260 = vector.multi_reduction <maximumf>, %259, %cst_88 [2] : vector<2x8x8xf32> to vector<2x8xf32>
    %261 = vector.shape_cast %260 : vector<2x8xf32> to vector<2x8x1xf32>
    %262 = vector.broadcast %261 : vector<2x8x1xf32> to vector<2x8x8xf32>
    %263 = arith.subf %259, %262 : vector<2x8x8xf32>
    %264 = math.exp %263 : vector<2x8x8xf32>
    %cst_89 = arith.constant dense<0.000000e+00> : vector<2x8xf32>
    %265 = vector.multi_reduction <add>, %264, %cst_89 [2] : vector<2x8x8xf32> to vector<2x8xf32>
    %266 = vector.shape_cast %265 : vector<2x8xf32> to vector<2x8x1xf32>
    %267 = tpu.reciprocal %266 {approx = true} : vector<2x8x1xf32> -> vector<2x8x1xf32>
    %268 = vector.broadcast %267 : vector<2x8x1xf32> to vector<2x8x8xf32>
    %269 = arith.mulf %264, %268 : vector<2x8x8xf32>
    %270 = arith.truncf %269 : vector<2x8x8xf32> to vector<2x8x8xbf16>
    "tpu.trace_start"() <{level = 10 : i32, message = "bqk,bkd->bqd"}> : () -> ()
    %cst_90 = arith.constant dense<0.000000e+00> : vector<2x8x8xf32>
    %271 = tpu.matmul %270, %258, %cst_90 {dimension_numbers = #tpu.dot_dimension_numbers<[2], [1], [1], [2], [0, 0, 0, 1, 1, 2], [0], [0]>} : vector<2x8x8xbf16>, vector<2x8x8xbf16>, vector<2x8x8xf32> -> vector<2x8x8xf32>
    "tpu.trace_stop"() : () -> ()
    %272 = vector.shape_cast %271 : vector<2x8x8xf32> to vector<16x8xf32>
    %c0_91 = arith.constant 0 : index
    %c16_92 = arith.constant 16 : index
    %273 = vector.load %arg13[%c0_91, %c16_92] : memref<16x32xf32, #tpu.memory_space<vmem>>, vector<16x8xf32>
    tpu.vector_store %arg13[%c0_91, %c16_92], %272 {strides = array<i32>} : memref<16x32xf32, #tpu.memory_space<vmem>>, vector<16x8xf32>,
    %274 = vector.extract_strided_slice %201 {offsets = [0, 24], sizes = [16, 8], strides = [1, 1]} : vector<16x96xf32> to vector<16x8xf32>
    %275 = vector.shape_cast %274 : vector<16x8xf32> to vector<2x8x8xf32>
    %276 = arith.truncf %275 : vector<2x8x8xf32> to vector<2x8x8xbf16>
    %277 = vector.extract_strided_slice %201 {offsets = [0, 56], sizes = [16, 8], strides = [1, 1]} : vector<16x96xf32> to vector<16x8xf32>
    %278 = vector.shape_cast %277 : vector<16x8xf32> to vector<2x8x8xf32>
    %279 = arith.truncf %278 : vector<2x8x8xf32> to vector<2x8x8xbf16>
    %280 = vector.extract_strided_slice %201 {offsets = [0, 88], sizes = [16, 8], strides = [1, 1]} : vector<16x96xf32> to vector<16x8xf32>
    %281 = vector.shape_cast %280 : vector<16x8xf32> to vector<2x8x8xf32>
    %282 = arith.truncf %281 : vector<2x8x8xf32> to vector<2x8x8xbf16>
    "tpu.trace_start"() <{level = 10 : i32, message = "bqd,bkd->bqk"}> : () -> ()
    %cst_93 = arith.constant dense<0.000000e+00> : vector<2x8x8xf32>
    %283 = tpu.matmul %276, %279, %cst_93 {dimension_numbers = #tpu.dot_dimension_numbers<[2], [2], [1], [1], [0, 0, 0, 1, 1, 1], [0], [0]>} : vector<2x8x8xbf16>, vector<2x8x8xbf16>, vector<2x8x8xf32> -> vector<2x8x8xf32>
    "tpu.trace_stop"() : () -> ()
    %cst_94 = arith.constant dense<0xFF800000> : vector<2x8xf32>
    %284 = vector.multi_reduction <maximumf>, %283, %cst_94 [2] : vector<2x8x8xf32> to vector<2x8xf32>
    %285 = vector.shape_cast %284 : vector<2x8xf32> to vector<2x8x1xf32>
    %286 = vector.broadcast %285 : vector<2x8x1xf32> to vector<2x8x8xf32>
    %287 = arith.subf %283, %286 : vector<2x8x8xf32>
    %288 = math.exp %287 : vector<2x8x8xf32>
    %cst_95 = arith.constant dense<0.000000e+00> : vector<2x8xf32>
    %289 = vector.multi_reduction <add>, %288, %cst_95 [2] : vector<2x8x8xf32> to vector<2x8xf32>
    %290 = vector.shape_cast %289 : vector<2x8xf32> to vector<2x8x1xf32>
    %291 = tpu.reciprocal %290 {approx = true} : vector<2x8x1xf32> -> vector<2x8x1xf32>
    %292 = vector.broadcast %291 : vector<2x8x1xf32> to vector<2x8x8xf32>
    %293 = arith.mulf %288, %292 : vector<2x8x8xf32>
    %294 = arith.truncf %293 : vector<2x8x8xf32> to vector<2x8x8xbf16>
    "tpu.trace_start"() <{level = 10 : i32, message = "bqk,bkd->bqd"}> : () -> ()
    %cst_96 = arith.constant dense<0.000000e+00> : vector<2x8x8xf32>
    %295 = tpu.matmul %294, %282, %cst_96 {dimension_numbers = #tpu.dot_dimension_numbers<[2], [1], [1], [2], [0, 0, 0, 1, 1, 2], [0], [0]>} : vector<2x8x8xbf16>, vector<2x8x8xbf16>, vector<2x8x8xf32> -> vector<2x8x8xf32>
    "tpu.trace_stop"() : () -> ()
    %296 = vector.shape_cast %295 : vector<2x8x8xf32> to vector<16x8xf32>
    %c0_97 = arith.constant 0 : index
    %c24_98 = arith.constant 24 : index
    %297 = vector.load %arg13[%c0_97, %c24_98] : memref<16x32xf32, #tpu.memory_space<vmem>>, vector<16x8xf32>
    tpu.vector_store %arg13[%c0_97, %c24_98], %296 {strides = array<i32>} : memref<16x32xf32, #tpu.memory_space<vmem>>, vector<16x8xf32>,
    %c0_99 = arith.constant 0 : index
    %c0_100 = arith.constant 0 : index
    %298 = vector.load %arg13[%c0_99, %c0_100] : memref<16x32xf32, #tpu.memory_space<vmem>>, vector<16x32xf32>
    %299 = arith.truncf %298 : vector<16x32xf32> to vector<16x32xbf16>
    %c1_101 = arith.constant 1 : index
    %c0_102 = arith.constant 0 : index
    %c0_103 = arith.constant 0 : index
    %300 = vector.load %arg5[%c1_101, %c0_102, %c0_103] : memref<2x32x32xbf16, #tpu.memory_space<vmem>>, vector<1x32x32xbf16>
    %301 = vector.shape_cast %300 : vector<1x32x32xbf16> to vector<32x32xbf16>
    %cst_104 = arith.constant dense<0.000000e+00> : vector<16x32xf32>
    %302 = tpu.matmul %299, %301, %cst_104 {dimension_numbers = #tpu.dot_dimension_numbers<[1], [0], [0], [1], [0, 0, 1, 1], [], []>} : vector<16x32xbf16>, vector<32x32xbf16>, vector<16x32xf32> -> vector<16x32xf32>
    %303 = vector.extract_strided_slice %193 {offsets = [0, 0], sizes = [1, 32], strides = [1, 1]} : vector<6x32xf32> to vector<1x32xf32>
    %304 = vector.broadcast %303 : vector<1x32xf32> to vector<16x32xf32>
    %305 = arith.addf %302, %304 : vector<16x32xf32>
    %306 = arith.addf %191, %305 : vector<16x32xf32>
    %307 = vector.extract_strided_slice %193 {offsets = [1, 0], sizes = [1, 32], strides = [1, 1]} : vector<6x32xf32> to vector<1x32xf32>
    %308 = vector.extract_strided_slice %193 {offsets = [2, 0], sizes = [1, 32], strides = [1, 1]} : vector<6x32xf32> to vector<1x32xf32>
    %cst_105 = arith.constant dense<0.000000e+00> : vector<16xf32>
    %309 = vector.multi_reduction <add>, %306, %cst_105 [1] : vector<16x32xf32> to vector<16xf32>
    %310 = vector.shape_cast %309 : vector<16xf32> to vector<16x1xf32>
    %311 = arith.mulf %306, %306 : vector<16x32xf32>
    %cst_106 = arith.constant dense<0.000000e+00> : vector<16xf32>
    %312 = vector.multi_reduction <add>, %311, %cst_106 [1] : vector<16x32xf32> to vector<16xf32>
    %313 = vector.shape_cast %312 : vector<16xf32> to vector<16x1xf32>
    %cst_107 = arith.constant 3.125000e-02 : f32
    %314 = vector.broadcast %cst_107 : f32 to vector<16x1xf32>
    %315 = arith.mulf %310, %314 : vector<16x1xf32>
    %cst_108 = arith.constant 3.125000e-02 : f32
    %316 = vector.broadcast %cst_108 : f32 to vector<16x1xf32>
    %317 = arith.mulf %313, %316 : vector<16x1xf32>
    %318 = arith.mulf %315, %315 : vector<16x1xf32>
    %319 = arith.subf %317, %318 : vector<16x1xf32>
    %cst_109 = arith.constant 0.000000e+00 : f32
    %320 = vector.broadcast %cst_109 : f32 to vector<16x1xf32>
    %321 = arith.maximumf %319, %320 : vector<16x1xf32>
    %322 = vector.broadcast %315 : vector<16x1xf32> to vector<16x32xf32>
    %323 = arith.subf %306, %322 : vector<16x32xf32>
    %cst_110 = arith.constant 9.99999974E-6 : f32
    %324 = vector.broadcast %cst_110 : f32 to vector<16x1xf32>
    %325 = arith.addf %321, %324 : vector<16x1xf32>
    %326 = math.rsqrt %325 : vector<16x1xf32>
    %327 = vector.broadcast %326 : vector<16x1xf32> to vector<16x32xf32>
    %328 = arith.mulf %323, %327 : vector<16x32xf32>
    %329 = vector.broadcast %307 : vector<1x32xf32> to vector<16x32xf32>
    %330 = arith.mulf %328, %329 : vector<16x32xf32>
    %331 = vector.broadcast %308 : vector<1x32xf32> to vector<16x32xf32>
    %332 = arith.addf %330, %331 : vector<16x32xf32>
    %333 = arith.truncf %332 : vector<16x32xf32> to vector<16x32xbf16>
    %c1_111 = arith.constant 1 : index
    %c0_112 = arith.constant 0 : index
    %c0_113 = arith.constant 0 : index
    %334 = vector.load %arg6[%c1_111, %c0_112, %c0_113] : memref<2x32x2048xbf16, #tpu.memory_space<vmem>>, vector<1x32x2048xbf16>
    %335 = vector.shape_cast %334 : vector<1x32x2048xbf16> to vector<32x2048xbf16>
    %cst_114 = arith.constant dense<0.000000e+00> : vector<16x2048xf32>
    %336 = tpu.matmul %333, %335, %cst_114 {dimension_numbers = #tpu.dot_dimension_numbers<[1], [0], [0], [1], [0, 0, 1, 1], [], []>} : vector<16x32xbf16>, vector<32x2048xbf16>, vector<16x2048xf32> -> vector<16x2048xf32>
    %c1_115 = arith.constant 1 : index
    %c0_116 = arith.constant 0 : index
    %c0_117 = arith.constant 0 : index
    %337 = vector.load %arg7[%c1_115, %c0_116, %c0_117] : memref<2x1x2048xf32, #tpu.memory_space<vmem>>, vector<1x1x2048xf32>
    %338 = vector.shape_cast %337 : vector<1x1x2048xf32> to vector<1x2048xf32>
    %339 = vector.broadcast %338 : vector<1x2048xf32> to vector<16x2048xf32>
    %340 = arith.addf %336, %339 : vector<16x2048xf32>
    %cst_118 = arith.constant 0.000000e+00 : f32
    %341 = vector.broadcast %cst_118 : f32 to vector<16x2048xf32>
    %342 = arith.maximumf %340, %341 : vector<16x2048xf32>
    %343 = arith.truncf %342 : vector<16x2048xf32> to vector<16x2048xbf16>
    %c1_119 = arith.constant 1 : index
    %c0_120 = arith.constant 0 : index
    %c0_121 = arith.constant 0 : index
    %344 = vector.load %arg8[%c1_119, %c0_120, %c0_121] : memref<2x2048x32xbf16, #tpu.memory_space<vmem>>, vector<1x2048x32xbf16>
    %345 = vector.shape_cast %344 : vector<1x2048x32xbf16> to vector<2048x32xbf16>
    %cst_122 = arith.constant dense<0.000000e+00> : vector<16x32xf32>
    %346 = tpu.matmul %343, %345, %cst_122 {dimension_numbers = #tpu.dot_dimension_numbers<[1], [0], [0], [1], [0, 0, 1, 1], [], []>} : vector<16x2048xbf16>, vector<2048x32xbf16>, vector<16x32xf32> -> vector<16x32xf32>
    %347 = vector.extract_strided_slice %193 {offsets = [3, 0], sizes = [1, 32], strides = [1, 1]} : vector<6x32xf32> to vector<1x32xf32>
    %348 = vector.broadcast %347 : vector<1x32xf32> to vector<16x32xf32>
    %349 = arith.addf %346, %348 : vector<16x32xf32>
    %350 = arith.addf %332, %349 : vector<16x32xf32>
    %351 = vector.extract_strided_slice %193 {offsets = [4, 0], sizes = [1, 32], strides = [1, 1]} : vector<6x32xf32> to vector<1x32xf32>
    %352 = vector.extract_strided_slice %193 {offsets = [5, 0], sizes = [1, 32], strides = [1, 1]} : vector<6x32xf32> to vector<1x32xf32>
    %cst_123 = arith.constant dense<0.000000e+00> : vector<16xf32>
    %353 = vector.multi_reduction <add>, %350, %cst_123 [1] : vector<16x32xf32> to vector<16xf32>
    %354 = vector.shape_cast %353 : vector<16xf32> to vector<16x1xf32>
    %355 = arith.mulf %350, %350 : vector<16x32xf32>
    %cst_124 = arith.constant dense<0.000000e+00> : vector<16xf32>
    %356 = vector.multi_reduction <add>, %355, %cst_124 [1] : vector<16x32xf32> to vector<16xf32>
    %357 = vector.shape_cast %356 : vector<16xf32> to vector<16x1xf32>
    %cst_125 = arith.constant 3.125000e-02 : f32
    %358 = vector.broadcast %cst_125 : f32 to vector<16x1xf32>
    %359 = arith.mulf %354, %358 : vector<16x1xf32>
    %cst_126 = arith.constant 3.125000e-02 : f32
    %360 = vector.broadcast %cst_126 : f32 to vector<16x1xf32>
    %361 = arith.mulf %357, %360 : vector<16x1xf32>
    %362 = arith.mulf %359, %359 : vector<16x1xf32>
    %363 = arith.subf %361, %362 : vector<16x1xf32>
    %cst_127 = arith.constant 0.000000e+00 : f32
    %364 = vector.broadcast %cst_127 : f32 to vector<16x1xf32>
    %365 = arith.maximumf %363, %364 : vector<16x1xf32>
    %366 = vector.broadcast %359 : vector<16x1xf32> to vector<16x32xf32>
    %367 = arith.subf %350, %366 : vector<16x32xf32>
    %cst_128 = arith.constant 9.99999974E-6 : f32
    %368 = vector.broadcast %cst_128 : f32 to vector<16x1xf32>
    %369 = arith.addf %365, %368 : vector<16x1xf32>
    %370 = math.rsqrt %369 : vector<16x1xf32>
    %371 = vector.broadcast %370 : vector<16x1xf32> to vector<16x32xf32>
    %372 = arith.mulf %367, %371 : vector<16x32xf32>
    %373 = vector.broadcast %351 : vector<1x32xf32> to vector<16x32xf32>
    %374 = arith.mulf %372, %373 : vector<16x32xf32>
    %375 = vector.broadcast %352 : vector<1x32xf32> to vector<16x32xf32>
    %376 = arith.addf %374, %375 : vector<16x32xf32>
    %377 = vector.shape_cast %376 : vector<16x32xf32> to vector<2x8x32xf32>
    %cst_129 = arith.constant dense<0xFF800000> : vector<2x32xf32>
    %378 = vector.multi_reduction <maximumf>, %377, %cst_129 [1] : vector<2x8x32xf32> to vector<2x32xf32>
    %379 = arith.truncf %378 : vector<2x32xf32> to vector<2x32xbf16>
    %c0_130 = arith.constant 0 : index
    %c0_131 = arith.constant 0 : index
    %380 = vector.load %arg10[%c0_130, %c0_131] : memref<32x10xbf16, #tpu.memory_space<vmem>>, vector<32x10xbf16>
    %cst_132 = arith.constant dense<0.000000e+00> : vector<2x10xf32>
    %381 = tpu.matmul %379, %380, %cst_132 {dimension_numbers = #tpu.dot_dimension_numbers<[1], [0], [0], [1], [0, 0, 1, 1], [], []>} : vector<2x32xbf16>, vector<32x10xbf16>, vector<2x10xf32> -> vector<2x10xf32>
    %c0_133 = arith.constant 0 : index
    %c0_134 = arith.constant 0 : index
    %382 = vector.load %arg11[%c0_133, %c0_134] : memref<1x10xf32, #tpu.memory_space<vmem>>, vector<1x10xf32>
    %383 = vector.broadcast %382 : vector<1x10xf32> to vector<2x10xf32>
    %384 = arith.addf %381, %383 : vector<2x10xf32>
    %c0_135 = arith.constant 0 : index
    %c0_136 = arith.constant 0 : index
    %385 = vector.load %arg12[%c0_135, %c0_136] : memref<2x10xf32, #tpu.memory_space<vmem>>, vector<2x10xf32>
    tpu.vector_store %arg12[%c0_135, %c0_136], %384 {strides = array<i32>} : memref<2x10xf32, #tpu.memory_space<vmem>>, vector<2x10xf32>,
    return
  }
}

</mosaic_0001>

<bundles_post_ra>
// kernel: transformer_encoder_forward.1
= control target key start
LH: loop header
LB: loop body
LE: loop exit
PB: predicated region body
PF: predicated region fallthrough
CT: control target
= control target key end

     0   :  { %v8311_v1 = vmov 0.0   ;;  %vm61_vm0 = vcmask 130048   ;;  %vm8312_vm1 = vmmov 0   ;;  %s10097_s0 = inlined_call_operand.vmem [shape: f32[16,16], index: 0, kind: input, shape index: {}]   ;;  %s10098_s1 = inlined_call_operand.vmem [shape: bf16[16,32], index: 1, kind: input, shape index: {}]   ;;  %s10099_s2 = inlined_call_operand.vmem [shape: f32[1,32], index: 2, kind: input, shape index: {}]   ;;  %s10100_s3 = inlined_call_operand.vmem [shape: bf16[2,32,96], index: 3, kind: input, shape index: {}]   ;;  %s10101_s4 = inlined_call_operand.vmem [shape: f32[2,1,96], index: 4, kind: input, shape index: {}]   ;;  %s10102_s5 = inlined_call_operand.vmem [shape: bf16[2,32,32], index: 5, kind: input, shape index: {}]   ;;  %s10103_s6 = inlined_call_operand.vmem [shape: bf16[2,32,2048], index: 6, kind: input, shape index: {}]   ;;  %s10104_s7 = inlined_call_operand.vmem [shape: f32[2,1,2048], index: 7, kind: input, shape index: {}]   ;;  %s10105_s8 = inlined_call_operand.vmem [shape: bf16[2,2048,32], index: 8, kind: input, shape index: {}]   ;;  %s10106_s9 = inlined_call_operand.vmem [shape: f32[2,6,32], index: 9, kind: input, shape index: {}]   ;;  %s10107_s10 = inlined_call_operand.vmem [shape: bf16[32,10], index: 10, kind: input, shape index: {}]   ;;  %s10108_s11 = inlined_call_operand.vmem [shape: f32[1,10], index: 11, kind: input, shape index: {}]   ;;  %s10109_s12 = inlined_call_operand.hbm [shape: f32[2,10], index: 12, kind: output, shape index: {}]  }
   0x1   :  { %v7938_v0 = vld [vmem:[%s10098_s1] sm:$0xff]   ;;  %7682 = vmatprep.subr.bf16.mxu0 %v8311_v1  ;;  %v44_v3 = vld [vmem:[%s10097_s0 + $0x8] sm:$0xff]  ;;  %7688 = vmatprep.subr.bf16.mxu1 %v8311_v1 }
   0x2   :  { %v43_v2 = vld [vmem:[%s10097_s0] sm:$0xff]  ;;  %7683 = vmatpush3.bf16.msra.mxu0 %v7938_v0  ;;  %7684 = vmatprep.mubr.msk.bf16.mxu0 %vm8312_vm1, %v8311_v1  ;;  %v7940_v6 = vld [vmem:[%s10100_s3 + $0x8] sm:$0xff]  }
   0x3   :  { %v45_v4 = vpack.c.bf16 %v44_v3, %v43_v2  ;;  %7692 = vmatprep.mubr.msk.bf16.mxu1 %vm8312_vm1, %v8311_v1  ;;  %7696 = vmatprep.subr.bf16.mxu0 %v8311_v1  ;;  %v7939_v5 = vld [vmem:[%s10100_s3] sm:$0xff]  }
   0x4   :  { %7689 = vmatpush3.bf16.msra.mxu1 %v7939_v5 }
   0x5   :  { %7685 = vmatmul.mubr.msk.bf16.vlgmr.msra.gmra.mrb[0].mxu0 %vm61_vm0, %v45_v4  ;;  %7690 = vmatprep.subr.bf16.mxu1 %v8311_v1 }
   0x6   :  { %7698 = vmatprep.mubr.msk.bf16.mxu0 %vm8312_vm1, %v8311_v1 }
   0x8   :  { %7691 = vmatpush3.bf16.msra.mxu1 %v7940_v6 }
   0x9   :  { %7702 = vmatprep.subr.bf16.mxu1 %v8311_v1 }
   0xa   :  { %17 = vsyncpa [#allocation4], 0  ;;  %v6560_v7 = vld [vmem:[%s10099_s2] ss:$0 sm:$0xff]  ;;  %vm131_vm2 = vcmask 261120   ;;  %s8313_s2 = smov 96  }
   0xb   :  { %v6563_v15 = vld [vmem:[%s10101_s4] ss:$0 sm:$0xff]  ;;  %vm181_vm3 = vcmask 64512   ;;  %s8314_s15 = smov 64   ;;  %s8315_s16 = smov 88   ;;  %vm306_vm4 = vcmask 1043456  }
   0xc   :  { %s8316_s17 = smov 120   ;;  %s8317_s18 = smov 56   ;;  %vm628_vm5 = vcmask 130112   ;;  %vm859_vm6 = vcmask 195712   ;;  %vm1090_vm7 = vcmask 261312   ;;  %vm6486_vm8 = vcmask 1041409  }
   0xd   :  { %s8318_s19 = smov 80   ;;  %s8319_s20 = smov 112   ;;  %vm6544_vm9 = vcmask 74752  }
   0xe   :  { %s8320_s21 = smov 48   ;;  %s8321_s22 = smov 72  }
   0xf   :  { %s8322_s23 = smov 104   ;;  %s8323_s24 = smov 40  }
  0x10   :  { %s10114_s25 = smov 8   ;;  %s10112_s26 = smov 16  }
  0x11   :  { %s10110_s29 = smov 24  }
  0xd8   :  { %v99_v8 = vpop.f32.mrb[0].mxu0 }
  0xd9   :  { %v7686_v9 = vpop.f32.mrb[1].mxu0  ;;  %v8423_v11 = vadd.f32 %v6560_v7, %v99_v8 }
  0xda   :  { %v102_v10 = vpop.f32.mrb[2].mxu0 }
  0xdb   :  { %v8425_v12 = vadd.f32 %v6560_v7, %v102_v10  ;;  %v7687_v13 = vpop.f32.mrb[3].mxu0 }
  0xdd   :  { %v107_v14 = vpack.c.bf16 %v8425_v12, %v8423_v11 }
  0xdf   :  { %7693 = vmatmul.mubr.msk.bf16.vlgmr.msra.gmra.mrb[0].mxu1 %vm131_vm2, %v107_v14 }
  0xe0   :  { %7704 = vmatprep.mubr.msk.bf16.mxu1 %vm8312_vm1, %v8311_v1 }
 0x1b2   :  { %v169_v16 = vpop.f32.mrb[0].mxu1 }
 0x1b3   :  { %v170_v17 = vadd.f32 %v6563_v15, %v169_v16  ;;  %v7694_v18 = vpop.f32.mrb[1].mxu1 }
 0x1b4   :  { %v172_v19 = vpop.f32.mrb[2].mxu1 }
 0x1b5   :  { %v8435_v20 = vpack.c.bf16 %v170_v17, %v170_v17  ;;  %v173_v21 = vadd.f32 %v6563_v15, %v172_v19  ;;  %v7695_v22 = vpop.f32.mrb[3].mxu1 }
 0x1b7   :  { %179 = vrot.lane.b32.xlu0 %v8435_v20, %s8313_s2  ;;  %v8439_v23 = vpack.c.bf16 %v173_v21, %v173_v21 }
 0x1bb   :  { %229 = vrot.lane.b32.xlu0 %v8439_v23, %s8313_s2 }
 0x229   :  { %v180_v24 = vpop.permute.xlu0 %179 }
 0x22a   :  { %v186_v25 = vsel %vm181_vm3, %v180_v24, 0 }
 0x22b   :  { %7697 = vmatpush3.bf16.xpose.msra.mxu0 %v186_v25 }
 0x22c   :  { %7708 = vmatprep.subr.bf16.mxu0 %v8311_v1 }
 0x22d   :  { %v230_v26 = vpop.permute.xlu0 %229 }
 0x22e   :  { %v235_v27 = vsel %vm181_vm3, %v230_v26, 0 }
 0x22f   :  { %7703 = vmatpush3.bf16.xpose.msra.mxu1 %v235_v27 }
 0x230   :  { %7714 = vmatprep.subr.bf16.mxu1 %v8311_v1 }
 0x232   :  { %7699 = vmatmul.mubr.msk.bf16.vlgmr.msra.gmra.mrb[4].mxu0 %vm181_vm3, %v8435_v20 }
 0x233   :  { %7710 = vmatprep.mubr.msk.bf16.mxu0 %vm8312_vm1, %v8311_v1 }
 0x236   :  { %7705 = vmatmul.mubr.msk.bf16.vlgmr.msra.gmra.mrb[4].mxu1 %vm181_vm3, %v8439_v23 }
 0x237   :  { %7716 = vmatprep.mubr.msk.bf16.mxu1 %vm8312_vm1, %v8311_v1 }
 0x305   :  { %v222_v28 = vpop.f32.mrb[4].mxu0 }
 0x306   :  { %v7700_v29 = vpop.f32.mrb[5].mxu0  ;;  %v277_v30 = vsel %vm181_vm3, %v222_v28, -inf }
 0x307   :  { %278 = vmax.xlane.f32.xlu1 %v277_v30  ;;  %v225_v31 = vpop.f32.mrb[6].mxu0 }
 0x308   :  { %v7701_v32 = vpop.f32.mrb[7].mxu0 }
 0x309   :  { %v271_v33 = vpop.f32.mrb[4].mxu1 }
 0x30a   :  { %v7706_v34 = vpop.f32.mrb[5].mxu1  ;;  %v280_v35 = vsel %vm181_vm3, %v271_v33, -inf }
 0x30b   :  { %v274_v36 = vpop.f32.mrb[6].mxu1  ;;  %281 = vmax.xlane.f32.xlu1 %v280_v35 }
 0x30c   :  { %v7707_v37 = vpop.f32.mrb[7].mxu1 }
 0x31c   :  { %301 = vrot.lane.b32.xlu1 %v8435_v20, %s8314_s15 }
 0x320   :  { %350 = vrot.lane.b32.xlu1 %v8439_v23, %s8314_s15 }
 0x324   :  { %402 = vrot.lane.b32.xlu1 %v8435_v20, %s8315_s16 }
 0x394   :  { %v279_v38 = vpop.xlane.xlu1 %278 }
 0x395   :  { %v283_v39 = vsub.f32 %v222_v28, %v279_v38 }
 0x397   :  { %v285_v40 = vmul.f32 1.442695, %v283_v39 }
 0x398   :  { %v282_v41 = vpop.xlane.xlu1 %281 }
 0x399   :  { %8205 = vpow2.f32 %v285_v40  ;;  %v284_v42 = vsub.f32 %v271_v33, %v282_v41 }
 0x39b   :  { %v287_v43 = vmul.f32 1.442695, %v284_v42 }
 0x39c   :  { %v302_v44 = vpop.permute.xlu1 %301 }
 0x39d   :  { %8207 = vpow2.f32 %v287_v43  ;;  %v308_v45 = vsel %vm306_vm4, %v302_v44, 0 }
 0x39e   :  { %7709 = vmatpush3.bf16.msra.mxu0 %v308_v45 }
 0x39f   :  { %7720 = vmatprep.subr.bf16.mxu0 %v8311_v1 }
 0x3a0   :  { %v351_v46 = vpop.permute.xlu1 %350 }
 0x3a1   :  { %v356_v47 = vsel %vm306_vm4, %v351_v46, 0 }
 0x3a2   :  { %7715 = vmatpush3.bf16.msra.mxu1 %v356_v47 }
 0x3a3   :  { %v8206_v48 = vpop.eup %8205  ;;  %7726 = vmatprep.subr.bf16.mxu1 %v8311_v1 }
 0x3a4   :  { %v289_v49 = vsel %vm181_vm3, %v8206_v48, 0.0  ;;  %v403_v52 = vpop.permute.xlu1 %402 }
 0x3a5   :  { %290 = vadd.xlane.f32.xlu0 %v289_v49  ;;  %v408_v59 = vsel %vm181_vm3, %v403_v52, 0 }
 0x3a7   :  { %v8208_v50 = vpop.eup %8207 }
 0x3a8   :  { %v292_v51 = vsel %vm181_vm3, %v8208_v50, 0.0 }
 0x3a9   :  { %293 = vadd.xlane.f32.xlu1 %v292_v51 }
 0x3ba   :  { %452 = vrot.lane.b32.xlu1 %v8439_v23, %s8315_s16 }
 0x3bb   :  { %400 = vrot.lane.b32.xlu0 %v8435_v20, %s8316_s17 }
 0x3be   :  { %450 = vrot.lane.b32.xlu1 %v8439_v23, %s8316_s17 }
 0x432   :  { %v291_v53 = vpop.xlane.xlu0 %290 }
 0x433   :  { %8209 = vrcp.f32 %v291_v53 }
 0x436   :  { %v294_v54 = vpop.xlane.xlu1 %293  ;;  %v401_v0 = vpop.permute.xlu0 %400 }
 0x437   :  { %8211 = vrcp.f32 %v294_v54 }
 0x43a   :  { %v453_v61 = vpop.permute.xlu1 %452 }
 0x43b   :  { %v458_v63 = vsel %vm181_vm3, %v453_v61, 0 }
 0x43d   :  { %v8210_v55 = vpop.eup %8209 }
 0x43e   :  { %v297_v56 = vmul.f32 %v8210_v55, %v8206_v48  ;;  %v451_v2 = vpop.permute.xlu1 %450 }
 0x440   :  { %v299_v57 = vpack.c.bf16 %v297_v56, %v297_v56 }
 0x441   :  { %v8212_v58 = vpop.eup %8211 }
 0x442   :  { %7711 = vmatmul.mubr.msk.bf16.vlgmr.msra.gmra.mrb[8].mxu0 %vm181_vm3, %v299_v57  ;;  %v298_v60 = vmul.f32 %v8212_v58, %v8208_v50 }
 0x443   :  { %7721 = vmatpush3.bf16.xpose.msra.mxu0 %v408_v59  ;;  %7722 = vmatprep.mubr.msk.bf16.mxu0 %vm8312_vm1, %v8311_v1 }
 0x444   :  { %v300_v62 = vpack.c.bf16 %v298_v60, %v298_v60  ;;  %7732 = vmatprep.subr.bf16.mxu0 %v8311_v1 }
 0x446   :  { %7717 = vmatmul.mubr.msk.bf16.vlgmr.msra.gmra.mrb[8].mxu1 %vm181_vm3, %v300_v62 }
 0x447   :  { %7727 = vmatpush3.bf16.xpose.msra.mxu1 %v458_v63  ;;  %7728 = vmatprep.mubr.msk.bf16.mxu1 %vm8312_vm1, %v8311_v1 }
 0x448   :  { %7738 = vmatprep.subr.bf16.mxu1 %v8311_v1 }
 0x44a   :  { %7723 = vmatmul.mubr.msk.bf16.vlgmr.msra.gmra.mrb[12].mxu0 %vm181_vm3, %v401_v0 }
 0x44b   :  { %7734 = vmatprep.mubr.msk.bf16.mxu0 %vm8312_vm1, %v8311_v1 }
 0x44e   :  { %7729 = vmatmul.mubr.msk.bf16.vlgmr.msra.gmra.mrb[12].mxu1 %vm181_vm3, %v451_v2 }
 0x44f   :  { %7740 = vmatprep.mubr.msk.bf16.mxu1 %vm8312_vm1, %v8311_v1 }
 0x515   :  { %v344_v3 = vpop.f32.mrb[8].mxu0 }
 0x516   :  { %398 = vst.msk [vmem:[#allocation2] sm:$0xff] %vm181_vm3, %v344_v3  ;;  %v7712_v4 = vpop.f32.mrb[9].mxu0 }
 0x517   :  { %v347_v5 = vpop.f32.mrb[10].mxu0 }
 0x518   :  { %v7713_v6 = vpop.f32.mrb[11].mxu0 }
 0x519   :  { %v392_v7 = vpop.f32.mrb[8].mxu1 }
 0x51a   :  { %399 = vst.msk [vmem:[#allocation2 + $0x8] sm:$0xff] %vm181_vm3, %v392_v7  ;;  %v7718_v8 = vpop.f32.mrb[9].mxu1 }
 0x51b   :  { %v395_v9 = vpop.f32.mrb[10].mxu1 }
 0x51c   :  { %v7719_v10 = vpop.f32.mrb[11].mxu1 }
 0x51d   :  { %v444_v13 = vpop.f32.mrb[12].mxu0 }
 0x51e   :  { %v7724_v14 = vpop.f32.mrb[13].mxu0  ;;  %v500_v15 = vsel %vm181_vm3, %v444_v13, -inf }
 0x51f   :  { %501 = vmax.xlane.f32.xlu1 %v500_v15  ;;  %v447_v16 = vpop.f32.mrb[14].mxu0 }
 0x520   :  { %v7725_v17 = vpop.f32.mrb[15].mxu0 }
 0x521   :  { %v494_v18 = vpop.f32.mrb[12].mxu1 }
 0x522   :  { %v7730_v19 = vpop.f32.mrb[13].mxu1  ;;  %v503_v21 = vsel %vm181_vm3, %v494_v18, -inf }
 0x523   :  { %504 = vmax.xlane.f32.xlu0 %v503_v21  ;;  %v497_v22 = vpop.f32.mrb[14].mxu1 }
 0x524   :  { %v7731_v24 = vpop.f32.mrb[15].mxu1 }
 0x530   :  { %524 = vrot.lane.b32.xlu1 %v8435_v20, %s8317_s18 }
 0x534   :  { %633 = vrot.lane.b32.xlu1 %v8435_v20, %s8318_s19 }
 0x539   :  { %572 = vrot.lane.b32.xlu0 %v8439_v23, %s8317_s18 }
 0x53d   :  { %631 = vrot.lane.b32.xlu0 %v8435_v20, %s8319_s20 }
 0x5ac   :  { %v502_v25 = vpop.xlane.xlu1 %501 }
 0x5ad   :  { %v506_v26 = vsub.f32 %v444_v13, %v502_v25 }
 0x5af   :  { %v508_v27 = vmul.f32 1.442695, %v506_v26 }
 0x5b0   :  { %v505_v28 = vpop.xlane.xlu0 %504  ;;  %v525_v29 = vpop.permute.xlu1 %524 }
 0x5b1   :  { %8213 = vpow2.f32 %v508_v27  ;;  %v507_v30 = vsub.f32 %v494_v18, %v505_v28  ;;  %v530_v31 = vsel %vm306_vm4, %v525_v29, 0 }
 0x5b2   :  { %7733 = vmatpush3.bf16.msra.mxu0 %v530_v31 }
 0x5b3   :  { %v510_v32 = vmul.f32 1.442695, %v507_v30  ;;  %7744 = vmatprep.subr.bf16.mxu0 %v8311_v1 }
 0x5b4   :  { %v573_v33 = vpop.permute.xlu0 %572  ;;  %v634_v39 = vpop.permute.xlu1 %633 }
 0x5b5   :  { %8215 = vpow2.f32 %v510_v32  ;;  %v578_v34 = vsel %vm306_vm4, %v573_v33, 0  ;;  %v639_v46 = vsel %vm181_vm3, %v634_v39, 0 }
 0x5b6   :  { %7739 = vmatpush3.bf16.msra.mxu1 %v578_v34 }
 0x5b7   :  { %7750 = vmatprep.subr.bf16.mxu1 %v8311_v1 }
 0x5b8   :  { %v632_v51 = vpop.permute.xlu0 %631 }
 0x5bb   :  { %v8214_v35 = vpop.eup %8213 }
 0x5bc   :  { %v512_v36 = vsel %vm181_vm3, %v8214_v35, 0.0 }
 0x5bd   :  { %513 = vadd.xlane.f32.xlu1 %v512_v36 }
 0x5bf   :  { %v8216_v37 = vpop.eup %8215 }
 0x5c0   :  { %v515_v38 = vsel %vm181_vm3, %v8216_v37, 0.0 }
 0x5c1   :  { %516 = vadd.xlane.f32.xlu1 %v515_v38 }
 0x5d2   :  { %683 = vrot.lane.b32.xlu1 %v8439_v23, %s8318_s19 }
 0x5d6   :  { %681 = vrot.lane.b32.xlu1 %v8439_v23, %s8319_s20 }
 0x64a   :  { %v514_v40 = vpop.xlane.xlu1 %513 }
 0x64b   :  { %8217 = vrcp.f32 %v514_v40 }
 0x64e   :  { %v517_v41 = vpop.xlane.xlu1 %516 }
 0x64f   :  { %8219 = vrcp.f32 %v517_v41 }
 0x652   :  { %v684_v48 = vpop.permute.xlu1 %683 }
 0x653   :  { %v689_v50 = vsel %vm181_vm3, %v684_v48, 0 }
 0x655   :  { %v8218_v42 = vpop.eup %8217 }
 0x656   :  { %v520_v43 = vmul.f32 %v8218_v42, %v8214_v35  ;;  %v682_v52 = vpop.permute.xlu1 %681 }
 0x658   :  { %v522_v44 = vpack.c.bf16 %v520_v43, %v520_v43 }
 0x659   :  { %v8220_v45 = vpop.eup %8219 }
 0x65a   :  { %v521_v47 = vmul.f32 %v8220_v45, %v8216_v37  ;;  %7735 = vmatmul.mubr.msk.bf16.vlgmr.msra.gmra.mrb[16].mxu0 %vm181_vm3, %v522_v44 }
 0x65b   :  { %7745 = vmatpush3.bf16.xpose.msra.mxu0 %v639_v46  ;;  %7746 = vmatprep.mubr.msk.bf16.mxu0 %vm8312_vm1, %v8311_v1 }
 0x65c   :  { %v523_v49 = vpack.c.bf16 %v521_v47, %v521_v47  ;;  %7756 = vmatprep.subr.bf16.mxu0 %v8311_v1 }
 0x65e   :  { %7741 = vmatmul.mubr.msk.bf16.vlgmr.msra.gmra.mrb[16].mxu1 %vm181_vm3, %v523_v49 }
 0x65f   :  { %7751 = vmatpush3.bf16.xpose.msra.mxu1 %v689_v50  ;;  %7752 = vmatprep.mubr.msk.bf16.mxu1 %vm8312_vm1, %v8311_v1 }
 0x660   :  { %7762 = vmatprep.subr.bf16.mxu1 %v8311_v1 }
 0x662   :  { %7747 = vmatmul.mubr.msk.bf16.vlgmr.msra.gmra.mrb[20].mxu0 %vm181_vm3, %v632_v51 }
 0x663   :  { %7758 = vmatprep.mubr.msk.bf16.mxu0 %vm8312_vm1, %v8311_v1 }
 0x666   :  { %7753 = vmatmul.mubr.msk.bf16.vlgmr.msra.gmra.mrb[20].mxu1 %vm181_vm3, %v682_v52 }
 0x667   :  { %7764 = vmatprep.mubr.msk.bf16.mxu1 %vm8312_vm1, %v8311_v1 }
 0x72d   :  { %v8529_v53 = vpop.f32.mrb[16].mxu0 }
 0x72e   :  { %v7736_v54 = vpop.f32.mrb[17].mxu0 }
 0x72f   :  { %v569_v55 = vpop.f32.mrb[18].mxu0 }
 0x730   :  { %v7737_v56 = vpop.f32.mrb[19].mxu0 }
 0x731   :  { %v8531_v57 = vpop.f32.mrb[16].mxu1 }
 0x732   :  { %v7742_v58 = vpop.f32.mrb[17].mxu1 }
 0x733   :  { %v617_v59 = vpop.f32.mrb[18].mxu1 }
 0x734   :  { %v7743_v60 = vpop.f32.mrb[19].mxu1 }
 0x735   :  { %v675_v61 = vpop.f32.mrb[20].mxu0 }
 0x736   :  { %v7748_v62 = vpop.f32.mrb[21].mxu0  ;;  %v731_v63 = vsel %vm181_vm3, %v675_v61, -inf }
 0x737   :  { %732 = vmax.xlane.f32.xlu0 %v731_v63  ;;  %v678_v0 = vpop.f32.mrb[22].mxu0 }
 0x738   :  { %v7749_v2 = vpop.f32.mrb[23].mxu0 }
 0x739   :  { %v725_v3 = vpop.f32.mrb[20].mxu1 }
 0x73a   :  { %v7754_v4 = vpop.f32.mrb[21].mxu1  ;;  %v734_v5 = vsel %vm181_vm3, %v725_v3, -inf }
 0x73b   :  { %735 = vmax.xlane.f32.xlu1 %v734_v5  ;;  %v728_v6 = vpop.f32.mrb[22].mxu1 }
 0x73c   :  { %v7755_v7 = vpop.f32.mrb[23].mxu1 }
 0x74c   :  { %755 = vrot.lane.b32.xlu1 %v8435_v20, %s8320_s21 }
 0x750   :  { %864 = vrot.lane.b32.xlu1 %v8435_v20, %s8321_s22 }
 0x754   :  { %914 = vrot.lane.b32.xlu1 %v8439_v23, %s8321_s22 }
 0x758   :  { %912 = vrot.lane.b32.xlu1 %v8439_v23, %s8322_s23 }
 0x7c4   :  { %v733_v8 = vpop.xlane.xlu0 %732 }
 0x7c5   :  { %v737_v9 = vsub.f32 %v675_v61, %v733_v8 }
 0x7c7   :  { %v739_v10 = vmul.f32 1.442695, %v737_v9 }
 0x7c8   :  { %v736_v13 = vpop.xlane.xlu1 %735 }
 0x7c9   :  { %8221 = vpow2.f32 %v739_v10  ;;  %v738_v14 = vsub.f32 %v725_v3, %v736_v13 }
 0x7cb   :  { %v741_v15 = vmul.f32 1.442695, %v738_v14 }
 0x7cc   :  { %v756_v16 = vpop.permute.xlu1 %755 }
 0x7cd   :  { %8223 = vpow2.f32 %v741_v15  ;;  %v761_v17 = vsel %vm306_vm4, %v756_v16, 0 }
 0x7ce   :  { %7757 = vmatpush3.bf16.msra.mxu0 %v761_v17 }
 0x7cf   :  { %7768 = vmatprep.subr.bf16.mxu0 %v8311_v1 }
 0x7d0   :  { %v865_v29 = vpop.permute.xlu1 %864 }
 0x7d1   :  { %v870_v33 = vsel %vm181_vm3, %v865_v29, 0 }
 0x7d3   :  { %v8222_v18 = vpop.eup %8221 }
 0x7d4   :  { %v743_v19 = vsel %vm181_vm3, %v8222_v18, 0.0  ;;  %v915_v35 = vpop.permute.xlu1 %914 }
 0x7d5   :  { %744 = vadd.xlane.f32.xlu0 %v743_v19  ;;  %v920_v37 = vsel %vm181_vm3, %v915_v35, 0 }
 0x7d7   :  { %v8224_v21 = vpop.eup %8223 }
 0x7d8   :  { %v746_v22 = vsel %vm181_vm3, %v8224_v21, 0.0  ;;  %v913_v39 = vpop.permute.xlu1 %912 }
 0x7d9   :  { %747 = vadd.xlane.f32.xlu0 %v746_v22  ;;  %v7941_v22 = vld [vmem:[%s10102_s5] sm:$0xff]  }
 0x7ef   :  { %803 = vrot.lane.b32.xlu0 %v8439_v23, %s8320_s21 }
 0x7f3   :  { %862 = vrot.lane.b32.xlu0 %v8435_v20, %s8322_s23 }
 0x862   :  { %v745_v24 = vpop.xlane.xlu0 %744 }
 0x863   :  { %8225 = vrcp.f32 %v745_v24  ;;  %v7942_v24 = vld [vmem:[%s10102_s5 + $0x8] sm:$0xff]  }
 0x866   :  { %v748_v25 = vpop.xlane.xlu0 %747 }
 0x867   :  { %8227 = vrcp.f32 %v748_v25 }
 0x86a   :  { %v804_v26 = vpop.permute.xlu0 %803 }
 0x86b   :  { %v809_v27 = vsel %vm306_vm4, %v804_v26, 0 }
 0x86c   :  { %7763 = vmatpush3.bf16.msra.mxu1 %v809_v27 }
 0x86d   :  { %v8226_v28 = vpop.eup %8225  ;;  %7774 = vmatprep.subr.bf16.mxu1 %v8311_v1 }
 0x86e   :  { %v751_v30 = vmul.f32 %v8226_v28, %v8222_v18  ;;  %v863_v38 = vpop.permute.xlu0 %862 }
 0x870   :  { %v753_v31 = vpack.c.bf16 %v751_v30, %v751_v30 }
 0x871   :  { %v8228_v32 = vpop.eup %8227 }
 0x872   :  { %v752_v34 = vmul.f32 %v8228_v32, %v8224_v21  ;;  %7759 = vmatmul.mubr.msk.bf16.vlgmr.msra.gmra.mrb[24].mxu0 %vm181_vm3, %v753_v31 }
 0x873   :  { %7769 = vmatpush3.bf16.xpose.msra.mxu0 %v870_v33  ;;  %7770 = vmatprep.mubr.msk.bf16.mxu0 %vm8312_vm1, %v8311_v1 }
 0x874   :  { %v754_v36 = vpack.c.bf16 %v752_v34, %v752_v34  ;;  %7780 = vmatprep.subr.bf16.mxu0 %v8311_v1 }
 0x876   :  { %7765 = vmatmul.mubr.msk.bf16.vlgmr.msra.gmra.mrb[24].mxu1 %vm181_vm3, %v754_v36 }
 0x877   :  { %7775 = vmatpush3.bf16.xpose.msra.mxu1 %v920_v37  ;;  %7776 = vmatprep.mubr.msk.bf16.mxu1 %vm8312_vm1, %v8311_v1 }
 0x878   :  { %7786 = vmatprep.subr.bf16.mxu1 %v8311_v1 }
 0x87a   :  { %7771 = vmatmul.mubr.msk.bf16.vlgmr.msra.gmra.mrb[28].mxu0 %vm181_vm3, %v863_v38  ;;  %v1100_v38 = vlaneseq }
 0x87b   :  { %7782 = vmatprep.mubr.msk.bf16.mxu0 %vm8312_vm1, %v8311_v1 }
 0x87e   :  { %7777 = vmatmul.mubr.msk.bf16.vlgmr.msra.gmra.mrb[28].mxu1 %vm181_vm3, %v913_v39  ;;  %v8606_v39 = vshrl.u32 %v1100_v38, 7 }
 0x87f   :  { %7788 = vmatprep.mubr.msk.bf16.mxu1 %vm8312_vm1, %v8311_v1 }
 0x880   :  { %v8677_v38 = vsub.s32 2, %v8606_v39 }
 0x945   :  { %v797_v40 = vpop.f32.mrb[24].mxu0 }
 0x946   :  { %v7760_v41 = vpop.f32.mrb[25].mxu0 }
 0x947   :  { %v800_v42 = vpop.f32.mrb[26].mxu0  ;;  %v8614_v41 = vld [vmem:[%s10106_s9] sm:$0x3f] }
 0x948   :  { %v7761_v43 = vpop.f32.mrb[27].mxu0 }
 0x949   :  { %v845_v44 = vpop.f32.mrb[24].mxu1 }
 0x94a   :  { %v7766_v45 = vpop.f32.mrb[25].mxu1 }
 0x94b   :  { %v848_v46 = vpop.f32.mrb[26].mxu1 }
 0x94c   :  { %v7767_v47 = vpop.f32.mrb[27].mxu1 }
 0x94d   :  { %v906_v48 = vpop.f32.mrb[28].mxu0 }
 0x94e   :  { %v7772_v49 = vpop.f32.mrb[29].mxu0  ;;  %v962_v50 = vsel %vm181_vm3, %v906_v48, -inf }
 0x94f   :  { %963 = vmax.xlane.f32.xlu0 %v962_v50  ;;  %v909_v51 = vpop.f32.mrb[30].mxu0 }
 0x950   :  { %v7773_v52 = vpop.f32.mrb[31].mxu0 }
 0x951   :  { %v956_v54 = vpop.f32.mrb[28].mxu1 }
 0x952   :  { %v7778_v55 = vpop.f32.mrb[29].mxu1  ;;  %v965_v56 = vsel %vm181_vm3, %v956_v54, -inf }
 0x953   :  { %966 = vmax.xlane.f32.xlu1 %v965_v56  ;;  %v959_v58 = vpop.f32.mrb[30].mxu1  ;;  %v1207_v56 = vld [vmem:[%s10103_s6] sm:$0xff] }
 0x954   :  { %v7779_v59 = vpop.f32.mrb[31].mxu1  ;;  %v1215_v58 = vld [vmem:[%s10103_s6 + $0x40] sm:$0xff] }
 0x955   :  { %v1208_v59 = vld [vmem:[%s10103_s6 + $0x8] sm:$0xff] }
 0x964   :  { %986 = vrot.lane.b32.xlu1 %v8435_v20, %s8323_s24 }
 0x968   :  { %622 = vrot.lane.b32.xlu1 %v8529_v53, %s10114_s25 }
 0x96c   :  { %624 = vrot.lane.b32.xlu1 %v8531_v57, %s10114_s25 }
 0x970   :  { %855 = vrot.lane.b32.xlu1 %v845_v44, %s10112_s26 }
 0x9dc   :  { %v964_v60 = vpop.xlane.xlu0 %963 }
 0x9dd   :  { %v968_v61 = vsub.f32 %v906_v48, %v964_v60  ;;  %v6587_v60 = vcombine.high %v1207_v56, %v1215_v58 }
 0x9df   :  { %v970_v62 = vmul.f32 1.442695, %v968_v61  ;;  %v1216_v61 = vld [vmem:[%s10103_s6 + $0x48] sm:$0xff] }
 0x9e0   :  { %v967_v63 = vpop.xlane.xlu1 %966 }
 0x9e1   :  { %8229 = vpow2.f32 %v970_v62  ;;  %v969_v0 = vsub.f32 %v956_v54, %v967_v63  ;;  %v6586_v62 = vcombine.low %v1207_v56, %v1215_v58  ;;  %v6588_v63 = vcombine.low %v1208_v59, %v1216_v61  ;;  %v1211_v58 = vld [vmem:[%s10103_s6 + $0x20] sm:$0xff] }
 0x9e3   :  { %v972_v2 = vmul.f32 1.442695, %v969_v0  ;;  %v6589_v0 = vcombine.high %v1208_v59, %v1216_v61  ;;  %v1219_v59 = vld [vmem:[%s10103_s6 + $0x60] sm:$0xff]  ;;  %v1220_v61 = vld [vmem:[%s10103_s6 + $0x68] sm:$0xff] }
 0x9e4   :  { %v987_v3 = vpop.permute.xlu1 %986 }
 0x9e5   :  { %8231 = vpow2.f32 %v972_v2  ;;  %v992_v20 = vsel %vm306_vm4, %v987_v3, 0  ;;  %v1223_v2 = vld [vmem:[%s10103_s6 + $0x80] sm:$0xff] }
 0x9e6   :  { %7781 = vmatpush3.bf16.msra.mxu0 %v992_v20  ;;  %v1231_v3 = vld [vmem:[%s10103_s6 + $0xc0] sm:$0xff]  ;;  %v1224_v20 = vld [vmem:[%s10103_s6 + $0x88] sm:$0xff] }
 0x9e7   :  { %7792 = vmatprep.subr.bf16.mxu0 %v8311_v1 }
 0x9e8   :  { %v623_v53 = vpop.permute.xlu1 %622 }
 0x9e9   :  { %629 = vst.msk [vmem:[#allocation2] sm:$0xff] %vm628_vm5, %v623_v53  ;;  %v6603_v53 = vcombine.high %v1223_v2, %v1231_v3 }
 0x9eb   :  { %v8230_v57 = vpop.eup %8229 }
 0x9ec   :  { %v625_v4 = vpop.permute.xlu1 %624  ;;  %v974_v5 = vsel %vm181_vm3, %v8230_v57, 0.0 }
 0x9ed   :  { %630 = vst.msk [vmem:[#allocation2 + $0x8] sm:$0xff] %vm628_vm5, %v625_v4  ;;  %975 = vadd.xlane.f32.xlu0 %v974_v5  ;;  %v6602_v4 = vcombine.low %v1223_v2, %v1231_v3  ;;  %v1227_v3 = vld [vmem:[%s10103_s6 + $0xa0] sm:$0xff] }
 0x9ef   :  { %v8232_v6 = vpop.eup %8231 }
 0x9f0   :  { %v856_v7 = vpop.permute.xlu1 %855  ;;  %v977_v8 = vsel %vm181_vm3, %v8232_v6, 0.0 }
 0x9f1   :  { %861 = vst.msk [vmem:[#allocation2 + $0x8] sm:$0xff] %vm859_vm6, %v856_v7  ;;  %978 = vadd.xlane.f32.xlu0 %v977_v8  ;;  %v1209_v7 = vld [vmem:[%s10103_s6 + $0x10] sm:$0xff] }
 0x9f2   :  { %v1217_v8 = vld [vmem:[%s10103_s6 + $0x50] sm:$0xff] }
 0xa07   :  { %1034 = vrot.lane.b32.xlu0 %v8439_v23, %s8323_s24 }
 0xa0b   :  { %853 = vrot.lane.b32.xlu0 %v797_v40, %s10112_s26  ;;  %v8609_v40 = vsub.s32 0, %v8606_v39 }
 0xa0d   :  { %v1103_v42 = vrot.slane %v8614_v41, %v8609_v40 }
 0xa7a   :  { %v976_v9 = vpop.xlane.xlu0 %975 }
 0xa7b   :  { %8233 = vrcp.f32 %v976_v9  ;;  %v1210_v9 = vld [vmem:[%s10103_s6 + $0x18] sm:$0xff] }
 0xa7e   :  { %v979_v10 = vpop.xlane.xlu0 %978 }
 0xa7f   :  { %8235 = vrcp.f32 %v979_v10  ;;  %v8327_v10 = vmov 0  }
 0xa82   :  { %v1035_v13 = vpop.permute.xlu0 %1034 }
 0xa83   :  { %v1040_v14 = vsel %vm306_vm4, %v1035_v13, 0  ;;  %v6591_v13 = vcombine.high %v1209_v7, %v1217_v8 }
 0xa84   :  { %7787 = vmatpush3.bf16.msra.mxu1 %v1040_v14  ;;  %v1218_v14 = vld [vmem:[%s10103_s6 + $0x58] sm:$0xff] }
 0xa85   :  { %v8234_v15 = vpop.eup %8233  ;;  %1486 = vmatprep.subr.bf16.mxu1 %v6587_v60  ;;  %v1212_v60 = vld [vmem:[%s10103_s6 + $0x28] sm:$0xff] }
 0xa86   :  { %v982_v16 = vmul.f32 %v8234_v15, %v8230_v57  ;;  %v854_v17 = vpop.permute.xlu0 %853  ;;  %v1232_v57 = vld [vmem:[%s10103_s6 + $0xc8] sm:$0xff]  ;;  %v6590_v15 = vcombine.low %v1209_v7, %v1217_v8  ;;  %v6597_v2 = vcombine.high %v1212_v60, %v1220_v61  ;;  %v1213_v8 = vld [vmem:[%s10103_s6 + $0x30] sm:$0xff] }
 0xa87   :  { %860 = vst.msk [vmem:[#allocation2] sm:$0xff] %vm859_vm6, %v854_v17  ;;  %v6604_v5 = vcombine.low %v1224_v20, %v1232_v57  ;;  %v6593_v17 = vcombine.high %v1210_v9, %v1218_v14 }
 0xa88   :  { %v984_v18 = vpack.c.bf16 %v982_v16, %v982_v16  ;;  %v6592_v16 = vcombine.low %v1210_v9, %v1218_v14  ;;  %v1221_v9 = vld [vmem:[%s10103_s6 + $0x70] sm:$0xff]  ;;  %v1222_v14 = vld [vmem:[%s10103_s6 + $0x78] sm:$0xff] }
 0xa89   :  { %v8236_v19 = vpop.eup %8235 }
 0xa8a   :  { %v983_v21 = vmul.f32 %v8236_v19, %v8232_v6  ;;  %7783 = vmatmul.mubr.msk.bf16.vlgmr.msra.gmra.mrb[32].mxu0 %vm181_vm3, %v984_v18  ;;  %v6605_v6 = vcombine.high %v1224_v20, %v1232_v57  ;;  %v1235_v20 = vld [vmem:[%s10103_s6 + $0xe0] sm:$0xff]  ;;  %v1236_v57 = vld [vmem:[%s10103_s6 + $0xe8] sm:$0xff] }
 0xa8b   :  { %7796 = vmatprep.mubr.msk.bf16.mxu0 %vm8312_vm1, %v8311_v1  ;;  %7793 = vmatpush3.bf16.msra.mxu0 %v7941_v22 }
 0xa8c   :  { %v985_v23 = vpack.c.bf16 %v983_v21, %v983_v21  ;;  %7794 = vmatprep.subr.bf16.mxu0 %v8311_v1 }
 0xa8e   :  { %7789 = vmatmul.mubr.msk.bf16.vlgmr.msra.gmra.mrb[32].mxu1 %vm181_vm3, %v985_v23 }
 0xa8f   :  { %7795 = vmatpush3.bf16.msra.mxu0 %v7942_v24  ;;  %1487 = vmatpush1.bf16.msra.mxu1 %v6586_v62 }
 0xa90   :  { %1529 = vmatprep.subr.bf16.mxu0 %v6589_v0  ;;  %1488 = vmatprep.subr.bf16.mxu1 %v6603_v53  ;;  %v6595_v0 = vcombine.high %v1211_v58, %v1219_v59  ;;  %v1228_v53 = vld [vmem:[%s10103_s6 + $0xa8] sm:$0xff] }
 0xa91   :  { %1518 = vmatprep.mubr.bf16.mxu1 %v8327_v10  ;;  %v6613_v7 = vcombine.high %v1228_v53, %v1236_v57 }
 0xa93   :  { %1489 = vmatpush1.bf16.msra.mxu1 %v6602_v4  ;;  %v6594_v4 = vcombine.low %v1211_v58, %v1219_v59  ;;  %v7965_v58 = vld [vmem:[%s10105_s8 + $0x28] sm:$0xff]  }
 0xa94   :  { %1572 = vmatprep.subr.bf16.mxu1 %v6591_v13  ;;  %v1214_v13 = vld [vmem:[%s10103_s6 + $0x38] sm:$0xff]  ;;  %v7966_v59 = vld [vmem:[%s10105_s8 + $0xa8] sm:$0xff]  }
 0xb5d   :  { %v1028_v25 = vpop.f32.mrb[32].mxu0 }
 0xb5e   :  { %1084 = vrot.lane.b32.xlu0 %v1028_v25, %s10110_s29  ;;  %v7784_v26 = vpop.f32.mrb[33].mxu0 }
 0xb5f   :  { %v1031_v27 = vpop.f32.mrb[34].mxu0 }
 0xb60   :  { %v7785_v28 = vpop.f32.mrb[35].mxu0 }
 0xb61   :  { %v1076_v29 = vpop.f32.mrb[32].mxu1 }
 0xb62   :  { %1086 = vrot.lane.b32.xlu1 %v1076_v29, %s10110_s29  ;;  %v7790_v30 = vpop.f32.mrb[33].mxu1 }
 0xb63   :  { %v1079_v31 = vpop.f32.mrb[34].mxu1 }
 0xb64   :  { %v7791_v32 = vpop.f32.mrb[35].mxu1 }
 0xbd0   :  { %v1085_v33 = vpop.permute.xlu0 %1084 }
 0xbd1   :  { %1091 = vst.msk [vmem:[#allocation2] sm:$0xff] %vm1090_vm7, %v1085_v33 }
 0xbd4   :  { %v1087_v34 = vpop.permute.xlu1 %1086 }
 0xbd5   :  { %1092 = vst.msk [vmem:[#allocation2 + $0x8] sm:$0xff] %vm1090_vm7, %v1087_v34 }
 0xbd8   :  { %v1093_v35 = vld [vmem:[#allocation2] sm:$0xff] }
 0xbdc   :  { %v1094_v36 = vld [vmem:[#allocation2 + $0x8] sm:$0xff] }
 0xbdd   :  { %v1095_v37 = vpack.c.bf16 %v1094_v36, %v1093_v35  ;;  %v8673_v35 = vsub.s32 1, %v8606_v39 }
 0xbdf   :  { %7797 = vmatmul.mubr.msk.bf16.vlgmr.msra.gmra.mrb[36].mxu0 %vm131_vm2, %v1095_v37 }
 0xbe0   :  { %1530 = vmatpush1.bf16.msra.mxu0 %v6588_v63  ;;  %1561 = vmatprep.mubr.bf16.mxu0 %v8327_v10 }
 0xbe1   :  { %1531 = vmatprep.subr.bf16.mxu0 %v6605_v6  ;;  %v6611_v6 = vcombine.high %v1227_v3, %v1235_v20 }
 0xbe4   :  { %1532 = vmatpush1.bf16.msra.mxu0 %v6604_v5  ;;  %v6596_v5 = vcombine.low %v1212_v60, %v1220_v61  ;;  %v7967_v60 = vld [vmem:[%s10105_s8 + $0x70] sm:$0xff]  }
 0xbe5   :  { %1615 = vmatprep.subr.bf16.mxu0 %v6593_v17  ;;  %v6599_v17 = vcombine.high %v1213_v8, %v1221_v9  ;;  %v7968_v61 = vld [vmem:[%s10105_s8 + $0xf0] sm:$0xff]  }
 0xcb2   :  { %v1153_v43 = vpop.f32.mrb[36].mxu0 }
 0xcb3   :  { %v1154_v44 = vadd.f32 %v1153_v43, %v1103_v42  ;;  %v7798_v45 = vpop.f32.mrb[37].mxu0 }
 0xcb4   :  { %v1156_v46 = vpop.f32.mrb[38].mxu0 }
 0xcb5   :  { %v8619_v47 = vadd.f32 %v1154_v44, %v8423_v11  ;;  %v1157_v48 = vadd.f32 %v1156_v46, %v1103_v42  ;;  %v7799_v49 = vpop.f32.mrb[39].mxu0  ;;  %v1197_v42 = vrot.slane %v8614_v41, %v8673_v35  ;;  %v1203_v46 = vrot.slane %v8614_v41, %v8677_v38 }
 0xcb7   :  { %v8622_v50 = vadd.f32 %v1157_v48, %v8425_v12  ;;  %v1162_v51 = vsel %vm131_vm2, %v8619_v47, 0.0  ;;  %v1168_v52 = vmul.f32 %v8619_v47, %v8619_v47 }
 0xcb8   :  { %1163 = vadd.xlane.f32.xlu0 %v1162_v51 }
 0xcb9   :  { %v1165_v54 = vsel %vm131_vm2, %v8622_v50, 0.0  ;;  %v1170_v55 = vsel %vm131_vm2, %v1168_v52, 0.0  ;;  %v1169_v11 = vmul.f32 %v8622_v50, %v8622_v50  ;;  %v1233_v52 = vld [vmem:[%s10103_s6 + $0xd0] sm:$0xff] }
 0xcba   :  { %1166 = vadd.xlane.f32.xlu1 %v1165_v54  ;;  %v1226_v54 = vld [vmem:[%s10103_s6 + $0x98] sm:$0xff] }
 0xcbb   :  { %v1173_v12 = vsel %vm131_vm2, %v1169_v11, 0.0 }
 0xcbc   :  { %1171 = vadd.xlane.f32.xlu0 %v1170_v55 }
 0xcc0   :  { %1174 = vadd.xlane.f32.xlu0 %v1173_v12 }
 0xd45   :  { %v1164_v18 = vpop.xlane.xlu0 %1163 }
 0xd46   :  { %v1176_v19 = vmul.f32 0.03125, %v1164_v18  ;;  %v6601_v18 = vcombine.high %v1214_v13, %v1222_v14 }
 0xd47   :  { %v1167_v21 = vpop.xlane.xlu1 %1166 }
 0xd48   :  { %v1180_v22 = vmul.f32 %v1176_v19, %v1176_v19  ;;  %v1177_v24 = vmul.f32 0.03125, %v1167_v21  ;;  %v1186_v36 = vsub.f32 %v8619_v47, %v1176_v19  ;;  %v1225_v47 = vld [vmem:[%s10103_s6 + $0x90] sm:$0xff] }
 0xd49   :  { %v1172_v23 = vpop.xlane.xlu0 %1171  ;;  %v6607_v12 = vcombine.high %v1225_v47, %v1233_v52  ;;  %v6606_v62 = vcombine.low %v1225_v47, %v1233_v52  ;;  %v1229_v19 = vld [vmem:[%s10103_s6 + $0xb0] sm:$0xff]  ;;  %v7958_v47 = vld [vmem:[%s10105_s8 + $0x98] sm:$0xff]   ;;  %v7959_v52 = vld [vmem:[%s10105_s8 + $0x60] sm:$0xff]  }
 0xd4a   :  { %v1178_v25 = vmul.f32 0.03125, %v1172_v23  ;;  %v1181_v28 = vmul.f32 %v1177_v24, %v1177_v24  ;;  %v1187_v44 = vsub.f32 %v8622_v50, %v1177_v24  ;;  %v1234_v50 = vld [vmem:[%s10103_s6 + $0xd8] sm:$0xff]  ;;  %v1237_v21 = vld [vmem:[%s10103_s6 + $0xf0] sm:$0xff]  ;;  %v6598_v24 = vcombine.low %v1213_v8, %v1221_v9 }
 0xd4b   :  { %v6609_v56 = vcombine.high %v1226_v54, %v1234_v50  ;;  %v6608_v63 = vcombine.low %v1226_v54, %v1234_v50  ;;  %v1230_v23 = vld [vmem:[%s10103_s6 + $0xb8] sm:$0xff]  ;;  %v7960_v54 = vld [vmem:[%s10105_s8 + $0xe0] sm:$0xff]  }
 0xd4c   :  { %v1182_v26 = vsub.f32 %v1178_v25, %v1180_v22  ;;  %v1238_v22 = vld [vmem:[%s10103_s6 + $0xf8] sm:$0xff]  ;;  %v6600_v25 = vcombine.low %v1214_v13, %v1222_v14  ;;  %v7961_v50 = vld [vmem:[%s10105_s8 + $0x20] sm:$0xff]   ;;  %v8887_v13 = vsub.s32 4, %v8606_v39  ;;  %v8890_v14 = vsub.s32 6, %v8606_v39 }
 0xd4d   :  { %v1175_v27 = vpop.xlane.xlu0 %1174 }
 0xd4e   :  { %v1184_v29 = vmax.f32 %v1182_v26, 0.0  ;;  %v1179_v30 = vmul.f32 0.03125, %v1175_v27  ;;  %v6615_v26 = vcombine.high %v1229_v19, %v1237_v21  ;;  %v6617_v27 = vcombine.high %v1230_v23, %v1238_v22 }
 0xd50   :  { %v1188_v31 = vadd.f32 1e-05, %v1184_v29  ;;  %v1183_v32 = vsub.f32 %v1179_v30, %v1181_v28  ;;  %v6614_v28 = vcombine.low %v1229_v19, %v1237_v21  ;;  %v6616_v29 = vcombine.low %v1230_v23, %v1238_v22  ;;  %v7943_v30 = vld [vmem:[%s10105_s8 + $0x40] sm:$0xff]  }
 0xd52   :  { %8237 = vrsqrt.f32 %v1188_v31  ;;  %v1185_v33 = vmax.f32 %v1183_v32, 0.0  ;;  %v7944_v31 = vld [vmem:[%s10105_s8 + $0xc0] sm:$0xff]  }
 0xd53   :  { %v7945_v32 = vld [vmem:[%s10105_s8] sm:$0xff]  }
 0xd54   :  { %v1189_v34 = vadd.f32 1e-05, %v1185_v33  ;;  %v7946_v33 = vld [vmem:[%s10105_s8 + $0x80] sm:$0xff]  }
 0xd56   :  { %8239 = vrsqrt.f32 %v1189_v34  ;;  %v7947_v34 = vld [vmem:[%s10105_s8 + $0x48] sm:$0xff]  }
 0xd5c   :  { %v8238_v37 = vpop.eup %8237 }
 0xd5d   :  { %v1192_v43 = vmul.f32 %v8238_v37, %v1186_v36  ;;  %v7948_v36 = vld [vmem:[%s10105_s8 + $0xc8] sm:$0xff]  }
 0xd5e   :  { %v7949_v37 = vld [vmem:[%s10105_s8 + $0x8] sm:$0xff]  }
 0xd5f   :  { %v1198_v48 = vmul.f32 %v1197_v42, %v1192_v43  ;;  %v7951_v43 = vld [vmem:[%s10105_s8 + $0x50] sm:$0xff]  }
 0xd60   :  { %v8240_v45 = vpop.eup %8239 }
 0xd61   :  { %v1193_v49 = vmul.f32 %v8240_v45, %v1187_v44  ;;  %v8696_v41 = vadd.f32 %v1203_v46, %v1198_v48  ;;  %v7952_v44 = vld [vmem:[%s10105_s8 + $0xd0] sm:$0xff]   ;;  %v7955_v48 = vld [vmem:[%s10105_s8 + $0x58] sm:$0xff]  }
 0xd62   :  { %v7953_v45 = vld [vmem:[%s10105_s8 + $0x10] sm:$0xff]  }
 0xd63   :  { %v1199_v51 = vmul.f32 %v1197_v42, %v1193_v49  ;;  %v7950_v42 = vld [vmem:[%s10105_s8 + $0x88] sm:$0xff]   ;;  %v7956_v49 = vld [vmem:[%s10105_s8 + $0xd8] sm:$0xff]  }
 0xd65   :  { %v8698_v55 = vadd.f32 %v1203_v46, %v1199_v51  ;;  %v7954_v46 = vld [vmem:[%s10105_s8 + $0x90] sm:$0xff]   ;;  %v7957_v51 = vld [vmem:[%s10105_s8 + $0x18] sm:$0xff]  }
 0xd67   :  { %v8702_v11 = vpack.c.bf16 %v8698_v55, %v8696_v41 }
 0xd69   :  { %6618 = vmatmul.mubr.msk.bf16.vlgmr.msra.gmra.mrb[36].mxu1 %vm131_vm2, %v8702_v11  ;;  %6619 = vmatmul.mubr.msk.bf16.vlgmr.msra.gmra.mrb[40].mxu0 %vm131_vm2, %v8702_v11 }
 0xd6a   :  { %1573 = vmatpush1.bf16.msra.mxu1 %v6590_v15  ;;  %1616 = vmatpush1.bf16.msra.mxu0 %v6592_v16  ;;  %v6610_v15 = vcombine.low %v1227_v3, %v1235_v20  ;;  %v6612_v16 = vcombine.low %v1228_v53, %v1236_v57  ;;  %v7973_v3 = vld [vmem:[%s10105_s8 + $0x38] sm:$0xff]   ;;  %v7975_v53 = vld [vmem:[%s10105_s8 + $0x140] sm:$0xff]  }
 0xd6b   :  { %1574 = vmatprep.subr.bf16.mxu1 %v6607_v12  ;;  %1617 = vmatprep.subr.bf16.mxu0 %v6609_v56  ;;  %v7963_v12 = vld [vmem:[%s10105_s8 + $0x68] sm:$0xff]   ;;  %v7974_v20 = vld [vmem:[%s10105_s8 + $0xb8] sm:$0xff]   ;;  %v7976_v57 = vld [vmem:[%s10105_s8 + $0x1c0] sm:$0xff]  }
 0xd6c   :  { %1604 = vmatprep.mubr.bf16.mxu1 %v8327_v10  ;;  %1647 = vmatprep.mubr.bf16.mxu0 %v8327_v10  ;;  %v7964_v56 = vld [vmem:[%s10105_s8 + $0xe8] sm:$0xff]  }
 0xd6e   :  { %1575 = vmatpush1.bf16.msra.mxu1 %v6606_v62  ;;  %1618 = vmatpush1.bf16.msra.mxu0 %v6608_v63  ;;  %v7969_v62 = vld [vmem:[%s10105_s8 + $0x30] sm:$0xff]  }
 0xd6f   :  { %1658 = vmatprep.subr.bf16.mxu1 %v6595_v0  ;;  %1701 = vmatprep.subr.bf16.mxu0 %v6597_v2  ;;  %v7970_v63 = vld [vmem:[%s10105_s8 + $0xb0] sm:$0xff]   ;;  %v7971_v0 = vld [vmem:[%s10105_s8 + $0x78] sm:$0xff]  }
 0xd70   :  { %v7972_v2 = vld [vmem:[%s10105_s8 + $0xf8] sm:$0xff]  }
 0xd71   :  { %6620 = vmatmul.mubr.msk.bf16.vlgmr.msra.gmra.mrb[40].mxu1 %vm131_vm2, %v8702_v11  ;;  %6621 = vmatmul.mubr.msk.bf16.vlgmr.msra.gmra.mrb[44].mxu0 %vm131_vm2, %v8702_v11 }
 0xd72   :  { %1659 = vmatpush1.bf16.msra.mxu1 %v6594_v4  ;;  %1702 = vmatpush1.bf16.msra.mxu0 %v6596_v5  ;;  %v1239_v4 = vld [vmem:[%s10104_s7] sm:$0xff]  ;;  %v8880_v5 = vsub.s32 3, %v8606_v39 }
 0xd73   :  { %1660 = vmatprep.subr.bf16.mxu1 %v6611_v6  ;;  %1703 = vmatprep.subr.bf16.mxu0 %v6613_v7  ;;  %v1246_v6 = vrot.slane %v1239_v4, %v8609_v40  ;;  %v1254_v7 = vrot.slane %v1239_v4, %v8677_v38  ;;  %v1250_v8 = vrot.slane %v1239_v4, %v8673_v35 }
 0xd74   :  { %1690 = vmatprep.mubr.bf16.mxu1 %v8327_v10  ;;  %1733 = vmatprep.mubr.bf16.mxu0 %v8327_v10  ;;  %v1258_v9 = vrot.slane %v1239_v4, %v8880_v5 }
 0xd76   :  { %1661 = vmatpush1.bf16.msra.mxu1 %v6610_v15  ;;  %1704 = vmatpush1.bf16.msra.mxu0 %v6612_v16 }
 0xd77   :  { %1744 = vmatprep.subr.bf16.mxu1 %v6599_v17  ;;  %1787 = vmatprep.subr.bf16.mxu0 %v6601_v18  ;;  %v8893_v17 = vsub.s32 5, %v8606_v39  ;;  %v8896_v18 = vsub.s32 7, %v8606_v39 }
 0xd79   :  { %6622 = vmatmul.mubr.msk.bf16.vlgmr.msra.gmra.mrb[44].mxu1 %vm131_vm2, %v8702_v11  ;;  %6623 = vmatmul.mubr.msk.bf16.vlgmr.msra.gmra.mrb[48].mxu0 %vm131_vm2, %v8702_v11  ;;  %v1266_v39 = vrot.slane %v1239_v4, %v8893_v17 }
 0xd7a   :  { %1745 = vmatpush1.bf16.msra.mxu1 %v6598_v24  ;;  %1788 = vmatpush1.bf16.msra.mxu0 %v6600_v25 }
 0xd7b   :  { %1746 = vmatprep.subr.bf16.mxu1 %v6615_v26  ;;  %1789 = vmatprep.subr.bf16.mxu0 %v6617_v27 }
 0xd7c   :  { %1776 = vmatprep.mubr.bf16.mxu1 %v8327_v10  ;;  %1819 = vmatprep.mubr.bf16.mxu0 %v8327_v10 }
 0xd7e   :  { %1747 = vmatpush1.bf16.msra.mxu1 %v6614_v28  ;;  %1790 = vmatpush1.bf16.msra.mxu0 %v6616_v29 }
 0xd7f   :  { %7289 = vmatprep.subr.bf16.mxu1 %v7943_v30  ;;  %7311 = vmatprep.subr.bf16.mxu0 %v7944_v31 }
 0xd81   :  { %6624 = vmatmul.mubr.msk.bf16.vlgmr.msra.gmra.mrb[48].mxu1 %vm131_vm2, %v8702_v11  ;;  %6625 = vmatmul.mubr.msk.bf16.vlgmr.msra.gmra.mrb[52].mxu0 %vm131_vm2, %v8702_v11  ;;  %v7962_v11 = vld [vmem:[%s10105_s8 + $0xa0] sm:$0xff]  }
 0xd82   :  { %7290 = vmatpush3.bf16.msra.mxu1 %v7945_v32  ;;  %7312 = vmatpush3.bf16.msra.mxu0 %v7946_v33  ;;  %v1262_v32 = vrot.slane %v1239_v4, %v8887_v13  ;;  %v1270_v33 = vrot.slane %v1239_v4, %v8890_v14 }
 0xd83   :  { %7291 = vmatprep.subr.bf16.mxu1 %v7947_v34  ;;  %7313 = vmatprep.subr.bf16.mxu0 %v7948_v36 }
 0xd86   :  { %7292 = vmatpush3.bf16.msra.mxu1 %v7949_v37  ;;  %7314 = vmatpush3.bf16.msra.mxu0 %v7950_v42  ;;  %v1274_v37 = vrot.slane %v1239_v4, %v8896_v18 }
 0xd87   :  { %7293 = vmatprep.subr.bf16.mxu1 %v7951_v43  ;;  %7315 = vmatprep.subr.bf16.mxu0 %v7952_v44 }
 0xd8a   :  { %7294 = vmatpush3.bf16.msra.mxu1 %v7953_v45  ;;  %7316 = vmatpush3.bf16.msra.mxu0 %v7954_v46 }
 0xd8b   :  { %7295 = vmatprep.subr.bf16.mxu1 %v7955_v48  ;;  %7317 = vmatprep.subr.bf16.mxu0 %v7956_v49 }
 0xd8e   :  { %7296 = vmatpush3.bf16.msra.mxu1 %v7957_v51  ;;  %7318 = vmatpush3.bf16.msra.mxu0 %v7958_v47  ;;  %v8905_v47 = vld [vmem:[%s10104_s7 + $0x8] sm:$0xff] }
 0xd8f   :  { %7297 = vmatprep.subr.bf16.mxu1 %v7959_v52  ;;  %7319 = vmatprep.subr.bf16.mxu0 %v7960_v54 }
 0xd92   :  { %7298 = vmatpush3.bf16.msra.mxu1 %v7961_v50  ;;  %7320 = vmatpush3.bf16.msra.mxu0 %v7962_v11 }
 0xd93   :  { %7299 = vmatprep.subr.bf16.mxu1 %v7963_v12  ;;  %7321 = vmatprep.subr.bf16.mxu0 %v7964_v56 }
 0xd96   :  { %7300 = vmatpush3.bf16.msra.mxu1 %v7965_v58  ;;  %7322 = vmatpush3.bf16.msra.mxu0 %v7966_v59  ;;  %v7977_v58 = vld [vmem:[%s10105_s8 + $0x100] sm:$0xff]  }
 0xd97   :  { %7301 = vmatprep.subr.bf16.mxu1 %v7967_v60  ;;  %7323 = vmatprep.subr.bf16.mxu0 %v7968_v61  ;;  %v7978_v59 = vld [vmem:[%s10105_s8 + $0x180] sm:$0xff]  }
 0xd9a   :  { %7302 = vmatpush3.bf16.msra.mxu1 %v7969_v62  ;;  %7324 = vmatpush3.bf16.msra.mxu0 %v7970_v63 }
 0xd9b   :  { %7303 = vmatprep.subr.bf16.mxu1 %v7971_v0  ;;  %7325 = vmatprep.subr.bf16.mxu0 %v7972_v2  ;;  %v7979_v0 = vld [vmem:[%s10105_s8 + $0x148] sm:$0xff]  }
 0xd9c   :  { %v7980_v2 = vld [vmem:[%s10105_s8 + $0x1c8] sm:$0xff]  }
 0xd9e   :  { %7304 = vmatpush3.bf16.msra.mxu1 %v7973_v3  ;;  %7326 = vmatpush3.bf16.msra.mxu0 %v7974_v20  ;;  %v1278_v3 = vrot.slane %v8905_v47, %v8609_v40 }
 0xd9f   :  { %7333 = vmatprep.subr.bf16.mxu1 %v7975_v53  ;;  %7355 = vmatprep.subr.bf16.mxu0 %v7976_v57 }
 0xe3c   :  { %v1520_v15 = vpop.f32.mrb[36].mxu1  ;;  %v1563_v16 = vpop.f32.mrb[40].mxu0 }
 0xe3d   :  { %v1521_v19 = vadd.f32 %v1520_v15, %v1246_v6  ;;  %v1564_v21 = vadd.f32 %v1563_v16, %v1254_v7  ;;  %v1522_v23 = vpop.f32.mrb[37].mxu1  ;;  %v1565_v22 = vpop.f32.mrb[41].mxu0  ;;  %v1282_v16 = vrot.slane %v8905_v47, %v8673_v35 }
 0xe3e   :  { %v1523_v24 = vadd.f32 %v1522_v23, %v1250_v8  ;;  %v1566_v25 = vadd.f32 %v1565_v22, %v1258_v9  ;;  %v1524_v26 = vpop.f32.mrb[38].mxu1  ;;  %v1567_v27 = vpop.f32.mrb[42].mxu0  ;;  %v7981_v23 = vld [vmem:[%s10105_s8 + $0x108] sm:$0xff]  }
 0xe3f   :  { %v1525_v28 = vadd.f32 %v1524_v26, %v1246_v6  ;;  %v1568_v29 = vadd.f32 %v1567_v27, %v1254_v7  ;;  %v1526_v30 = vpop.f32.mrb[39].mxu1  ;;  %v1569_v31 = vpop.f32.mrb[43].mxu0  ;;  %v1830_v42 = vmax.f32 %v1521_v19, 0.0  ;;  %v1832_v43 = vmax.f32 %v1564_v21, 0.0  ;;  %v7982_v22 = vld [vmem:[%s10105_s8 + $0x188] sm:$0xff]  }
 0xe40   :  { %v1527_v34 = vadd.f32 %v1526_v30, %v1250_v8  ;;  %v1570_v36 = vadd.f32 %v1569_v31, %v1258_v9  ;;  %v1831_v46 = vmax.f32 %v1523_v24, 0.0  ;;  %v1833_v48 = vmax.f32 %v1566_v25, 0.0  ;;  %v7984_v30 = vld [vmem:[%s10105_s8 + $0x1d0] sm:$0xff]  }
 0xe41   :  { %v1846_v44 = vmax.f32 %v1525_v28, 0.0  ;;  %v1848_v45 = vmax.f32 %v1568_v29, 0.0  ;;  %v1286_v6 = vrot.slane %v8905_v47, %v8677_v38  ;;  %v1290_v24 = vrot.slane %v8905_v47, %v8880_v5  ;;  %v7983_v29 = vld [vmem:[%s10105_s8 + $0x150] sm:$0xff]  }
 0xe42   :  { %v1847_v49 = vmax.f32 %v1527_v34, 0.0  ;;  %v1849_v51 = vmax.f32 %v1570_v36, 0.0 }
 0xe43   :  { %v1862_v52 = vpack.c.bf16 %v1846_v44, %v1830_v42  ;;  %v1864_v54 = vpack.c.bf16 %v1848_v45, %v1832_v43  ;;  %v7985_v45 = vld [vmem:[%s10105_s8 + $0x110] sm:$0xff]  }
 0xe44   :  { %v1863_v50 = vpack.c.bf16 %v1847_v49, %v1831_v46  ;;  %v1865_v11 = vpack.c.bf16 %v1849_v51, %v1833_v48  ;;  %v1606_v12 = vpop.f32.mrb[40].mxu1  ;;  %v1649_v56 = vpop.f32.mrb[44].mxu0  ;;  %v7986_v46 = vld [vmem:[%s10105_s8 + $0x190] sm:$0xff]  }
 0xe45   :  { %v1607_v60 = vadd.f32 %v1606_v12, %v1262_v32  ;;  %v1650_v61 = vadd.f32 %v1649_v56, %v1270_v33  ;;  %v1608_v62 = vpop.f32.mrb[41].mxu1  ;;  %v1651_v63 = vpop.f32.mrb[45].mxu0 }
 0xe46   :  { %v1609_v20 = vadd.f32 %v1608_v62, %v1266_v39  ;;  %v1652_v53 = vadd.f32 %v1651_v63, %v1274_v37  ;;  %v1610_v57 = vpop.f32.mrb[42].mxu1  ;;  %v1653_v4 = vpop.f32.mrb[46].mxu0  ;;  %2938 = vmatprep.mubr.bf16.mxu1 %v1863_v50  ;;  %2979 = vmatprep.mubr.bf16.mxu0 %v1865_v11  ;;  %v7988_v50 = vld [vmem:[%s10105_s8 + $0x1d8] sm:$0xff]  }
 0xe47   :  { %v1611_v7 = vadd.f32 %v1610_v57, %v1262_v32  ;;  %v1654_v8 = vadd.f32 %v1653_v4, %v1270_v33  ;;  %v1612_v9 = vpop.f32.mrb[43].mxu1  ;;  %v1655_v15 = vpop.f32.mrb[47].mxu0  ;;  %2939 = vmatmul.mubr.bf16.vlgmr.msra.gmra.mrb[52].mxu1 %v1862_v52  ;;  %2980 = vmatmul.mubr.bf16.vlgmr.msra.gmra.mrb[56].mxu0 %v1864_v54  ;;  %v1834_v25 = vmax.f32 %v1607_v60, 0.0  ;;  %v1836_v26 = vmax.f32 %v1650_v61, 0.0  ;;  %v7987_v54 = vld [vmem:[%s10105_s8 + $0x158] sm:$0xff]  }
 0xe48   :  { %v1613_v19 = vadd.f32 %v1612_v9, %v1266_v39  ;;  %v1656_v21 = vadd.f32 %v1655_v15, %v1274_v37  ;;  %7334 = vmatpush3.bf16.msra.mxu1 %v7977_v58  ;;  %7356 = vmatpush3.bf16.msra.mxu0 %v7978_v59  ;;  %v1835_v31 = vmax.f32 %v1609_v20, 0.0  ;;  %v1837_v32 = vmax.f32 %v1652_v53, 0.0  ;;  %v7989_v57 = vld [vmem:[%s10105_s8 + $0x118] sm:$0xff]   ;;  %v7991_v15 = vld [vmem:[%s10105_s8 + $0x160] sm:$0xff]  }
 0xe49   :  { %v1850_v27 = vmax.f32 %v1611_v7, 0.0  ;;  %v1852_v28 = vmax.f32 %v1654_v8, 0.0  ;;  %7335 = vmatprep.subr.bf16.mxu1 %v7979_v0  ;;  %7357 = vmatprep.subr.bf16.mxu0 %v7980_v2  ;;  %v1294_v59 = vrot.slane %v8905_v47, %v8887_v13  ;;  %v1302_v0 = vrot.slane %v8905_v47, %v8890_v14 }
 0xe4a   :  { %v1851_v33 = vmax.f32 %v1613_v19, 0.0  ;;  %v1853_v34 = vmax.f32 %v1656_v21, 0.0  ;;  %v1298_v2 = vrot.slane %v8905_v47, %v8893_v17  ;;  %v1306_v4 = vrot.slane %v8905_v47, %v8896_v18 }
 0xe4b   :  { %v8939_v36 = vpack.c.bf16 %v1850_v27, %v1834_v25  ;;  %v8941_v39 = vpack.c.bf16 %v1852_v28, %v1836_v26 }
 0xe4c   :  { %v1867_v37 = vpack.c.bf16 %v1851_v33, %v1835_v31  ;;  %v1869_v42 = vpack.c.bf16 %v1853_v34, %v1837_v32  ;;  %7336 = vmatpush3.bf16.msra.mxu1 %v7981_v23  ;;  %7358 = vmatpush3.bf16.msra.mxu0 %v7982_v22  ;;  %v1692_v43 = vpop.f32.mrb[44].mxu1  ;;  %v1735_v44 = vpop.f32.mrb[48].mxu0 }
 0xe4d   :  { %v1693_v48 = vadd.f32 %v1692_v43, %v1278_v3  ;;  %v1736_v49 = vadd.f32 %v1735_v44, %v1286_v6  ;;  %v1694_v51 = vpop.f32.mrb[45].mxu1  ;;  %v1737_v52 = vpop.f32.mrb[49].mxu0  ;;  %7337 = vmatprep.subr.bf16.mxu1 %v7983_v29  ;;  %7359 = vmatprep.subr.bf16.mxu0 %v7984_v30  ;;  %v7993_v29 = vld [vmem:[%s10105_s8 + $0x120] sm:$0xff]  }
 0xe4e   :  { %v1695_v11 = vadd.f32 %v1694_v51, %v1282_v16  ;;  %v1738_v12 = vadd.f32 %v1737_v52, %v1290_v24  ;;  %v1696_v56 = vpop.f32.mrb[46].mxu1  ;;  %v1739_v58 = vpop.f32.mrb[50].mxu0  ;;  %3020 = vmatprep.mubr.bf16.mxu1 %v1867_v37  ;;  %3061 = vmatprep.mubr.bf16.mxu0 %v1869_v42  ;;  %v7994_v30 = vld [vmem:[%s10105_s8 + $0x1a0] sm:$0xff]   ;;  %v7995_v37 = vld [vmem:[%s10105_s8 + $0x168] sm:$0xff]  }
 0xe4f   :  { %v1697_v60 = vadd.f32 %v1696_v56, %v1278_v3  ;;  %v1740_v61 = vadd.f32 %v1739_v58, %v1286_v6  ;;  %v1698_v62 = vpop.f32.mrb[47].mxu1  ;;  %v1741_v63 = vpop.f32.mrb[51].mxu0  ;;  %v7990_v3 = vld [vmem:[%s10105_s8 + $0x198] sm:$0xff]   ;;  %v1838_v6 = vmax.f32 %v1693_v48, 0.0  ;;  %v1840_v7 = vmax.f32 %v1736_v49, 0.0  ;;  %v7996_v42 = vld [vmem:[%s10105_s8 + $0x1e8] sm:$0xff]  }
 0xe50   :  { %v1699_v20 = vadd.f32 %v1698_v62, %v1282_v16  ;;  %v1742_v53 = vadd.f32 %v1741_v63, %v1290_v24  ;;  %7338 = vmatpush3.bf16.msra.mxu1 %v7985_v45  ;;  %7360 = vmatpush3.bf16.msra.mxu0 %v7986_v46  ;;  %v7992_v16 = vld [vmem:[%s10105_s8 + $0x1e0] sm:$0xff]   ;;  %v1839_v19 = vmax.f32 %v1695_v11, 0.0  ;;  %v1841_v21 = vmax.f32 %v1738_v12, 0.0  ;;  %v7997_v11 = vld [vmem:[%s10105_s8 + $0x128] sm:$0xff]   ;;  %v8000_v62 = vld [vmem:[%s10105_s8 + $0x1f0] sm:$0xff]  }
 0xe51   :  { %v1854_v8 = vmax.f32 %v1697_v60, 0.0  ;;  %v1856_v9 = vmax.f32 %v1740_v61, 0.0  ;;  %7339 = vmatprep.subr.bf16.mxu1 %v7987_v54  ;;  %7361 = vmatprep.subr.bf16.mxu0 %v7988_v50  ;;  %v7998_v12 = vld [vmem:[%s10105_s8 + $0x1a8] sm:$0xff]  }
 0xe52   :  { %v1855_v23 = vmax.f32 %v1699_v20, 0.0  ;;  %v1857_v22 = vmax.f32 %v1742_v53, 0.0 }
 0xe53   :  { %v8975_v24 = vpack.c.bf16 %v1854_v8, %v1838_v6  ;;  %v8977_v47 = vpack.c.bf16 %v1856_v9, %v1840_v7  ;;  %v8001_v6 = vld [vmem:[%s10105_s8 + $0x130] sm:$0xff]   ;;  %v8003_v8 = vld [vmem:[%s10105_s8 + $0x178] sm:$0xff]  }
 0xe54   :  { %v8979_v25 = vpack.c.bf16 %v1855_v23, %v1839_v19  ;;  %v8981_v26 = vpack.c.bf16 %v1857_v22, %v1841_v21  ;;  %7340 = vmatpush3.bf16.msra.mxu1 %v7989_v57  ;;  %7362 = vmatpush3.bf16.msra.mxu0 %v7990_v3  ;;  %v1778_v27 = vpop.f32.mrb[48].mxu1  ;;  %v1821_v28 = vpop.f32.mrb[52].mxu0  ;;  %v8002_v7 = vld [vmem:[%s10105_s8 + $0x1b0] sm:$0xff]   ;;  %v8004_v9 = vld [vmem:[%s10105_s8 + $0x1f8] sm:$0xff]   ;;  %v8007_v19 = vld [vmem:[%s10105_s8 + $0x240] sm:$0xff]  }
 0xe55   :  { %v1779_v31 = vadd.f32 %v1778_v27, %v1294_v59  ;;  %v1822_v32 = vadd.f32 %v1821_v28, %v1302_v0  ;;  %v1780_v33 = vpop.f32.mrb[49].mxu1  ;;  %v1823_v34 = vpop.f32.mrb[53].mxu0  ;;  %7341 = vmatprep.subr.bf16.mxu1 %v7991_v15  ;;  %7363 = vmatprep.subr.bf16.mxu0 %v7992_v16  ;;  %v8005_v15 = vld [vmem:[%s10105_s8 + $0x138] sm:$0xff]   ;;  %v8008_v21 = vld [vmem:[%s10105_s8 + $0x2c0] sm:$0xff]   ;;  %v8011_v27 = vld [vmem:[%s10105_s8 + $0x248] sm:$0xff]  }
 0xe56   :  { %v1781_v43 = vadd.f32 %v1780_v33, %v1298_v2  ;;  %v1824_v44 = vadd.f32 %v1823_v34, %v1306_v4  ;;  %v1782_v45 = vpop.f32.mrb[50].mxu1  ;;  %v1825_v46 = vpop.f32.mrb[54].mxu0  ;;  %v8006_v16 = vld [vmem:[%s10105_s8 + $0x1b8] sm:$0xff]   ;;  %v8009_v23 = vld [vmem:[%s10105_s8 + $0x200] sm:$0xff]   ;;  %v8012_v28 = vld [vmem:[%s10105_s8 + $0x2c8] sm:$0xff]  }
 0xe57   :  { %v1783_v48 = vadd.f32 %v1782_v45, %v1294_v59  ;;  %v1826_v49 = vadd.f32 %v1825_v46, %v1302_v0  ;;  %v1784_v51 = vpop.f32.mrb[51].mxu1  ;;  %v1827_v52 = vpop.f32.mrb[55].mxu0  ;;  %v1842_v56 = vmax.f32 %v1779_v31, 0.0  ;;  %v1844_v58 = vmax.f32 %v1822_v32, 0.0  ;;  %v7999_v59 = vld [vmem:[%s10105_s8 + $0x170] sm:$0xff]   ;;  %v8010_v22 = vld [vmem:[%s10105_s8 + $0x280] sm:$0xff]  }
 0xe58   :  { %v1785_v54 = vadd.f32 %v1784_v51, %v1298_v2  ;;  %v1828_v50 = vadd.f32 %v1827_v52, %v1306_v4  ;;  %7342 = vmatpush3.bf16.msra.mxu1 %v7993_v29  ;;  %7364 = vmatpush3.bf16.msra.mxu0 %v7994_v30  ;;  %v1843_v63 = vmax.f32 %v1781_v43, 0.0  ;;  %v1845_v0 = vmax.f32 %v1824_v44, 0.0  ;;  %v8013_v29 = vld [vmem:[%s10105_s8 + $0x208] sm:$0xff]   ;;  %v8019_v31 = vld [vmem:[%s10105_s8 + $0x258] sm:$0xff]   ;;  %v8025_v43 = vld [vmem:[%s10105_s8 + $0x220] sm:$0xff]  }
 0xe59   :  { %v1858_v60 = vmax.f32 %v1783_v48, 0.0  ;;  %v1860_v61 = vmax.f32 %v1826_v49, 0.0  ;;  %7343 = vmatprep.subr.bf16.mxu1 %v7995_v37  ;;  %7365 = vmatprep.subr.bf16.mxu0 %v7996_v42  ;;  %v8014_v30 = vld [vmem:[%s10105_s8 + $0x288] sm:$0xff]   ;;  %v8020_v32 = vld [vmem:[%s10105_s8 + $0x2d8] sm:$0xff]   ;;  %v8023_v37 = vld [vmem:[%s10105_s8 + $0x260] sm:$0xff]  }
 0xe5a   :  { %v1859_v2 = vmax.f32 %v1785_v54, 0.0  ;;  %v1861_v20 = vmax.f32 %v1828_v50, 0.0  ;;  %v8021_v33 = vld [vmem:[%s10105_s8 + $0x218] sm:$0xff]   ;;  %v8024_v42 = vld [vmem:[%s10105_s8 + $0x2e0] sm:$0xff]   ;;  %v8027_v45 = vld [vmem:[%s10105_s8 + $0x268] sm:$0xff]  }
 0xe5b   :  { %v9007_v53 = vpack.c.bf16 %v1858_v60, %v1842_v56  ;;  %v9009_v57 = vpack.c.bf16 %v1860_v61, %v1844_v58  ;;  %v8022_v34 = vld [vmem:[%s10105_s8 + $0x298] sm:$0xff]   ;;  %v8026_v44 = vld [vmem:[%s10105_s8 + $0x2a0] sm:$0xff]   ;;  %v8028_v46 = vld [vmem:[%s10105_s8 + $0x2e8] sm:$0xff]  }
 0xe5c   :  { %v9011_v3 = vpack.c.bf16 %v1859_v2, %v1843_v63  ;;  %v9013_v4 = vpack.c.bf16 %v1861_v20, %v1845_v0  ;;  %7344 = vmatpush3.bf16.msra.mxu1 %v7997_v11  ;;  %7366 = vmatpush3.bf16.msra.mxu0 %v7998_v12  ;;  %v8029_v48 = vld [vmem:[%s10105_s8 + $0x228] sm:$0xff]   ;;  %v8031_v51 = vld [vmem:[%s10105_s8 + $0x270] sm:$0xff]   ;;  %v8035_v11 = vld [vmem:[%s10105_s8 + $0x278] sm:$0xff]  }
 0xe5d   :  { %7345 = vmatprep.subr.bf16.mxu1 %v7999_v59  ;;  %7367 = vmatprep.subr.bf16.mxu0 %v8000_v62  ;;  %v8030_v49 = vld [vmem:[%s10105_s8 + $0x2a8] sm:$0xff]   ;;  %v8032_v52 = vld [vmem:[%s10105_s8 + $0x2f0] sm:$0xff]   ;;  %v8036_v12 = vld [vmem:[%s10105_s8 + $0x2f8] sm:$0xff]  }
 0xe5e   :  { %v8033_v54 = vld [vmem:[%s10105_s8 + $0x230] sm:$0xff]   ;;  %v8037_v56 = vld [vmem:[%s10105_s8 + $0x238] sm:$0xff]   ;;  %v8039_v60 = vld [vmem:[%s10105_s8 + $0x340] sm:$0xff]  }
 0xe5f   :  { %v8034_v50 = vld [vmem:[%s10105_s8 + $0x2b0] sm:$0xff]   ;;  %v8038_v58 = vld [vmem:[%s10105_s8 + $0x2b8] sm:$0xff]   ;;  %v8040_v61 = vld [vmem:[%s10105_s8 + $0x3c0] sm:$0xff]  }
 0xe60   :  { %7346 = vmatpush3.bf16.msra.mxu1 %v8001_v6  ;;  %7368 = vmatpush3.bf16.msra.mxu0 %v8002_v7  ;;  %v8041_v59 = vld [vmem:[%s10105_s8 + $0x300] sm:$0xff]   ;;  %v8043_v63 = vld [vmem:[%s10105_s8 + $0x348] sm:$0xff]   ;;  %v8050_v6 = vld [vmem:[%s10105_s8 + $0x390] sm:$0xff]  }
 0xe61   :  { %7347 = vmatprep.subr.bf16.mxu1 %v8003_v8  ;;  %7369 = vmatprep.subr.bf16.mxu0 %v8004_v9  ;;  %v8042_v62 = vld [vmem:[%s10105_s8 + $0x380] sm:$0xff]   ;;  %v8044_v0 = vld [vmem:[%s10105_s8 + $0x3c8] sm:$0xff]   ;;  %v8052_v7 = vld [vmem:[%s10105_s8 + $0x3d8] sm:$0xff]  }
 0xe62   :  { %v8045_v2 = vld [vmem:[%s10105_s8 + $0x308] sm:$0xff]   ;;  %v8053_v8 = vld [vmem:[%s10105_s8 + $0x318] sm:$0xff]  }
 0xe63   :  { %v8046_v20 = vld [vmem:[%s10105_s8 + $0x388] sm:$0xff]   ;;  %v8054_v9 = vld [vmem:[%s10105_s8 + $0x398] sm:$0xff]  }
 0xe64   :  { %7348 = vmatpush3.bf16.msra.mxu1 %v8005_v15  ;;  %7370 = vmatpush3.bf16.msra.mxu0 %v8006_v16  ;;  %v8055_v15 = vld [vmem:[%s10105_s8 + $0x360] sm:$0xff]  }
 0xe65   :  { %7377 = vmatprep.subr.bf16.mxu1 %v8007_v19  ;;  %7399 = vmatprep.subr.bf16.mxu0 %v8008_v21  ;;  %v8056_v16 = vld [vmem:[%s10105_s8 + $0x3e0] sm:$0xff]  }
 0xe66   :  { %v8057_v19 = vld [vmem:[%s10105_s8 + $0x320] sm:$0xff]  }
 0xe67   :  { %3021 = vmatmul.mubr.bf16.vlgmr.msra.gmra.mrb[56].mxu1 %v8939_v36  ;;  %3062 = vmatmul.mubr.bf16.vlgmr.msra.gmra.mrb[60].mxu0 %v8941_v39  ;;  %v8015_v36 = vld [vmem:[%s10105_s8 + $0x250] sm:$0xff]   ;;  %v8058_v21 = vld [vmem:[%s10105_s8 + $0x3a0] sm:$0xff]  }
 0xe68   :  { %7378 = vmatpush3.bf16.msra.mxu1 %v8009_v23  ;;  %3102 = vmatprep.mubr.bf16.mxu1 %v8979_v25  ;;  %v8016_v39 = vld [vmem:[%s10105_s8 + $0x2d0] sm:$0xff]   ;;  %v8059_v23 = vld [vmem:[%s10105_s8 + $0x368] sm:$0xff]  }
 0xe69   :  { %7400 = vmatpush3.bf16.msra.mxu0 %v8010_v22  ;;  %3143 = vmatprep.mubr.bf16.mxu0 %v8981_v26  ;;  %v8017_v25 = vld [vmem:[%s10105_s8 + $0x210] sm:$0xff]   ;;  %v8060_v22 = vld [vmem:[%s10105_s8 + $0x3e8] sm:$0xff]  }
 0xe6a   :  { %7379 = vmatprep.subr.bf16.mxu1 %v8011_v27  ;;  %7401 = vmatprep.subr.bf16.mxu0 %v8012_v28  ;;  %v8018_v26 = vld [vmem:[%s10105_s8 + $0x290] sm:$0xff]   ;;  %v8061_v27 = vld [vmem:[%s10105_s8 + $0x328] sm:$0xff]  }
 0xe6b   :  { %v8062_v28 = vld [vmem:[%s10105_s8 + $0x3a8] sm:$0xff]  }
 0xe6c   :  { %7380 = vmatpush3.bf16.msra.mxu1 %v8013_v29  ;;  %v8063_v29 = vld [vmem:[%s10105_s8 + $0x370] sm:$0xff]  }
 0xe6d   :  { %7402 = vmatpush3.bf16.msra.mxu0 %v8014_v30  ;;  %7381 = vmatprep.subr.bf16.mxu1 %v8015_v36  ;;  %v8064_v30 = vld [vmem:[%s10105_s8 + $0x3f0] sm:$0xff]  }
 0xe6e   :  { %7403 = vmatprep.subr.bf16.mxu0 %v8016_v39  ;;  %v8065_v36 = vld [vmem:[%s10105_s8 + $0x330] sm:$0xff]  }
 0xe6f   :  { %v8066_v39 = vld [vmem:[%s10105_s8 + $0x3b0] sm:$0xff]  }
 0xe70   :  { %7382 = vmatpush3.bf16.msra.mxu1 %v8017_v25  ;;  %v8067_v25 = vld [vmem:[%s10105_s8 + $0x378] sm:$0xff]  }
 0xe71   :  { %7404 = vmatpush3.bf16.msra.mxu0 %v8018_v26  ;;  %7383 = vmatprep.subr.bf16.mxu1 %v8019_v31  ;;  %v8068_v26 = vld [vmem:[%s10105_s8 + $0x3f8] sm:$0xff]  }
 0xe72   :  { %7405 = vmatprep.subr.bf16.mxu0 %v8020_v32  ;;  %v8069_v31 = vld [vmem:[%s10105_s8 + $0x338] sm:$0xff]  }
 0xe73   :  { %v8070_v32 = vld [vmem:[%s10105_s8 + $0x3b8] sm:$0xff]  }
 0xe74   :  { %7384 = vmatpush3.bf16.msra.mxu1 %v8021_v33 }
 0xe75   :  { %7406 = vmatpush3.bf16.msra.mxu0 %v8022_v34  ;;  %7385 = vmatprep.subr.bf16.mxu1 %v8023_v37  ;;  %v9244_v37 = vld [vmem:[%s10106_s9] sm:$0x3f] }
 0xe76   :  { %7407 = vmatprep.subr.bf16.mxu0 %v8024_v42  ;;  %v2137_v42 = vrot.slane %v9244_v37, %v8880_v5 }
 0xe78   :  { %7386 = vmatpush3.bf16.msra.mxu1 %v8025_v43 }
 0xe79   :  { %7408 = vmatpush3.bf16.msra.mxu0 %v8026_v44  ;;  %7387 = vmatprep.subr.bf16.mxu1 %v8027_v45 }
 0xe7a   :  { %7409 = vmatprep.subr.bf16.mxu0 %v8028_v46 }
 0xe7c   :  { %7388 = vmatpush3.bf16.msra.mxu1 %v8029_v48 }
 0xe7d   :  { %7410 = vmatpush3.bf16.msra.mxu0 %v8030_v49  ;;  %7389 = vmatprep.subr.bf16.mxu1 %v8031_v51 }
 0xe7e   :  { %7411 = vmatprep.subr.bf16.mxu0 %v8032_v52 }
 0xe80   :  { %7390 = vmatpush3.bf16.msra.mxu1 %v8033_v54 }
 0xe81   :  { %7412 = vmatpush3.bf16.msra.mxu0 %v8034_v50  ;;  %7391 = vmatprep.subr.bf16.mxu1 %v8035_v11 }
 0xe82   :  { %7413 = vmatprep.subr.bf16.mxu0 %v8036_v12 }
 0xe84   :  { %7392 = vmatpush3.bf16.msra.mxu1 %v8037_v56 }
 0xe85   :  { %7414 = vmatpush3.bf16.msra.mxu0 %v8038_v58  ;;  %7421 = vmatprep.subr.bf16.mxu1 %v8039_v60 }
 0xe86   :  { %7443 = vmatprep.subr.bf16.mxu0 %v8040_v61 }
 0xe87   :  { %3103 = vmatmul.mubr.bf16.vlgmr.msra.gmra.mrb[60].mxu1 %v8975_v24  ;;  %v8047_v24 = vld [vmem:[%s10105_s8 + $0x350] sm:$0xff]  }
 0xe88   :  { %3144 = vmatmul.mubr.bf16.vlgmr.msra.gmra.mrb[64].mxu0 %v8977_v47  ;;  %7422 = vmatpush3.bf16.msra.mxu1 %v8041_v59  ;;  %v8048_v47 = vld [vmem:[%s10105_s8 + $0x3d0] sm:$0xff]  }
 0xe89   :  { %3184 = vmatprep.mubr.bf16.mxu1 %v9011_v3  ;;  %7444 = vmatpush3.bf16.msra.mxu0 %v8042_v62  ;;  %v8049_v3 = vld [vmem:[%s10105_s8 + $0x310] sm:$0xff]  }
 0xe8a   :  { %3225 = vmatprep.mubr.bf16.mxu0 %v9013_v4  ;;  %7423 = vmatprep.subr.bf16.mxu1 %v8043_v63  ;;  %v8051_v4 = vld [vmem:[%s10105_s8 + $0x358] sm:$0xff]  }
 0xe8b   :  { %7445 = vmatprep.subr.bf16.mxu0 %v8044_v0 }
 0xe8c   :  { %7424 = vmatpush3.bf16.msra.mxu1 %v8045_v2 }
 0xe8d   :  { %7446 = vmatpush3.bf16.msra.mxu0 %v8046_v20  ;;  %7425 = vmatprep.subr.bf16.mxu1 %v8047_v24 }
 0xe8e   :  { %7447 = vmatprep.subr.bf16.mxu0 %v8048_v47 }
 0xe90   :  { %7426 = vmatpush3.bf16.msra.mxu1 %v8049_v3 }
 0xe91   :  { %7448 = vmatpush3.bf16.msra.mxu0 %v8050_v6  ;;  %7427 = vmatprep.subr.bf16.mxu1 %v8051_v4 }
 0xe92   :  { %7449 = vmatprep.subr.bf16.mxu0 %v8052_v7 }
 0xe94   :  { %7428 = vmatpush3.bf16.msra.mxu1 %v8053_v8 }
 0xe95   :  { %7450 = vmatpush3.bf16.msra.mxu0 %v8054_v9  ;;  %7429 = vmatprep.subr.bf16.mxu1 %v8055_v15 }
 0xe96   :  { %7451 = vmatprep.subr.bf16.mxu0 %v8056_v16 }
 0xe98   :  { %7430 = vmatpush3.bf16.msra.mxu1 %v8057_v19 }
 0xe99   :  { %7452 = vmatpush3.bf16.msra.mxu0 %v8058_v21  ;;  %7431 = vmatprep.subr.bf16.mxu1 %v8059_v23 }
 0xe9a   :  { %7453 = vmatprep.subr.bf16.mxu0 %v8060_v22 }
 0xe9c   :  { %7432 = vmatpush3.bf16.msra.mxu1 %v8061_v27 }
 0xe9d   :  { %7454 = vmatpush3.bf16.msra.mxu0 %v8062_v28  ;;  %7433 = vmatprep.subr.bf16.mxu1 %v8063_v29 }
 0xe9e   :  { %7455 = vmatprep.subr.bf16.mxu0 %v8064_v30 }
 0xea0   :  { %7434 = vmatpush3.bf16.msra.mxu1 %v8065_v36 }
 0xea1   :  { %7456 = vmatpush3.bf16.msra.mxu0 %v8066_v39  ;;  %7435 = vmatprep.subr.bf16.mxu1 %v8067_v25 }
 0xea2   :  { %7457 = vmatprep.subr.bf16.mxu0 %v8068_v26 }
 0xea4   :  { %7436 = vmatpush3.bf16.msra.mxu1 %v8069_v31 }
 0xea5   :  { %7458 = vmatpush3.bf16.msra.mxu0 %v8070_v32  ;;  %7800 = vmatprep.subr.bf16.mxu1 %v8311_v1 }
 0xea6   :  { %7808 = vmatprep.subr.bf16.mxu0 %v8311_v1 }
 0xea7   :  { %3185 = vmatmul.mubr.bf16.vlgmr.msra.gmra.mrb[64].mxu1 %v9007_v53 }
 0xea8   :  { %3226 = vmatmul.mubr.bf16.vlgmr.msra.gmra.mrb[68].mxu0 %v9009_v57  ;;  %7804 = vmatprep.mubr.msk.bf16.mxu1 %vm8312_vm1, %v8311_v1 }
 0xea9   :  { %7810 = vmatprep.mubr.msk.bf16.mxu0 %vm8312_vm1, %v8311_v1 }
 0xf1a   :  { %v7305_v33 = vpop.f32.mrb[52].mxu1  ;;  %v7327_v34 = vpop.f32.mrb[56].mxu0 }
 0xf1b   :  { %v7306_v43 = vpop.f32.mrb[53].mxu1  ;;  %v7328_v53 = vpop.f32.mrb[57].mxu0 }
 0xf1c   :  { %v7307_v44 = vadd.f32 %v7306_v43, %v7305_v33  ;;  %v7329_v57 = vadd.f32 %v7328_v53, %v7327_v34  ;;  %v7308_v45 = vpop.f32.mrb[54].mxu1  ;;  %v7330_v46 = vpop.f32.mrb[58].mxu0 }
 0xf1d   :  { %v7309_v48 = vpop.f32.mrb[55].mxu1  ;;  %v7331_v49 = vpop.f32.mrb[59].mxu0 }
 0xf1e   :  { %v2941_v51 = vadd.f32 %v7307_v44, %v2137_v42  ;;  %v7310_v52 = vadd.f32 %v7309_v48, %v7308_v45  ;;  %v7332_v54 = vadd.f32 %v7331_v49, %v7330_v46 }
 0xf20   :  { %v2982_v50 = vadd.f32 %v7329_v57, %v2941_v51  ;;  %v2944_v11 = vadd.f32 %v7310_v52, %v2137_v42 }
 0xf22   :  { %v2985_v12 = vadd.f32 %v7332_v54, %v2944_v11 }
 0xf3a   :  { %v7349_v56 = vpop.f32.mrb[56].mxu1  ;;  %v7371_v58 = vpop.f32.mrb[60].mxu0 }
 0xf3b   :  { %v7350_v60 = vpop.f32.mrb[57].mxu1  ;;  %v7372_v61 = vpop.f32.mrb[61].mxu0 }
 0xf3c   :  { %v7351_v59 = vadd.f32 %v7350_v60, %v7349_v56  ;;  %v7373_v62 = vadd.f32 %v7372_v61, %v7371_v58  ;;  %v7352_v63 = vpop.f32.mrb[58].mxu1  ;;  %v7374_v0 = vpop.f32.mrb[62].mxu0 }
 0xf3d   :  { %v7353_v2 = vpop.f32.mrb[59].mxu1  ;;  %v7375_v20 = vpop.f32.mrb[63].mxu0 }
 0xf3e   :  { %v3023_v24 = vadd.f32 %v7351_v59, %v2982_v50  ;;  %v7354_v47 = vadd.f32 %v7353_v2, %v7352_v63  ;;  %v7376_v3 = vadd.f32 %v7375_v20, %v7374_v0 }
 0xf40   :  { %v3064_v6 = vadd.f32 %v7373_v62, %v3023_v24  ;;  %v3026_v4 = vadd.f32 %v7354_v47, %v2985_v12 }
 0xf42   :  { %v3067_v7 = vadd.f32 %v7376_v3, %v3026_v4 }
 0xf5a   :  { %v7393_v8 = vpop.f32.mrb[60].mxu1 }
 0xf5b   :  { %v7415_v9 = vpop.f32.mrb[64].mxu0  ;;  %v7394_v15 = vpop.f32.mrb[61].mxu1 }
 0xf5c   :  { %v7395_v16 = vadd.f32 %v7394_v15, %v7393_v8  ;;  %v7416_v19 = vpop.f32.mrb[65].mxu0  ;;  %v7396_v21 = vpop.f32.mrb[62].mxu1 }
 0xf5d   :  { %v7417_v23 = vadd.f32 %v7416_v19, %v7415_v9  ;;  %v7418_v22 = vpop.f32.mrb[66].mxu0  ;;  %v7397_v27 = vpop.f32.mrb[63].mxu1 }
 0xf5e   :  { %v3105_v28 = vadd.f32 %v7395_v16, %v3064_v6  ;;  %v7398_v29 = vadd.f32 %v7397_v27, %v7396_v21  ;;  %v7419_v30 = vpop.f32.mrb[67].mxu0 }
 0xf5f   :  { %v7420_v36 = vadd.f32 %v7419_v30, %v7418_v22 }
 0xf60   :  { %v3146_v39 = vadd.f32 %v7417_v23, %v3105_v28  ;;  %v3108_v25 = vadd.f32 %v7398_v29, %v3067_v7  ;;  %v3271_v23 = vrot.slane %v9244_v37, %v8887_v13 }
 0xf62   :  { %v3149_v26 = vadd.f32 %v7420_v36, %v3108_v25 }
 0xf7a   :  { %v7437_v31 = vpop.f32.mrb[64].mxu1 }
 0xf7b   :  { %v7459_v32 = vpop.f32.mrb[68].mxu0  ;;  %v7438_v33 = vpop.f32.mrb[65].mxu1 }
 0xf7c   :  { %v7439_v34 = vadd.f32 %v7438_v33, %v7437_v31  ;;  %v7460_v42 = vpop.f32.mrb[69].mxu0  ;;  %v7440_v43 = vpop.f32.mrb[66].mxu1  ;;  %v6760_v33 = vld [vmem:[%s10101_s4 + $0x1] ss:$0 sm:$0xff]  ;;  %s10116_s4 = smov 8  }
 0xf7d   :  { %v7461_v53 = vadd.f32 %v7460_v42, %v7459_v32  ;;  %v7462_v44 = vpop.f32.mrb[70].mxu0  ;;  %v7441_v57 = vpop.f32.mrb[67].mxu1 }
 0xf7e   :  { %v3187_v45 = vadd.f32 %v7439_v34, %v3146_v39  ;;  %v7442_v46 = vadd.f32 %v7441_v57, %v7440_v43  ;;  %v7463_v48 = vpop.f32.mrb[71].mxu0  ;;  %v3277_v39 = vrot.slane %v9244_v37, %v8893_v17 }
 0xf7f   :  { %v7464_v49 = vadd.f32 %v7463_v48, %v7462_v44 }
 0xf80   :  { %v3228_v51 = vadd.f32 %v7461_v53, %v3187_v45  ;;  %v3190_v52 = vadd.f32 %v7442_v46, %v3149_v26 }
 0xf82   :  { %v3234_v54 = vadd.f32 %v3228_v51, %v8696_v41  ;;  %v3231_v50 = vadd.f32 %v7464_v49, %v3190_v52  ;;  %v8071_v41 = vld [vmem:[%s10100_s3 + $0x10] sm:$0xff]  }
 0xf83   :  { %7801 = vmatpush3.bf16.msra.mxu1 %v8071_v41 }
 0xf84   :  { %v3235_v11 = vadd.f32 %v3231_v50, %v8698_v55  ;;  %v3236_v12 = vsel %vm131_vm2, %v3234_v54, 0.0  ;;  %v3242_v56 = vmul.f32 %v3234_v54, %v3234_v54  ;;  %v8072_v55 = vld [vmem:[%s10100_s3 + $0x18] sm:$0xff]   ;;  %7802 = vmatprep.subr.bf16.mxu1 %v8311_v1 }
 0xf85   :  { %3237 = vadd.xlane.f32.xlu1 %v3236_v12 }
 0xf86   :  { %v3239_v58 = vsel %vm131_vm2, %v3235_v11, 0.0  ;;  %v3243_v60 = vmul.f32 %v3235_v11, %v3235_v11  ;;  %v3244_v61 = vsel %vm131_vm2, %v3242_v56, 0.0 }
 0xf87   :  { %3240 = vadd.xlane.f32.xlu0 %v3239_v58  ;;  %7803 = vmatpush3.bf16.msra.mxu1 %v8072_v55 }
 0xf88   :  { %v3247_v59 = vsel %vm131_vm2, %v3243_v60, 0.0  ;;  %7814 = vmatprep.subr.bf16.mxu1 %v8311_v1 }
 0xf89   :  { %3245 = vadd.xlane.f32.xlu1 %v3244_v61 }
 0xf8b   :  { %3248 = vadd.xlane.f32.xlu0 %v3247_v59 }
0x1012   :  { %v3238_v62 = vpop.xlane.xlu1 %3237 }
0x1013   :  { %v3250_v63 = vmul.f32 0.03125, %v3238_v62 }
0x1014   :  { %v3241_v0 = vpop.xlane.xlu0 %3240 }
0x1015   :  { %v3251_v2 = vmul.f32 0.03125, %v3241_v0  ;;  %v3254_v24 = vmul.f32 %v3250_v63, %v3250_v63  ;;  %v3260_v21 = vsub.f32 %v3234_v54, %v3250_v63 }
0x1016   :  { %v3246_v20 = vpop.xlane.xlu1 %3245 }
0x1017   :  { %v3252_v47 = vmul.f32 0.03125, %v3246_v20  ;;  %v3255_v6 = vmul.f32 %v3251_v2, %v3251_v2  ;;  %v3261_v27 = vsub.f32 %v3235_v11, %v3251_v2 }
0x1018   :  { %v3249_v3 = vpop.xlane.xlu0 %3248 }
0x1019   :  { %v3256_v4 = vsub.f32 %v3252_v47, %v3254_v24  ;;  %v3253_v7 = vmul.f32 0.03125, %v3249_v3 }
0x101b   :  { %v3258_v8 = vmax.f32 %v3256_v4, 0.0  ;;  %v3257_v9 = vsub.f32 %v3253_v7, %v3255_v6 }
0x101d   :  { %v3262_v15 = vadd.f32 1e-05, %v3258_v8  ;;  %v3259_v16 = vmax.f32 %v3257_v9, 0.0 }
0x101f   :  { %8241 = vrsqrt.f32 %v3262_v15  ;;  %v3263_v19 = vadd.f32 1e-05, %v3259_v16 }
0x1021   :  { %8243 = vrsqrt.f32 %v3263_v19 }
0x1029   :  { %v8242_v22 = vpop.eup %8241 }
0x102a   :  { %v3266_v28 = vmul.f32 %v8242_v22, %v3260_v21 }
0x102b   :  { %v8244_v29 = vpop.eup %8243 }
0x102c   :  { %v3267_v30 = vmul.f32 %v8244_v29, %v3261_v27  ;;  %v3272_v36 = vmul.f32 %v3271_v23, %v3266_v28 }
0x102e   :  { %v3273_v25 = vmul.f32 %v3271_v23, %v3267_v30  ;;  %v9266_v26 = vadd.f32 %v3277_v39, %v3272_v36 }
0x1030   :  { %v9268_v31 = vadd.f32 %v3277_v39, %v3273_v25 }
0x1032   :  { %v3282_v32 = vpack.c.bf16 %v9268_v31, %v9266_v26 }
0x1034   :  { %7805 = vmatmul.mubr.msk.bf16.vlgmr.msra.gmra.mrb[68].mxu1 %vm131_vm2, %v3282_v32 }
0x1035   :  { %7816 = vmatprep.mubr.msk.bf16.mxu1 %vm8312_vm1, %v8311_v1 }
0x1107   :  { %v3345_v34 = vpop.f32.mrb[68].mxu1 }
0x1108   :  { %v3346_v42 = vadd.f32 %v6760_v33, %v3345_v34  ;;  %v7806_v37 = vpop.f32.mrb[69].mxu1 }
0x1109   :  { %v3348_v43 = vpop.f32.mrb[70].mxu1 }
0x110a   :  { %v9278_v53 = vpack.c.bf16 %v3346_v42, %v3346_v42  ;;  %v3349_v44 = vadd.f32 %v6760_v33, %v3348_v43  ;;  %v7807_v57 = vpop.f32.mrb[71].mxu1 }
0x110c   :  { %v9280_v45 = vpack.c.bf16 %v3349_v44, %v3349_v44  ;;  %3355 = vrot.lane.b32.xlu1 %v9278_v53, %s8313_s2 }
0x110e   :  { %3404 = vrot.lane.b32.xlu0 %v9280_v45, %s8313_s2  ;;  %s10117_s2 = smov 16  }
0x117e   :  { %v3356_v46 = vpop.permute.xlu1 %3355 }
0x117f   :  { %v3361_v48 = vsel %vm181_vm3, %v3356_v46, 0 }
0x1180   :  { %7809 = vmatpush3.bf16.xpose.msra.mxu0 %v3361_v48  ;;  %v3405_v49 = vpop.permute.xlu0 %3404 }
0x1181   :  { %v3410_v51 = vsel %vm181_vm3, %v3405_v49, 0  ;;  %7820 = vmatprep.subr.bf16.mxu0 %v8311_v1 }
0x1182   :  { %7815 = vmatpush3.bf16.xpose.msra.mxu1 %v3410_v51 }
0x1183   :  { %7826 = vmatprep.subr.bf16.mxu1 %v8311_v1 }
0x1187   :  { %7811 = vmatmul.mubr.msk.bf16.vlgmr.msra.gmra.mrb[72].mxu0 %vm181_vm3, %v9278_v53 }
0x1188   :  { %7822 = vmatprep.mubr.msk.bf16.mxu0 %vm8312_vm1, %v8311_v1 }
0x1189   :  { %7817 = vmatmul.mubr.msk.bf16.vlgmr.msra.gmra.mrb[72].mxu1 %vm181_vm3, %v9280_v45 }
0x118a   :  { %7828 = vmatprep.mubr.msk.bf16.mxu1 %vm8312_vm1, %v8311_v1 }
0x125a   :  { %v3397_v52 = vpop.f32.mrb[72].mxu0 }
0x125b   :  { %v7812_v54 = vpop.f32.mrb[73].mxu0  ;;  %v3452_v50 = vsel %vm181_vm3, %v3397_v52, -inf }
0x125c   :  { %3453 = vmax.xlane.f32.xlu1 %v3452_v50  ;;  %v3400_v11 = vpop.f32.mrb[74].mxu0  ;;  %v3446_v12 = vpop.f32.mrb[72].mxu1 }
0x125d   :  { %v7813_v56 = vpop.f32.mrb[75].mxu0  ;;  %v7818_v58 = vpop.f32.mrb[73].mxu1  ;;  %v3455_v60 = vsel %vm181_vm3, %v3446_v12, -inf }
0x125e   :  { %3456 = vmax.xlane.f32.xlu0 %v3455_v60  ;;  %v3449_v61 = vpop.f32.mrb[74].mxu1 }
0x125f   :  { %v7819_v59 = vpop.f32.mrb[75].mxu1 }
0x126d   :  { %3476 = vrot.lane.b32.xlu1 %v9278_v53, %s8314_s15 }
0x12e9   :  { %v3454_v41 = vpop.xlane.xlu1 %3453 }
0x12ea   :  { %v3458_v55 = vsub.f32 %v3397_v52, %v3454_v41 }
0x12eb   :  { %v3457_v62 = vpop.xlane.xlu0 %3456 }
0x12ec   :  { %v3460_v63 = vmul.f32 1.442695, %v3458_v55  ;;  %v3459_v0 = vsub.f32 %v3446_v12, %v3457_v62 }
0x12ed   :  { %v3477_v2 = vpop.permute.xlu1 %3476 }
0x12ee   :  { %8245 = vpow2.f32 %v3460_v63  ;;  %v3462_v20 = vmul.f32 1.442695, %v3459_v0  ;;  %v3482_v24 = vsel %vm306_vm4, %v3477_v2, 0 }
0x12ef   :  { %7821 = vmatpush3.bf16.msra.mxu0 %v3482_v24 }
0x12f0   :  { %8247 = vpow2.f32 %v3462_v20  ;;  %7832 = vmatprep.subr.bf16.mxu0 %v8311_v1 }
0x12f8   :  { %v8246_v47 = vpop.eup %8245 }
0x12f9   :  { %v3464_v3 = vsel %vm181_vm3, %v8246_v47, 0.0 }
0x12fa   :  { %v8248_v6 = vpop.eup %8247  ;;  %3465 = vadd.xlane.f32.xlu1 %v3464_v3 }
0x12fb   :  { %v3467_v4 = vsel %vm181_vm3, %v8248_v6, 0.0 }
0x12fc   :  { %3468 = vadd.xlane.f32.xlu0 %v3467_v4 }
0x130b   :  { %3576 = vrot.lane.b32.xlu1 %v9278_v53, %s8315_s16 }
0x130f   :  { %3626 = vrot.lane.b32.xlu1 %v9280_v45, %s8315_s16 }
0x1312   :  { %3524 = vrot.lane.b32.xlu0 %v9280_v45, %s8314_s15 }
0x1313   :  { %3624 = vrot.lane.b32.xlu1 %v9280_v45, %s8316_s17 }
0x1316   :  { %3574 = vrot.lane.b32.xlu0 %v9278_v53, %s8316_s17 }
0x1387   :  { %v3466_v7 = vpop.xlane.xlu1 %3465 }
0x1388   :  { %8249 = vrcp.f32 %v3466_v7 }
0x1389   :  { %v3469_v8 = vpop.xlane.xlu0 %3468 }
0x138a   :  { %8251 = vrcp.f32 %v3469_v8 }
0x138b   :  { %v3577_v16 = vpop.permute.xlu1 %3576 }
0x138c   :  { %v3582_v29 = vsel %vm181_vm3, %v3577_v16, 0 }
0x138d   :  { %v3525_v9 = vpop.permute.xlu0 %3524 }
0x138e   :  { %v3530_v15 = vsel %vm306_vm4, %v3525_v9, 0 }
0x138f   :  { %7827 = vmatpush3.bf16.msra.mxu1 %v3530_v15  ;;  %v3627_v28 = vpop.permute.xlu1 %3626 }
0x1390   :  { %7838 = vmatprep.subr.bf16.mxu1 %v8311_v1  ;;  %v3632_v36 = vsel %vm181_vm3, %v3627_v28, 0 }
0x1391   :  { %v3575_v39 = vpop.permute.xlu0 %3574 }
0x1392   :  { %v8250_v19 = vpop.eup %8249 }
0x1393   :  { %v3472_v21 = vmul.f32 %v8250_v19, %v8246_v47  ;;  %v3625_v25 = vpop.permute.xlu1 %3624 }
0x1394   :  { %v8252_v23 = vpop.eup %8251 }
0x1395   :  { %v3473_v22 = vmul.f32 %v8252_v23, %v8248_v6  ;;  %v3474_v27 = vpack.c.bf16 %v3472_v21, %v3472_v21 }
0x1397   :  { %7823 = vmatmul.mubr.msk.bf16.vlgmr.msra.gmra.mrb[76].mxu0 %vm181_vm3, %v3474_v27  ;;  %v3475_v30 = vpack.c.bf16 %v3473_v22, %v3473_v22 }
0x1398   :  { %7833 = vmatpush3.bf16.xpose.msra.mxu0 %v3582_v29  ;;  %7834 = vmatprep.mubr.msk.bf16.mxu0 %vm8312_vm1, %v8311_v1 }
0x1399   :  { %7829 = vmatmul.mubr.msk.bf16.vlgmr.msra.gmra.mrb[76].mxu1 %vm181_vm3, %v3475_v30  ;;  %7844 = vmatprep.subr.bf16.mxu0 %v8311_v1 }
0x139a   :  { %7839 = vmatpush3.bf16.xpose.msra.mxu1 %v3632_v36  ;;  %7840 = vmatprep.mubr.msk.bf16.mxu1 %vm8312_vm1, %v8311_v1 }
0x139b   :  { %7850 = vmatprep.subr.bf16.mxu1 %v8311_v1 }
0x139f   :  { %7835 = vmatmul.mubr.msk.bf16.vlgmr.msra.gmra.mrb[80].mxu0 %vm181_vm3, %v3575_v39 }
0x13a0   :  { %7846 = vmatprep.mubr.msk.bf16.mxu0 %vm8312_vm1, %v8311_v1 }
0x13a1   :  { %7841 = vmatmul.mubr.msk.bf16.vlgmr.msra.gmra.mrb[80].mxu1 %vm181_vm3, %v3625_v25 }
0x13a2   :  { %7852 = vmatprep.mubr.msk.bf16.mxu1 %vm8312_vm1, %v8311_v1 }
0x146a   :  { %v3518_v32 = vpop.f32.mrb[76].mxu0 }
0x146b   :  { %3572 = vst.msk [vmem:[#allocation2] sm:$0xff] %vm181_vm3, %v3518_v32  ;;  %v7824_v33 = vpop.f32.mrb[77].mxu0 }
0x146c   :  { %v3521_v34 = vpop.f32.mrb[78].mxu0  ;;  %v3566_v42 = vpop.f32.mrb[76].mxu1 }
0x146d   :  { %3573 = vst.msk [vmem:[#allocation2 + $0x8] sm:$0xff] %vm181_vm3, %v3566_v42  ;;  %v7825_v37 = vpop.f32.mrb[79].mxu0  ;;  %v7830_v43 = vpop.f32.mrb[77].mxu1 }
0x146e   :  { %v3569_v44 = vpop.f32.mrb[78].mxu1 }
0x146f   :  { %v7831_v57 = vpop.f32.mrb[79].mxu1 }
0x1472   :  { %v3618_v46 = vpop.f32.mrb[80].mxu0 }
0x1473   :  { %v7836_v48 = vpop.f32.mrb[81].mxu0  ;;  %v3674_v49 = vsel %vm181_vm3, %v3618_v46, -inf }
0x1474   :  { %3675 = vmax.xlane.f32.xlu0 %v3674_v49  ;;  %v3621_v51 = vpop.f32.mrb[82].mxu0  ;;  %v3668_v52 = vpop.f32.mrb[80].mxu1 }
0x1475   :  { %v7837_v54 = vpop.f32.mrb[83].mxu0  ;;  %v7842_v50 = vpop.f32.mrb[81].mxu1  ;;  %v3677_v11 = vsel %vm181_vm3, %v3668_v52, -inf }
0x1476   :  { %3678 = vmax.xlane.f32.xlu1 %v3677_v11  ;;  %v3671_v12 = vpop.f32.mrb[82].mxu1 }
0x1477   :  { %v7843_v56 = vpop.f32.mrb[83].mxu1 }
0x1487   :  { %3698 = vrot.lane.b32.xlu1 %v9278_v53, %s8317_s18 }
0x148b   :  { %3806 = vrot.lane.b32.xlu1 %v9278_v53, %s8318_s19 }
0x148f   :  { %3856 = vrot.lane.b32.xlu1 %v9280_v45, %s8318_s19  ;;  %s10118_s19 = smov 24  }
0x1493   :  { %3854 = vrot.lane.b32.xlu1 %v9280_v45, %s8319_s20 }
0x1501   :  { %v3676_v58 = vpop.xlane.xlu0 %3675 }
0x1502   :  { %v3680_v60 = vsub.f32 %v3618_v46, %v3676_v58 }
0x1503   :  { %v3679_v61 = vpop.xlane.xlu1 %3678 }
0x1504   :  { %v3682_v59 = vmul.f32 1.442695, %v3680_v60  ;;  %v3681_v41 = vsub.f32 %v3668_v52, %v3679_v61 }
0x1506   :  { %8253 = vpow2.f32 %v3682_v59  ;;  %v3684_v55 = vmul.f32 1.442695, %v3681_v41 }
0x1507   :  { %v3699_v62 = vpop.permute.xlu1 %3698 }
0x1508   :  { %8255 = vpow2.f32 %v3684_v55  ;;  %v3704_v63 = vsel %vm306_vm4, %v3699_v62, 0 }
0x1509   :  { %7845 = vmatpush3.bf16.msra.mxu0 %v3704_v63 }
0x150a   :  { %7856 = vmatprep.subr.bf16.mxu0 %v8311_v1 }
0x150b   :  { %v3807_v8 = vpop.permute.xlu1 %3806 }
0x150c   :  { %v3812_v19 = vsel %vm181_vm3, %v3807_v8, 0 }
0x150f   :  { %v3857_v23 = vpop.permute.xlu1 %3856 }
0x1510   :  { %v8254_v0 = vpop.eup %8253  ;;  %v3862_v27 = vsel %vm181_vm3, %v3857_v23, 0 }
0x1511   :  { %v3686_v2 = vsel %vm181_vm3, %v8254_v0, 0.0 }
0x1512   :  { %v8256_v20 = vpop.eup %8255  ;;  %3687 = vadd.xlane.f32.xlu0 %v3686_v2 }
0x1513   :  { %v3689_v24 = vsel %vm181_vm3, %v8256_v20, 0.0  ;;  %v3855_v29 = vpop.permute.xlu1 %3854 }
0x1516   :  { %3690 = vadd.xlane.f32.xlu0 %v3689_v24 }
0x152c   :  { %3746 = vrot.lane.b32.xlu0 %v9280_v45, %s8317_s18 }
0x1530   :  { %3804 = vrot.lane.b32.xlu0 %v9278_v53, %s8319_s20 }
0x159f   :  { %v3688_v47 = vpop.xlane.xlu0 %3687 }
0x15a0   :  { %8257 = vrcp.f32 %v3688_v47 }
0x15a3   :  { %v3691_v3 = vpop.xlane.xlu0 %3690 }
0x15a4   :  { %8259 = vrcp.f32 %v3691_v3 }
0x15a7   :  { %v3747_v6 = vpop.permute.xlu0 %3746 }
0x15a8   :  { %v3752_v4 = vsel %vm306_vm4, %v3747_v6, 0 }
0x15a9   :  { %7851 = vmatpush3.bf16.msra.mxu1 %v3752_v4 }
0x15aa   :  { %v8258_v7 = vpop.eup %8257  ;;  %7862 = vmatprep.subr.bf16.mxu1 %v8311_v1 }
0x15ab   :  { %v3694_v9 = vmul.f32 %v8258_v7, %v8254_v0  ;;  %v3805_v28 = vpop.permute.xlu0 %3804 }
0x15ad   :  { %v3696_v15 = vpack.c.bf16 %v3694_v9, %v3694_v9 }
0x15ae   :  { %v8260_v16 = vpop.eup %8259 }
0x15af   :  { %v3695_v21 = vmul.f32 %v8260_v16, %v8256_v20  ;;  %7847 = vmatmul.mubr.msk.bf16.vlgmr.msra.gmra.mrb[84].mxu0 %vm181_vm3, %v3696_v15 }
0x15b0   :  { %7857 = vmatpush3.bf16.xpose.msra.mxu0 %v3812_v19  ;;  %7858 = vmatprep.mubr.msk.bf16.mxu0 %vm8312_vm1, %v8311_v1 }
0x15b1   :  { %v3697_v22 = vpack.c.bf16 %v3695_v21, %v3695_v21  ;;  %7868 = vmatprep.subr.bf16.mxu0 %v8311_v1 }
0x15b3   :  { %7853 = vmatmul.mubr.msk.bf16.vlgmr.msra.gmra.mrb[84].mxu1 %vm181_vm3, %v3697_v22 }
0x15b4   :  { %7863 = vmatpush3.bf16.xpose.msra.mxu1 %v3862_v27  ;;  %7864 = vmatprep.mubr.msk.bf16.mxu1 %vm8312_vm1, %v8311_v1 }
0x15b5   :  { %7874 = vmatprep.subr.bf16.mxu1 %v8311_v1 }
0x15b7   :  { %7859 = vmatmul.mubr.msk.bf16.vlgmr.msra.gmra.mrb[88].mxu0 %vm181_vm3, %v3805_v28 }
0x15b8   :  { %7870 = vmatprep.mubr.msk.bf16.mxu0 %vm8312_vm1, %v8311_v1 }
0x15bb   :  { %7865 = vmatmul.mubr.msk.bf16.vlgmr.msra.gmra.mrb[88].mxu1 %vm181_vm3, %v3855_v29 }
0x15bc   :  { %7876 = vmatprep.mubr.msk.bf16.mxu1 %vm8312_vm1, %v8311_v1 }
0x1682   :  { %v9372_v30 = vpop.f32.mrb[84].mxu0 }
0x1683   :  { %v7848_v36 = vpop.f32.mrb[85].mxu0 }
0x1684   :  { %v3743_v39 = vpop.f32.mrb[86].mxu0 }
0x1685   :  { %v7849_v25 = vpop.f32.mrb[87].mxu0 }
0x1686   :  { %v9374_v32 = vpop.f32.mrb[84].mxu1 }
0x1687   :  { %v7854_v33 = vpop.f32.mrb[85].mxu1 }
0x1688   :  { %v3791_v34 = vpop.f32.mrb[86].mxu1 }
0x1689   :  { %v7855_v42 = vpop.f32.mrb[87].mxu1 }
0x168a   :  { %v3848_v37 = vpop.f32.mrb[88].mxu0 }
0x168b   :  { %v7860_v43 = vpop.f32.mrb[89].mxu0  ;;  %v3904_v44 = vsel %vm181_vm3, %v3848_v37, -inf }
0x168c   :  { %3905 = vmax.xlane.f32.xlu0 %v3904_v44  ;;  %v3851_v57 = vpop.f32.mrb[90].mxu0 }
0x168d   :  { %v7861_v46 = vpop.f32.mrb[91].mxu0 }
0x168e   :  { %v3898_v48 = vpop.f32.mrb[88].mxu1 }
0x168f   :  { %v7866_v49 = vpop.f32.mrb[89].mxu1  ;;  %v3907_v51 = vsel %vm181_vm3, %v3898_v48, -inf }
0x1690   :  { %3908 = vmax.xlane.f32.xlu1 %v3907_v51  ;;  %v3901_v52 = vpop.f32.mrb[90].mxu1 }
0x1691   :  { %v7867_v54 = vpop.f32.mrb[91].mxu1 }
0x16a1   :  { %3928 = vrot.lane.b32.xlu1 %v9278_v53, %s8320_s21 }
0x16a5   :  { %4036 = vrot.lane.b32.xlu1 %v9278_v53, %s8321_s22 }
0x16a9   :  { %4086 = vrot.lane.b32.xlu1 %v9280_v45, %s8321_s22 }
0x16ad   :  { %4084 = vrot.lane.b32.xlu1 %v9280_v45, %s8322_s23 }
0x1719   :  { %v3906_v50 = vpop.xlane.xlu0 %3905 }
0x171a   :  { %v3910_v11 = vsub.f32 %v3848_v37, %v3906_v50 }
0x171c   :  { %v3912_v12 = vmul.f32 1.442695, %v3910_v11 }
0x171d   :  { %v3909_v56 = vpop.xlane.xlu1 %3908 }
0x171e   :  { %8261 = vpow2.f32 %v3912_v12  ;;  %v3911_v58 = vsub.f32 %v3898_v48, %v3909_v56 }
0x1720   :  { %v3914_v60 = vmul.f32 1.442695, %v3911_v58 }
0x1721   :  { %v3929_v61 = vpop.permute.xlu1 %3928 }
0x1722   :  { %8263 = vpow2.f32 %v3914_v60  ;;  %v3934_v59 = vsel %vm306_vm4, %v3929_v61, 0 }
0x1723   :  { %7869 = vmatpush3.bf16.msra.mxu0 %v3934_v59 }
0x1724   :  { %7880 = vmatprep.subr.bf16.mxu0 %v8311_v1 }
0x1725   :  { %v4037_v3 = vpop.permute.xlu1 %4036 }
0x1726   :  { %v4042_v8 = vsel %vm181_vm3, %v4037_v3, 0 }
0x1728   :  { %v8262_v41 = vpop.eup %8261 }
0x1729   :  { %v3916_v55 = vsel %vm181_vm3, %v8262_v41, 0.0  ;;  %v4087_v15 = vpop.permute.xlu1 %4086 }
0x172a   :  { %3917 = vadd.xlane.f32.xlu0 %v3916_v55  ;;  %v4092_v19 = vsel %vm181_vm3, %v4087_v15, 0 }
0x172c   :  { %v8264_v62 = vpop.eup %8263 }
0x172d   :  { %v3919_v63 = vsel %vm181_vm3, %v8264_v62, 0.0  ;;  %v4085_v23 = vpop.permute.xlu1 %4084 }
0x172e   :  { %3920 = vadd.xlane.f32.xlu0 %v3919_v63 }
0x1744   :  { %3976 = vrot.lane.b32.xlu0 %v9280_v45, %s8320_s21 }
0x1748   :  { %4034 = vrot.lane.b32.xlu0 %v9278_v53, %s8322_s23 }
0x17b7   :  { %v3918_v0 = vpop.xlane.xlu0 %3917 }
0x17b8   :  { %8265 = vrcp.f32 %v3918_v0 }
0x17bb   :  { %v3921_v2 = vpop.xlane.xlu0 %3920 }
0x17bc   :  { %8267 = vrcp.f32 %v3921_v2 }
0x17bf   :  { %v3977_v20 = vpop.permute.xlu0 %3976 }
0x17c0   :  { %v3982_v24 = vsel %vm306_vm4, %v3977_v20, 0 }
0x17c1   :  { %7875 = vmatpush3.bf16.msra.mxu1 %v3982_v24 }
0x17c2   :  { %v8266_v47 = vpop.eup %8265  ;;  %7886 = vmatprep.subr.bf16.mxu1 %v8311_v1 }
0x17c3   :  { %v3924_v6 = vmul.f32 %v8266_v47, %v8262_v41  ;;  %v4035_v21 = vpop.permute.xlu0 %4034 }
0x17c5   :  { %v3926_v4 = vpack.c.bf16 %v3924_v6, %v3924_v6 }
0x17c6   :  { %v8268_v7 = vpop.eup %8267 }
0x17c7   :  { %v3925_v9 = vmul.f32 %v8268_v7, %v8264_v62  ;;  %7871 = vmatmul.mubr.msk.bf16.vlgmr.msra.gmra.mrb[92].mxu0 %vm181_vm3, %v3926_v4  ;;  %v8073_v7 = vld [vmem:[%s10102_s5 + $0x10] sm:$0xff]  }
0x17c8   :  { %7881 = vmatpush3.bf16.xpose.msra.mxu0 %v4042_v8  ;;  %7882 = vmatprep.mubr.msk.bf16.mxu0 %vm8312_vm1, %v8311_v1  ;;  %v8074_v8 = vld [vmem:[%s10102_s5 + $0x18] sm:$0xff]   ;;  %s8328_s5 = smov [#allocation3]  }
0x17c9   :  { %v3927_v16 = vpack.c.bf16 %v3925_v9, %v3925_v9  ;;  %7892 = vmatprep.subr.bf16.mxu0 %v8311_v1  ;;  %s6552_s20 = sshll.u32 %s8328_s5, 4  ;;  %s6553_s20 = int_to_ptr.vmem [resolvable:$true] %s6552_s20 }
0x17ca   :  { %s8287_s21 = scalar_lea.vmem %s6553_s20, 32  ;;  %p8292_p1 = scmp.lt.s32.totalorder %s6553_s20, %s6553_s20 }
0x17cb   :  { %7877 = vmatmul.mubr.msk.bf16.vlgmr.msra.gmra.mrb[92].mxu1 %vm181_vm3, %v3927_v16  ;;  %p8288_p0 = scmp.ne.s32.totalorder %s6553_s20, %s8287_s21  ;;  %p8293_p2 = scmp.lt.s32.totalorder %s8287_s21, %s8287_s21 }
0x17cc   :  { %7887 = vmatpush3.bf16.xpose.msra.mxu1 %v4092_v19  ;;  %7888 = vmatprep.mubr.msk.bf16.mxu1 %vm8312_vm1, %v8311_v1 }
0x17cd   :  { %7898 = vmatprep.subr.bf16.mxu1 %v8311_v1  ;;  %p8294_p3 = por %p8293_p2, %p8292_p1 }
0x17cf   :  { %7883 = vmatmul.mubr.msk.bf16.vlgmr.msra.gmra.mrb[96].mxu0 %vm181_vm3, %v4035_v21  ;;  %p8295_p4 = pnand %p8294_p3, %p8288_p0 }
0x17d0   :  { %7894 = vmatprep.mubr.msk.bf16.mxu0 %vm8312_vm1, %v8311_v1 }
0x17d3   :  { %7889 = vmatmul.mubr.msk.bf16.vlgmr.msra.gmra.mrb[96].mxu1 %vm181_vm3, %v4085_v23 }
0x17d4   :  { %7900 = vmatprep.mubr.msk.bf16.mxu1 %vm8312_vm1, %v8311_v1 }
0x189a   :  { %v3970_v22 = vpop.f32.mrb[92].mxu0 }
0x189b   :  { %v7872_v27 = vpop.f32.mrb[93].mxu0 }
0x189c   :  { %v3973_v28 = vpop.f32.mrb[94].mxu0 }
0x189d   :  { %v7873_v29 = vpop.f32.mrb[95].mxu0 }
0x189e   :  { %v4018_v36 = vpop.f32.mrb[92].mxu1 }
0x189f   :  { %v7878_v39 = vpop.f32.mrb[93].mxu1 }
0x18a0   :  { %v4021_v25 = vpop.f32.mrb[94].mxu1 }
0x18a1   :  { %v7879_v33 = vpop.f32.mrb[95].mxu1 }
0x18a2   :  { %v4078_v34 = vpop.f32.mrb[96].mxu0  ;;  %v9454_v33 = vld [vmem:[%s10106_s9 + $0x8] sm:$0x3f] }
0x18a3   :  { %v7884_v42 = vpop.f32.mrb[97].mxu0  ;;  %v4134_v37 = vsel %vm181_vm3, %v4078_v34, -inf }
0x18a4   :  { %4135 = vmax.xlane.f32.xlu0 %v4134_v37  ;;  %v4081_v43 = vpop.f32.mrb[98].mxu0 }
0x18a5   :  { %v7885_v44 = vpop.f32.mrb[99].mxu0 }
0x18a6   :  { %v4128_v57 = vpop.f32.mrb[96].mxu1 }
0x18a7   :  { %v7890_v46 = vpop.f32.mrb[97].mxu1  ;;  %v4137_v48 = vsel %vm181_vm3, %v4128_v57, -inf }
0x18a8   :  { %4138 = vmax.xlane.f32.xlu1 %v4137_v48  ;;  %v4131_v49 = vpop.f32.mrb[98].mxu1 }
0x18a9   :  { %v7891_v51 = vpop.f32.mrb[99].mxu1 }
0x18b9   :  { %4158 = vrot.lane.b32.xlu1 %v9278_v53, %s8323_s24 }
0x18bd   :  { %3796 = vrot.lane.b32.xlu1 %v9372_v30, %s10116_s4 }
0x18c1   :  { %3798 = vrot.lane.b32.xlu1 %v9374_v32, %s10116_s4 }
0x18c5   :  { %4028 = vrot.lane.b32.xlu1 %v4018_v36, %s10117_s2 }
0x1931   :  { %v4136_v52 = vpop.xlane.xlu0 %4135 }
0x1932   :  { %v4140_v54 = vsub.f32 %v4078_v34, %v4136_v52  ;;  %v4275_v34 = vrot.slane %v9454_v33, %v8609_v40 }
0x1934   :  { %v4142_v50 = vmul.f32 1.442695, %v4140_v54 }
0x1935   :  { %v4139_v11 = vpop.xlane.xlu1 %4138 }
0x1936   :  { %8269 = vpow2.f32 %v4142_v50  ;;  %v4141_v12 = vsub.f32 %v4128_v57, %v4139_v11  ;;  %v6787_v11 = vld [vmem:[%s10103_s6 + $0x100] sm:$0xff] }
0x1938   :  { %v4144_v56 = vmul.f32 1.442695, %v4141_v12  ;;  %v6795_v12 = vld [vmem:[%s10103_s6 + $0x140] sm:$0xff] }
0x1939   :  { %v4159_v58 = vpop.permute.xlu1 %4158 }
0x193a   :  { %8271 = vpow2.f32 %v4144_v56  ;;  %v4164_v60 = vsel %vm306_vm4, %v4159_v58, 0  ;;  %v6788_v56 = vld [vmem:[%s10103_s6 + $0x108] sm:$0xff]  ;;  %v6822_v58 = vcombine.high %v6787_v11, %v6795_v12 }
0x193b   :  { %7893 = vmatpush3.bf16.msra.mxu0 %v4164_v60  ;;  %v6796_v60 = vld [vmem:[%s10103_s6 + $0x148] sm:$0xff] }
0x193c   :  { %7904 = vmatprep.subr.bf16.mxu0 %v8311_v1 }
0x193d   :  { %v3797_v53 = vpop.permute.xlu1 %3796 }
0x193e   :  { %3802 = vst.msk [vmem:[#allocation2] sm:$0xff] %vm628_vm5, %v3797_v53  ;;  %v6821_v53 = vcombine.low %v6787_v11, %v6795_v12  ;;  %v6806_v11 = vld [vmem:[%s10103_s6 + $0x198] sm:$0xff] }
0x1940   :  { %v8270_v30 = vpop.eup %8269 }
0x1941   :  { %v3799_v32 = vpop.permute.xlu1 %3798  ;;  %v4146_v61 = vsel %vm181_vm3, %v8270_v30, 0.0 }
0x1942   :  { %3803 = vst.msk [vmem:[#allocation2 + $0x8] sm:$0xff] %vm628_vm5, %v3799_v32  ;;  %4147 = vadd.xlane.f32.xlu0 %v4146_v61  ;;  %v6824_v32 = vcombine.high %v6788_v56, %v6796_v60  ;;  %v6803_v61 = vld [vmem:[%s10103_s6 + $0x180] sm:$0xff] }
0x1944   :  { %v8272_v59 = vpop.eup %8271 }
0x1945   :  { %v4029_v41 = vpop.permute.xlu1 %4028  ;;  %v4149_v55 = vsel %vm181_vm3, %v8272_v59, 0.0 }
0x1946   :  { %4033 = vst.msk [vmem:[#allocation2 + $0x8] sm:$0xff] %vm859_vm6, %v4029_v41  ;;  %4150 = vadd.xlane.f32.xlu0 %v4149_v55  ;;  %v6804_v41 = vld [vmem:[%s10103_s6 + $0x188] sm:$0xff] }
0x195c   :  { %4206 = vrot.lane.b32.xlu0 %v9280_v45, %s8323_s24 }
0x1960   :  { %4026 = vrot.lane.b32.xlu0 %v3970_v22, %s10117_s2 }
0x19cf   :  { %v4148_v62 = vpop.xlane.xlu0 %4147 }
0x19d0   :  { %8273 = vrcp.f32 %v4148_v62  ;;  %v6812_v62 = vld [vmem:[%s10103_s6 + $0x1c8] sm:$0xff] }
0x19d3   :  { %v4151_v63 = vpop.xlane.xlu0 %4150 }
0x19d4   :  { %8275 = vrcp.f32 %v4151_v63 }
0x19d7   :  { %v4207_v0 = vpop.permute.xlu0 %4206 }
0x19d8   :  { %v4212_v2 = vsel %vm306_vm4, %v4207_v0, 0  ;;  %v6839_v0 = vcombine.low %v6804_v41, %v6812_v62 }
0x19d9   :  { %7899 = vmatpush3.bf16.msra.mxu1 %v4212_v2  ;;  %v6840_v2 = vcombine.high %v6804_v41, %v6812_v62 }
0x19da   :  { %v8274_v20 = vpop.eup %8273  ;;  %4660 = vmatprep.subr.bf16.mxu1 %v6822_v58 }
0x19db   :  { %v4154_v24 = vmul.f32 %v8274_v20, %v8270_v30  ;;  %v4027_v47 = vpop.permute.xlu0 %4026  ;;  %v6823_v30 = vcombine.low %v6788_v56, %v6796_v60  ;;  %v6789_v20 = vld [vmem:[%s10103_s6 + $0x110] sm:$0xff] }
0x19dc   :  { %4032 = vst.msk [vmem:[#allocation2] sm:$0xff] %vm859_vm6, %v4027_v47  ;;  %v6790_v47 = vld [vmem:[%s10103_s6 + $0x118] sm:$0xff] }
0x19dd   :  { %v4156_v3 = vpack.c.bf16 %v4154_v24, %v4154_v24  ;;  %v6797_v24 = vld [vmem:[%s10103_s6 + $0x150] sm:$0xff] }
0x19de   :  { %v8276_v6 = vpop.eup %8275 }
0x19df   :  { %v4155_v4 = vmul.f32 %v8276_v6, %v8272_v59  ;;  %7895 = vmatmul.mubr.msk.bf16.vlgmr.msra.gmra.mrb[100].mxu0 %vm181_vm3, %v4156_v3  ;;  %v6811_v59 = vld [vmem:[%s10103_s6 + $0x1c0] sm:$0xff]  ;;  %v6825_v3 = vcombine.low %v6789_v20, %v6797_v24  ;;  %v6826_v6 = vcombine.high %v6789_v20, %v6797_v24  ;;  %v6816_v20 = vld [vmem:[%s10103_s6 + $0x1e8] sm:$0xff] }
0x19e0   :  { %7908 = vmatprep.mubr.msk.bf16.mxu0 %vm8312_vm1, %v8311_v1  ;;  %7905 = vmatpush3.bf16.msra.mxu0 %v8073_v7  ;;  %v6838_v55 = vcombine.high %v6803_v61, %v6811_v59  ;;  %v6837_v63 = vcombine.low %v6803_v61, %v6811_v59  ;;  %v6800_v61 = vld [vmem:[%s10103_s6 + $0x168] sm:$0xff] }
0x19e1   :  { %v4157_v45 = vpack.c.bf16 %v4155_v4, %v4155_v4  ;;  %7906 = vmatprep.subr.bf16.mxu0 %v8311_v1  ;;  %v6798_v4 = vld [vmem:[%s10103_s6 + $0x158] sm:$0xff] }
0x19e2   :  { %v6828_v7 = vcombine.high %v6790_v47, %v6798_v4 }
0x19e3   :  { %7901 = vmatmul.mubr.msk.bf16.vlgmr.msra.gmra.mrb[100].mxu1 %vm181_vm3, %v4157_v45  ;;  %v6827_v45 = vcombine.low %v6790_v47, %v6798_v4  ;;  %v6793_v4 = vld [vmem:[%s10103_s6 + $0x130] sm:$0xff] }
0x19e4   :  { %4692 = vmatprep.mubr.bf16.mxu1 %v8327_v10  ;;  %7907 = vmatpush3.bf16.msra.mxu0 %v8074_v8 }
0x19e5   :  { %4703 = vmatprep.subr.bf16.mxu0 %v6824_v32  ;;  %4661 = vmatpush1.bf16.msra.mxu1 %v6821_v53  ;;  %v6791_v53 = vld [vmem:[%s10103_s6 + $0x120] sm:$0xff]  ;;  %v6792_v32 = vld [vmem:[%s10103_s6 + $0x128] sm:$0xff] }
0x19e6   :  { %4662 = vmatprep.subr.bf16.mxu1 %v6838_v55  ;;  %v6832_v62 = vcombine.high %v6792_v32, %v6800_v61  ;;  %v6831_v47 = vcombine.low %v6792_v32, %v6800_v61  ;;  %v8096_v32 = vld [vmem:[%s10105_s8 + $0x4e8] sm:$0xff]  }
0x19e7   :  { %v8097_v61 = vld [vmem:[%s10105_s8 + $0x428] sm:$0xff]  }
0x19e9   :  { %4663 = vmatpush1.bf16.msra.mxu1 %v6837_v63  ;;  %v6807_v63 = vld [vmem:[%s10103_s6 + $0x1a0] sm:$0xff] }
0x19ea   :  { %4746 = vmatprep.subr.bf16.mxu1 %v6826_v6 }
0x1ab2   :  { %v4200_v9 = vpop.f32.mrb[100].mxu0 }
0x1ab3   :  { %4256 = vrot.lane.b32.xlu0 %v4200_v9, %s10118_s19  ;;  %v7896_v15 = vpop.f32.mrb[101].mxu0 }
0x1ab4   :  { %v4203_v16 = vpop.f32.mrb[102].mxu0 }
0x1ab5   :  { %v7897_v19 = vpop.f32.mrb[103].mxu0 }
0x1ab6   :  { %v4248_v21 = vpop.f32.mrb[100].mxu1 }
0x1ab7   :  { %4258 = vrot.lane.b32.xlu1 %v4248_v21, %s10118_s19  ;;  %v7902_v23 = vpop.f32.mrb[101].mxu1 }
0x1ab8   :  { %v4251_v22 = vpop.f32.mrb[102].mxu1 }
0x1ab9   :  { %v7903_v27 = vpop.f32.mrb[103].mxu1 }
0x1b25   :  { %v4257_v28 = vpop.permute.xlu0 %4256 }
0x1b26   :  { %4262 = vst.msk [vmem:[#allocation2] sm:$0xff] %vm1090_vm7, %v4257_v28 }
0x1b29   :  { %v4259_v29 = vpop.permute.xlu1 %4258 }
0x1b2a   :  { %4263 = vst.msk [vmem:[#allocation2 + $0x8] sm:$0xff] %vm1090_vm7, %v4259_v29 }
0x1b2d   :  { %v4264_v36 = vld [vmem:[#allocation2] sm:$0xff] }
0x1b31   :  { %v4265_v39 = vld [vmem:[#allocation2 + $0x8] sm:$0xff] }
0x1b32   :  { %v4266_v25 = vpack.c.bf16 %v4265_v39, %v4264_v36 }
0x1b34   :  { %7909 = vmatmul.mubr.msk.bf16.vlgmr.msra.gmra.mrb[104].mxu0 %vm131_vm2, %v4266_v25 }
0x1b35   :  { %4735 = vmatprep.mubr.bf16.mxu0 %v8327_v10  ;;  %4704 = vmatpush1.bf16.msra.mxu0 %v6823_v30  ;;  %v6799_v30 = vld [vmem:[%s10103_s6 + $0x160] sm:$0xff] }
0x1b36   :  { %4705 = vmatprep.subr.bf16.mxu0 %v6840_v2  ;;  %v6830_v55 = vcombine.high %v6791_v53, %v6799_v30  ;;  %v6808_v2 = vld [vmem:[%s10103_s6 + $0x1a8] sm:$0xff]  ;;  %v6829_v24 = vcombine.low %v6791_v53, %v6799_v30  ;;  %v8094_v53 = vld [vmem:[%s10105_s8 + $0x4a0] sm:$0xff]  }
0x1b37   :  { %v6848_v6 = vcombine.high %v6808_v2, %v6816_v20  ;;  %v8095_v30 = vld [vmem:[%s10105_s8 + $0x468] sm:$0xff]  }
0x1b39   :  { %4706 = vmatpush1.bf16.msra.mxu0 %v6839_v0  ;;  %v6815_v0 = vld [vmem:[%s10103_s6 + $0x1e0] sm:$0xff] }
0x1b3a   :  { %4789 = vmatprep.subr.bf16.mxu0 %v6828_v7  ;;  %v6794_v7 = vld [vmem:[%s10103_s6 + $0x138] sm:$0xff] }
0x1c07   :  { %v4325_v42 = vpop.f32.mrb[104].mxu0 }
0x1c08   :  { %v4326_v37 = vadd.f32 %v4325_v42, %v4275_v34  ;;  %v7910_v43 = vpop.f32.mrb[105].mxu0 }
0x1c09   :  { %v4328_v44 = vpop.f32.mrb[106].mxu0 }
0x1c0a   :  { %v9459_v57 = vadd.f32 %v4326_v37, %v9266_v26  ;;  %v4329_v46 = vadd.f32 %v4328_v44, %v4275_v34  ;;  %v7911_v48 = vpop.f32.mrb[107].mxu0  ;;  %v4369_v44 = vrot.slane %v9454_v33, %v8673_v35 }
0x1c0c   :  { %v9462_v49 = vadd.f32 %v4329_v46, %v9268_v31  ;;  %v4334_v51 = vsel %vm131_vm2, %v9459_v57, 0.0  ;;  %v4340_v52 = vmul.f32 %v9459_v57, %v9459_v57 }
0x1c0d   :  { %4335 = vadd.xlane.f32.xlu0 %v4334_v51 }
0x1c0e   :  { %v4337_v54 = vsel %vm131_vm2, %v9462_v49, 0.0  ;;  %v4342_v50 = vsel %vm131_vm2, %v4340_v52, 0.0  ;;  %v4341_v26 = vmul.f32 %v9462_v49, %v9462_v49  ;;  %v4375_v52 = vrot.slane %v9454_v33, %v8677_v38 }
0x1c0f   :  { %4338 = vadd.xlane.f32.xlu1 %v4337_v54 }
0x1c10   :  { %v4345_v31 = vsel %vm131_vm2, %v4341_v26, 0.0 }
0x1c11   :  { %4343 = vadd.xlane.f32.xlu0 %v4342_v50 }
0x1c15   :  { %4346 = vadd.xlane.f32.xlu0 %v4345_v31  ;;  %v6805_v31 = vld [vmem:[%s10103_s6 + $0x190] sm:$0xff] }
0x1c9a   :  { %v4336_v8 = vpop.xlane.xlu0 %4335 }
0x1c9b   :  { %v4348_v9 = vmul.f32 0.03125, %v4336_v8  ;;  %v6802_v8 = vld [vmem:[%s10103_s6 + $0x178] sm:$0xff] }
0x1c9c   :  { %v4339_v15 = vpop.xlane.xlu1 %4338 }
0x1c9d   :  { %v4352_v19 = vmul.f32 %v4348_v9, %v4348_v9  ;;  %v4349_v21 = vmul.f32 0.03125, %v4339_v15  ;;  %v4358_v37 = vsub.f32 %v9459_v57, %v4348_v9  ;;  %v6813_v57 = vld [vmem:[%s10103_s6 + $0x1d0] sm:$0xff]  ;;  %v6845_v9 = vcombine.low %v6807_v63, %v6815_v0 }
0x1c9e   :  { %v4344_v16 = vpop.xlane.xlu0 %4343  ;;  %v6842_v58 = vcombine.high %v6805_v31, %v6813_v57  ;;  %v6841_v59 = vcombine.low %v6805_v31, %v6813_v57  ;;  %v6847_v15 = vcombine.low %v6808_v2, %v6816_v20  ;;  %v8087_v31 = vld [vmem:[%s10105_s8 + $0x458] sm:$0xff]  }
0x1c9f   :  { %v4350_v23 = vmul.f32 0.03125, %v4344_v16  ;;  %v4353_v28 = vmul.f32 %v4349_v21, %v4349_v21  ;;  %v4359_v48 = vsub.f32 %v9462_v49, %v4349_v21  ;;  %v6814_v49 = vld [vmem:[%s10103_s6 + $0x1d8] sm:$0xff]  ;;  %v6809_v21 = vld [vmem:[%s10103_s6 + $0x1b0] sm:$0xff] }
0x1ca0   :  { %v6844_v60 = vcombine.high %v6806_v11, %v6814_v49  ;;  %v6843_v41 = vcombine.low %v6806_v11, %v6814_v49  ;;  %v8088_v57 = vld [vmem:[%s10105_s8 + $0x4d8] sm:$0xff]  }
0x1ca1   :  { %v4354_v22 = vsub.f32 %v4350_v23, %v4352_v19  ;;  %v6836_v19 = vcombine.high %v6794_v7, %v6802_v8  ;;  %v6817_v23 = vld [vmem:[%s10103_s6 + $0x1f0] sm:$0xff]  ;;  %v8089_v11 = vld [vmem:[%s10105_s8 + $0x418] sm:$0xff]  }
0x1ca2   :  { %v4347_v27 = vpop.xlane.xlu0 %4346  ;;  %v8090_v49 = vld [vmem:[%s10105_s8 + $0x498] sm:$0xff]  }
0x1ca3   :  { %v4356_v29 = vmax.f32 %v4354_v22, 0.0  ;;  %v4351_v36 = vmul.f32 0.03125, %v4347_v27  ;;  %v6810_v22 = vld [vmem:[%s10103_s6 + $0x1b8] sm:$0xff] }
0x1ca4   :  { %v6818_v27 = vld [vmem:[%s10103_s6 + $0x1f8] sm:$0xff] }
0x1ca5   :  { %v4360_v39 = vadd.f32 1e-05, %v4356_v29  ;;  %v4355_v25 = vsub.f32 %v4351_v36, %v4353_v28  ;;  %v6835_v29 = vcombine.low %v6794_v7, %v6802_v8  ;;  %v6850_v36 = vcombine.high %v6809_v21, %v6817_v23  ;;  %v8104_v2 = vld [vmem:[%s10105_s8 + $0x4f8] sm:$0xff]  }
0x1ca6   :  { %v8105_v20 = vld [vmem:[%s10105_s8 + $0x438] sm:$0xff]  }
0x1ca7   :  { %8277 = vrsqrt.f32 %v4360_v39  ;;  %v4357_v34 = vmax.f32 %v4355_v25, 0.0  ;;  %v6852_v39 = vcombine.high %v6810_v22, %v6818_v27  ;;  %v6849_v25 = vcombine.low %v6809_v21, %v6817_v23 }
0x1ca9   :  { %v4361_v42 = vadd.f32 1e-05, %v4357_v34  ;;  %v6851_v34 = vcombine.low %v6810_v22, %v6818_v27 }
0x1cab   :  { %8279 = vrsqrt.f32 %v4361_v42  ;;  %v8075_v42 = vld [vmem:[%s10105_s8 + $0x440] sm:$0xff]  }
0x1cb1   :  { %v8278_v43 = vpop.eup %8277 }
0x1cb2   :  { %v4364_v46 = vmul.f32 %v8278_v43, %v4358_v37  ;;  %v8076_v37 = vld [vmem:[%s10105_s8 + $0x4c0] sm:$0xff]  }
0x1cb3   :  { %v8077_v43 = vld [vmem:[%s10105_s8 + $0x400] sm:$0xff]  }
0x1cb4   :  { %v4370_v54 = vmul.f32 %v4369_v44, %v4364_v46  ;;  %v8079_v46 = vld [vmem:[%s10105_s8 + $0x448] sm:$0xff]  }
0x1cb5   :  { %v8280_v51 = vpop.eup %8279 }
0x1cb6   :  { %v4365_v50 = vmul.f32 %v8280_v51, %v4359_v48  ;;  %v9528_v33 = vadd.f32 %v4375_v52, %v4370_v54  ;;  %v8081_v48 = vld [vmem:[%s10105_s8 + $0x408] sm:$0xff]   ;;  %v8084_v54 = vld [vmem:[%s10105_s8 + $0x4d0] sm:$0xff]  }
0x1cb7   :  { %v8082_v51 = vld [vmem:[%s10105_s8 + $0x488] sm:$0xff]  }
0x1cb8   :  { %v4371_v26 = vmul.f32 %v4369_v44, %v4365_v50  ;;  %v8078_v44 = vld [vmem:[%s10105_s8 + $0x480] sm:$0xff]   ;;  %v8085_v50 = vld [vmem:[%s10105_s8 + $0x410] sm:$0xff]  }
0x1cba   :  { %v9530_v12 = vadd.f32 %v4375_v52, %v4371_v26  ;;  %v8083_v52 = vld [vmem:[%s10105_s8 + $0x450] sm:$0xff]  }
0x1cbb   :  { %v8086_v26 = vld [vmem:[%s10105_s8 + $0x490] sm:$0xff]  }
0x1cbc   :  { %v9534_v56 = vpack.c.bf16 %v9530_v12, %v9528_v33 }
0x1cbe   :  { %6853 = vmatmul.mubr.msk.bf16.vlgmr.msra.gmra.mrb[104].mxu1 %vm131_vm2, %v9534_v56  ;;  %6854 = vmatmul.mubr.msk.bf16.vlgmr.msra.gmra.mrb[108].mxu0 %vm131_vm2, %v9534_v56 }
0x1cbf   :  { %4747 = vmatpush1.bf16.msra.mxu1 %v6825_v3  ;;  %4790 = vmatpush1.bf16.msra.mxu0 %v6827_v45  ;;  %v6846_v3 = vcombine.high %v6807_v63, %v6815_v0  ;;  %v6801_v45 = vld [vmem:[%s10103_s6 + $0x170] sm:$0xff]  ;;  %v8103_v0 = vld [vmem:[%s10105_s8 + $0x478] sm:$0xff]  }
0x1cc0   :  { %4748 = vmatprep.subr.bf16.mxu1 %v6842_v58  ;;  %4791 = vmatprep.subr.bf16.mxu0 %v6844_v60  ;;  %v6834_v16 = vcombine.high %v6793_v4, %v6801_v45  ;;  %v6833_v28 = vcombine.low %v6793_v4, %v6801_v45  ;;  %v8092_v58 = vld [vmem:[%s10105_s8 + $0x4e0] sm:$0xff]   ;;  %v8102_v63 = vld [vmem:[%s10105_s8 + $0x4b0] sm:$0xff]  }
0x1cc1   :  { %4778 = vmatprep.mubr.bf16.mxu1 %v8327_v10  ;;  %4821 = vmatprep.mubr.bf16.mxu0 %v8327_v10  ;;  %v8093_v60 = vld [vmem:[%s10105_s8 + $0x420] sm:$0xff]  }
0x1cc3   :  { %4749 = vmatpush1.bf16.msra.mxu1 %v6841_v59  ;;  %4792 = vmatpush1.bf16.msra.mxu0 %v6843_v41  ;;  %v8098_v59 = vld [vmem:[%s10105_s8 + $0x4a8] sm:$0xff]   ;;  %v8099_v41 = vld [vmem:[%s10105_s8 + $0x470] sm:$0xff]  }
0x1cc4   :  { %4832 = vmatprep.subr.bf16.mxu1 %v6830_v55  ;;  %4875 = vmatprep.subr.bf16.mxu0 %v6832_v62  ;;  %v8100_v55 = vld [vmem:[%s10105_s8 + $0x4f0] sm:$0xff]  }
0x1cc5   :  { %v8101_v62 = vld [vmem:[%s10105_s8 + $0x430] sm:$0xff]  }
0x1cc6   :  { %6855 = vmatmul.mubr.msk.bf16.vlgmr.msra.gmra.mrb[108].mxu1 %vm131_vm2, %v9534_v56  ;;  %6856 = vmatmul.mubr.msk.bf16.vlgmr.msra.gmra.mrb[112].mxu0 %vm131_vm2, %v9534_v56 }
0x1cc7   :  { %4833 = vmatpush1.bf16.msra.mxu1 %v6829_v24  ;;  %4876 = vmatpush1.bf16.msra.mxu0 %v6831_v47  ;;  %v8106_v24 = vld [vmem:[%s10105_s8 + $0x4b8] sm:$0xff]   ;;  %v8107_v47 = vld [vmem:[%s10105_s8 + $0x540] sm:$0xff]  }
0x1cc8   :  { %4834 = vmatprep.subr.bf16.mxu1 %v6846_v3  ;;  %4877 = vmatprep.subr.bf16.mxu0 %v6848_v6  ;;  %v8108_v3 = vld [vmem:[%s10105_s8 + $0x5c0] sm:$0xff]   ;;  %v6819_v6 = vld [vmem:[%s10104_s7 + $0x10] sm:$0xff] }
0x1cc9   :  { %4864 = vmatprep.mubr.bf16.mxu1 %v8327_v10  ;;  %4907 = vmatprep.mubr.bf16.mxu0 %v8327_v10  ;;  %v4420_v4 = vrot.slane %v6819_v6, %v8609_v40  ;;  %v4428_v45 = vrot.slane %v6819_v6, %v8677_v38  ;;  %v4424_v7 = vrot.slane %v6819_v6, %v8673_v35 }
0x1cca   :  { %v4432_v8 = vrot.slane %v6819_v6, %v8880_v5 }
0x1ccb   :  { %4835 = vmatpush1.bf16.msra.mxu1 %v6845_v9  ;;  %4878 = vmatpush1.bf16.msra.mxu0 %v6847_v15 }
0x1ccc   :  { %4918 = vmatprep.subr.bf16.mxu1 %v6834_v16  ;;  %4961 = vmatprep.subr.bf16.mxu0 %v6836_v19 }
0x1cce   :  { %6857 = vmatmul.mubr.msk.bf16.vlgmr.msra.gmra.mrb[112].mxu1 %vm131_vm2, %v9534_v56  ;;  %6858 = vmatmul.mubr.msk.bf16.vlgmr.msra.gmra.mrb[116].mxu0 %vm131_vm2, %v9534_v56 }
0x1ccf   :  { %4919 = vmatpush1.bf16.msra.mxu1 %v6833_v28  ;;  %4962 = vmatpush1.bf16.msra.mxu0 %v6835_v29 }
0x1cd0   :  { %4920 = vmatprep.subr.bf16.mxu1 %v6850_v36  ;;  %4963 = vmatprep.subr.bf16.mxu0 %v6852_v39 }
0x1cd1   :  { %4950 = vmatprep.mubr.bf16.mxu1 %v8327_v10  ;;  %4993 = vmatprep.mubr.bf16.mxu0 %v8327_v10  ;;  %v8080_v10 = vld [vmem:[%s10105_s8 + $0x4c8] sm:$0xff]  }
0x1cd3   :  { %4921 = vmatpush1.bf16.msra.mxu1 %v6849_v25  ;;  %4964 = vmatpush1.bf16.msra.mxu0 %v6851_v34 }
0x1cd4   :  { %7503 = vmatprep.subr.bf16.mxu1 %v8075_v42  ;;  %7525 = vmatprep.subr.bf16.mxu0 %v8076_v37  ;;  %v4436_v42 = vrot.slane %v6819_v6, %v8887_v13  ;;  %v4444_v37 = vrot.slane %v6819_v6, %v8890_v14 }
0x1cd6   :  { %6859 = vmatmul.mubr.msk.bf16.vlgmr.msra.gmra.mrb[116].mxu1 %vm131_vm2, %v9534_v56  ;;  %6860 = vmatmul.mubr.msk.bf16.vlgmr.msra.gmra.mrb[120].mxu0 %vm131_vm2, %v9534_v56  ;;  %v8091_v56 = vld [vmem:[%s10105_s8 + $0x460] sm:$0xff]  }
0x1cd7   :  { %7504 = vmatpush3.bf16.msra.mxu1 %v8077_v43  ;;  %7526 = vmatpush3.bf16.msra.mxu0 %v8078_v44 }
0x1cd8   :  { %7505 = vmatprep.subr.bf16.mxu1 %v8079_v46  ;;  %7527 = vmatprep.subr.bf16.mxu0 %v8080_v10  ;;  %v4440_v46 = vrot.slane %v6819_v6, %v8893_v17  ;;  %v4448_v10 = vrot.slane %v6819_v6, %v8896_v18 }
0x1cdb   :  { %7506 = vmatpush3.bf16.msra.mxu1 %v8081_v48  ;;  %7528 = vmatpush3.bf16.msra.mxu0 %v8082_v51 }
0x1cdc   :  { %7507 = vmatprep.subr.bf16.mxu1 %v8083_v52  ;;  %7529 = vmatprep.subr.bf16.mxu0 %v8084_v54 }
0x1cdf   :  { %7508 = vmatpush3.bf16.msra.mxu1 %v8085_v50  ;;  %7530 = vmatpush3.bf16.msra.mxu0 %v8086_v26 }
0x1ce0   :  { %7509 = vmatprep.subr.bf16.mxu1 %v8087_v31  ;;  %7531 = vmatprep.subr.bf16.mxu0 %v8088_v57 }
0x1ce3   :  { %7510 = vmatpush3.bf16.msra.mxu1 %v8089_v11  ;;  %7532 = vmatpush3.bf16.msra.mxu0 %v8090_v49  ;;  %v9722_v11 = vld [vmem:[%s10104_s7 + $0x18] sm:$0xff] }
0x1ce4   :  { %7511 = vmatprep.subr.bf16.mxu1 %v8091_v56  ;;  %7533 = vmatprep.subr.bf16.mxu0 %v8092_v58  ;;  %v4460_v6 = vrot.slane %v9722_v11, %v8677_v38  ;;  %v8114_v38 = vld [vmem:[%s10105_s8 + $0x588] sm:$0xff]  }
0x1ce7   :  { %7512 = vmatpush3.bf16.msra.mxu1 %v8093_v60  ;;  %7534 = vmatpush3.bf16.msra.mxu0 %v8094_v53 }
0x1ce8   :  { %7513 = vmatprep.subr.bf16.mxu1 %v8095_v30  ;;  %7535 = vmatprep.subr.bf16.mxu0 %v8096_v32  ;;  %v8109_v32 = vld [vmem:[%s10105_s8 + $0x500] sm:$0xff]  }
0x1ceb   :  { %7514 = vmatpush3.bf16.msra.mxu1 %v8097_v61  ;;  %7536 = vmatpush3.bf16.msra.mxu0 %v8098_v59  ;;  %v8110_v61 = vld [vmem:[%s10105_s8 + $0x580] sm:$0xff]  }
0x1cec   :  { %7515 = vmatprep.subr.bf16.mxu1 %v8099_v41  ;;  %7537 = vmatprep.subr.bf16.mxu0 %v8100_v55 }
0x1cef   :  { %7516 = vmatpush3.bf16.msra.mxu1 %v8101_v62  ;;  %7538 = vmatpush3.bf16.msra.mxu0 %v8102_v63  ;;  %v8111_v63 = vld [vmem:[%s10105_s8 + $0x548] sm:$0xff]  }
0x1cf0   :  { %7517 = vmatprep.subr.bf16.mxu1 %v8103_v0  ;;  %7539 = vmatprep.subr.bf16.mxu0 %v8104_v2  ;;  %v8112_v0 = vld [vmem:[%s10105_s8 + $0x5c8] sm:$0xff]   ;;  %v4452_v2 = vrot.slane %v9722_v11, %v8609_v40 }
0x1cf3   :  { %7518 = vmatpush3.bf16.msra.mxu1 %v8105_v20  ;;  %7540 = vmatpush3.bf16.msra.mxu0 %v8106_v24 }
0x1cf4   :  { %7547 = vmatprep.subr.bf16.mxu1 %v8107_v47  ;;  %7569 = vmatprep.subr.bf16.mxu0 %v8108_v3 }
0x1d91   :  { %v4694_v9 = vpop.f32.mrb[104].mxu1  ;;  %v4737_v15 = vpop.f32.mrb[108].mxu0 }
0x1d92   :  { %v4695_v16 = vadd.f32 %v4694_v9, %v4420_v4  ;;  %v4738_v19 = vadd.f32 %v4737_v15, %v4428_v45  ;;  %v4696_v21 = vpop.f32.mrb[105].mxu1  ;;  %v4739_v23 = vpop.f32.mrb[109].mxu0  ;;  %v4456_v9 = vrot.slane %v9722_v11, %v8673_v35  ;;  %v8115_v35 = vld [vmem:[%s10105_s8 + $0x550] sm:$0xff]  }
0x1d93   :  { %v4697_v22 = vadd.f32 %v4696_v21, %v4424_v7  ;;  %v4740_v27 = vadd.f32 %v4739_v23, %v4432_v8  ;;  %v4698_v28 = vpop.f32.mrb[106].mxu1  ;;  %v4741_v29 = vpop.f32.mrb[110].mxu0 }
0x1d94   :  { %v4699_v36 = vadd.f32 %v4698_v28, %v4420_v4  ;;  %v4742_v39 = vadd.f32 %v4741_v29, %v4428_v45  ;;  %v4700_v25 = vpop.f32.mrb[107].mxu1  ;;  %v4743_v34 = vpop.f32.mrb[111].mxu0  ;;  %v5004_v48 = vmax.f32 %v4695_v16, 0.0  ;;  %v5006_v51 = vmax.f32 %v4738_v19, 0.0  ;;  %v8113_v16 = vld [vmem:[%s10105_s8 + $0x508] sm:$0xff]   ;;  %v8116_v28 = vld [vmem:[%s10105_s8 + $0x5d0] sm:$0xff]  }
0x1d95   :  { %v4701_v43 = vadd.f32 %v4700_v25, %v4424_v7  ;;  %v4744_v44 = vadd.f32 %v4743_v34, %v4432_v8  ;;  %v5005_v50 = vmax.f32 %v4697_v22, 0.0  ;;  %v5007_v26 = vmax.f32 %v4740_v27, 0.0 }
0x1d96   :  { %v5020_v52 = vmax.f32 %v4699_v36, 0.0  ;;  %v5022_v54 = vmax.f32 %v4742_v39, 0.0  ;;  %v4464_v19 = vrot.slane %v9722_v11, %v8880_v5 }
0x1d97   :  { %v5021_v31 = vmax.f32 %v4701_v43, 0.0  ;;  %v5023_v57 = vmax.f32 %v4744_v44, 0.0 }
0x1d98   :  { %v5036_v49 = vpack.c.bf16 %v5020_v52, %v5004_v48  ;;  %v5038_v56 = vpack.c.bf16 %v5022_v54, %v5006_v51  ;;  %v8118_v48 = vld [vmem:[%s10105_s8 + $0x590] sm:$0xff]  }
0x1d99   :  { %v5037_v58 = vpack.c.bf16 %v5021_v31, %v5005_v50  ;;  %v5039_v60 = vpack.c.bf16 %v5023_v57, %v5007_v26  ;;  %v4780_v53 = vpop.f32.mrb[108].mxu1  ;;  %v4823_v30 = vpop.f32.mrb[112].mxu0  ;;  %v8119_v26 = vld [vmem:[%s10105_s8 + $0x558] sm:$0xff]  }
0x1d9a   :  { %v4781_v59 = vadd.f32 %v4780_v53, %v4436_v42  ;;  %v4824_v41 = vadd.f32 %v4823_v30, %v4444_v37  ;;  %v4782_v55 = vpop.f32.mrb[109].mxu1  ;;  %v4825_v62 = vpop.f32.mrb[113].mxu0  ;;  %v8120_v31 = vld [vmem:[%s10105_s8 + $0x5d8] sm:$0xff]  }
0x1d9b   :  { %v4783_v20 = vadd.f32 %v4782_v55, %v4440_v46  ;;  %v4826_v24 = vadd.f32 %v4825_v62, %v4448_v10  ;;  %v4784_v47 = vpop.f32.mrb[110].mxu1  ;;  %v4827_v3 = vpop.f32.mrb[114].mxu0  ;;  %6113 = vmatprep.mubr.bf16.mxu1 %v5037_v58  ;;  %6154 = vmatprep.mubr.bf16.mxu0 %v5039_v60  ;;  %v4468_v60 = vrot.slane %v9722_v11, %v8887_v13 }
0x1d9c   :  { %v4785_v4 = vadd.f32 %v4784_v47, %v4436_v42  ;;  %v4828_v45 = vadd.f32 %v4827_v3, %v4444_v37  ;;  %v4786_v7 = vpop.f32.mrb[111].mxu1  ;;  %v4829_v8 = vpop.f32.mrb[115].mxu0  ;;  %6114 = vmatmul.mubr.bf16.vlgmr.msra.gmra.mrb[120].mxu1 %v5036_v49  ;;  %6155 = vmatmul.mubr.bf16.vlgmr.msra.gmra.mrb[124].mxu0 %v5038_v56  ;;  %v5008_v21 = vmax.f32 %v4781_v59, 0.0  ;;  %v5010_v23 = vmax.f32 %v4824_v41, 0.0  ;;  %v8123_v3 = vld [vmem:[%s10105_s8 + $0x560] sm:$0xff]  }
0x1d9d   :  { %v4787_v15 = vadd.f32 %v4786_v7, %v4440_v46  ;;  %v4830_v40 = vadd.f32 %v4829_v8, %v4448_v10  ;;  %7548 = vmatpush3.bf16.msra.mxu1 %v8109_v32  ;;  %7570 = vmatpush3.bf16.msra.mxu0 %v8110_v61  ;;  %v5009_v29 = vmax.f32 %v4783_v20, 0.0  ;;  %v5011_v36 = vmax.f32 %v4826_v24, 0.0  ;;  %v8117_v10 = vld [vmem:[%s10105_s8 + $0x510] sm:$0xff]  }
0x1d9e   :  { %v5024_v22 = vmax.f32 %v4785_v4, 0.0  ;;  %v5026_v27 = vmax.f32 %v4828_v45, 0.0  ;;  %7549 = vmatprep.subr.bf16.mxu1 %v8111_v63  ;;  %7571 = vmatprep.subr.bf16.mxu0 %v8112_v0  ;;  %v4476_v59 = vrot.slane %v9722_v11, %v8890_v14  ;;  %v4472_v41 = vrot.slane %v9722_v11, %v8893_v17  ;;  %v8121_v63 = vld [vmem:[%s10105_s8 + $0x518] sm:$0xff]  }
0x1d9f   :  { %v5025_v39 = vmax.f32 %v4787_v15, 0.0  ;;  %v5027_v25 = vmax.f32 %v4830_v40, 0.0  ;;  %v8122_v0 = vld [vmem:[%s10105_s8 + $0x598] sm:$0xff]  }
0x1da0   :  { %v9756_v34 = vpack.c.bf16 %v5024_v22, %v5008_v21  ;;  %v9758_v42 = vpack.c.bf16 %v5026_v27, %v5010_v23 }
0x1da1   :  { %v5041_v37 = vpack.c.bf16 %v5025_v39, %v5009_v29  ;;  %v5043_v43 = vpack.c.bf16 %v5027_v25, %v5011_v36  ;;  %7550 = vmatpush3.bf16.msra.mxu1 %v8113_v16  ;;  %7572 = vmatpush3.bf16.msra.mxu0 %v8114_v38  ;;  %v4866_v44 = vpop.f32.mrb[112].mxu1  ;;  %v4909_v46 = vpop.f32.mrb[116].mxu0  ;;  %v8125_v38 = vld [vmem:[%s10105_s8 + $0x520] sm:$0xff]  }
0x1da2   :  { %v4867_v51 = vadd.f32 %v4866_v44, %v4452_v2  ;;  %v4910_v52 = vadd.f32 %v4909_v46, %v4460_v6  ;;  %v4868_v54 = vpop.f32.mrb[113].mxu1  ;;  %v4911_v50 = vpop.f32.mrb[117].mxu0  ;;  %7551 = vmatprep.subr.bf16.mxu1 %v8115_v35  ;;  %7573 = vmatprep.subr.bf16.mxu0 %v8116_v28  ;;  %v8127_v35 = vld [vmem:[%s10105_s8 + $0x568] sm:$0xff]  }
0x1da3   :  { %v4869_v57 = vadd.f32 %v4868_v54, %v4456_v9  ;;  %v4912_v49 = vadd.f32 %v4911_v50, %v4464_v19  ;;  %v4870_v56 = vpop.f32.mrb[114].mxu1  ;;  %v4913_v58 = vpop.f32.mrb[118].mxu0  ;;  %6195 = vmatprep.mubr.bf16.mxu1 %v5041_v37  ;;  %6236 = vmatprep.mubr.bf16.mxu0 %v5043_v43  ;;  %v8128_v28 = vld [vmem:[%s10105_s8 + $0x5e8] sm:$0xff]  }
0x1da4   :  { %v4871_v53 = vadd.f32 %v4870_v56, %v4452_v2  ;;  %v4914_v30 = vadd.f32 %v4913_v58, %v4460_v6  ;;  %v4872_v32 = vpop.f32.mrb[115].mxu1  ;;  %v4915_v61 = vpop.f32.mrb[119].mxu0  ;;  %v4480_v2 = vrot.slane %v9722_v11, %v8896_v18  ;;  %v5012_v20 = vmax.f32 %v4867_v51, 0.0  ;;  %v8124_v6 = vld [vmem:[%s10105_s8 + $0x5e0] sm:$0xff]   ;;  %v8129_v51 = vld [vmem:[%s10105_s8 + $0x528] sm:$0xff]  }
0x1da5   :  { %v4873_v55 = vadd.f32 %v4872_v32, %v4456_v9  ;;  %v4916_v62 = vadd.f32 %v4915_v61, %v4464_v19  ;;  %7552 = vmatpush3.bf16.msra.mxu1 %v8117_v10  ;;  %7574 = vmatpush3.bf16.msra.mxu0 %v8118_v48  ;;  %v5014_v14 = vmax.f32 %v4910_v52, 0.0  ;;  %v5013_v4 = vmax.f32 %v4869_v57, 0.0  ;;  %v8126_v19 = vld [vmem:[%s10105_s8 + $0x5a0] sm:$0xff]   ;;  %v8130_v52 = vld [vmem:[%s10105_s8 + $0x5a8] sm:$0xff]   ;;  %v8131_v57 = vld [vmem:[%s10105_s8 + $0x570] sm:$0xff]  }
0x1da6   :  { %v5028_v24 = vmax.f32 %v4871_v53, 0.0  ;;  %v5030_v47 = vmax.f32 %v4914_v30, 0.0  ;;  %7553 = vmatprep.subr.bf16.mxu1 %v8119_v26  ;;  %7575 = vmatprep.subr.bf16.mxu0 %v8120_v31  ;;  %v5015_v45 = vmax.f32 %v4912_v49, 0.0  ;;  %v8132_v49 = vld [vmem:[%s10105_s8 + $0x5f0] sm:$0xff]  }
0x1da7   :  { %v5029_v7 = vmax.f32 %v4873_v55, 0.0  ;;  %v5031_v8 = vmax.f32 %v4916_v62, 0.0  ;;  %v8134_v55 = vld [vmem:[%s10105_s8 + $0x5b0] sm:$0xff]   ;;  %v8135_v62 = vld [vmem:[%s10105_s8 + $0x578] sm:$0xff]  }
0x1da8   :  { %v9792_v9 = vpack.c.bf16 %v5028_v24, %v5012_v20  ;;  %v9794_v18 = vpack.c.bf16 %v5030_v47, %v5014_v14  ;;  %v8139_v20 = vld [vmem:[%s10105_s8 + $0x640] sm:$0xff]  }
0x1da9   :  { %v9796_v11 = vpack.c.bf16 %v5029_v7, %v5013_v4  ;;  %v9798_v15 = vpack.c.bf16 %v5031_v8, %v5015_v45  ;;  %7554 = vmatpush3.bf16.msra.mxu1 %v8121_v63  ;;  %7576 = vmatpush3.bf16.msra.mxu0 %v8122_v0  ;;  %v4952_v40 = vpop.f32.mrb[116].mxu1  ;;  %v4995_v16 = vpop.f32.mrb[120].mxu0  ;;  %v8136_v63 = vld [vmem:[%s10105_s8 + $0x5f8] sm:$0xff]   ;;  %v8140_v14 = vld [vmem:[%s10105_s8 + $0x6c0] sm:$0xff]   ;;  %v8145_v4 = vld [vmem:[%s10105_s8 + $0x608] sm:$0xff]  }
0x1daa   :  { %v4953_v21 = vadd.f32 %v4952_v40, %v4468_v60  ;;  %v4996_v23 = vadd.f32 %v4995_v16, %v4476_v59  ;;  %v4954_v22 = vpop.f32.mrb[117].mxu1  ;;  %v4997_v27 = vpop.f32.mrb[121].mxu0  ;;  %7555 = vmatprep.subr.bf16.mxu1 %v8123_v3  ;;  %7577 = vmatprep.subr.bf16.mxu0 %v8124_v6  ;;  %v8137_v0 = vld [vmem:[%s10105_s8 + $0x538] sm:$0xff]   ;;  %v8141_v24 = vld [vmem:[%s10105_s8 + $0x600] sm:$0xff]   ;;  %v8143_v3 = vld [vmem:[%s10105_s8 + $0x648] sm:$0xff]  }
0x1dab   :  { %v4955_v29 = vadd.f32 %v4954_v22, %v4472_v41  ;;  %v4998_v36 = vadd.f32 %v4997_v27, %v4480_v2  ;;  %v4956_v39 = vpop.f32.mrb[118].mxu1  ;;  %v4999_v25 = vpop.f32.mrb[122].mxu0  ;;  %v8142_v47 = vld [vmem:[%s10105_s8 + $0x680] sm:$0xff]   ;;  %v8144_v6 = vld [vmem:[%s10105_s8 + $0x6c8] sm:$0xff]   ;;  %v8149_v7 = vld [vmem:[%s10105_s8 + $0x610] sm:$0xff]  }
0x1dac   :  { %v4957_v37 = vadd.f32 %v4956_v39, %v4468_v60  ;;  %v5000_v43 = vadd.f32 %v4999_v25, %v4476_v59  ;;  %v4958_v44 = vpop.f32.mrb[119].mxu1  ;;  %v5001_v46 = vpop.f32.mrb[123].mxu0  ;;  %v5016_v54 = vmax.f32 %v4953_v21, 0.0  ;;  %v5018_v50 = vmax.f32 %v4996_v23, 0.0  ;;  %v8146_v45 = vld [vmem:[%s10105_s8 + $0x688] sm:$0xff]   ;;  %v8150_v8 = vld [vmem:[%s10105_s8 + $0x690] sm:$0xff]  }
0x1dad   :  { %v4959_v10 = vadd.f32 %v4958_v44, %v4472_v41  ;;  %v5002_v48 = vadd.f32 %v5001_v46, %v4480_v2  ;;  %7556 = vmatpush3.bf16.msra.mxu1 %v8125_v38  ;;  %7578 = vmatpush3.bf16.msra.mxu0 %v8126_v19  ;;  %v5017_v56 = vmax.f32 %v4955_v29, 0.0  ;;  %v5019_v58 = vmax.f32 %v4998_v36, 0.0  ;;  %v8133_v41 = vld [vmem:[%s10105_s8 + $0x530] sm:$0xff]   ;;  %v8138_v2 = vld [vmem:[%s10105_s8 + $0x5b8] sm:$0xff]   ;;  %v8155_v38 = vld [vmem:[%s10105_s8 + $0x660] sm:$0xff]  }
0x1dae   :  { %v5032_v26 = vmax.f32 %v4957_v37, 0.0  ;;  %v5034_v31 = vmax.f32 %v5000_v43, 0.0  ;;  %7557 = vmatprep.subr.bf16.mxu1 %v8127_v35  ;;  %7579 = vmatprep.subr.bf16.mxu0 %v8128_v28  ;;  %v8153_v40 = vld [vmem:[%s10105_s8 + $0x618] sm:$0xff]   ;;  %v8156_v19 = vld [vmem:[%s10105_s8 + $0x6e0] sm:$0xff]   ;;  %v8159_v22 = vld [vmem:[%s10105_s8 + $0x668] sm:$0xff]  }
0x1daf   :  { %v5033_v60 = vmax.f32 %v4959_v10, 0.0  ;;  %v5035_v53 = vmax.f32 %v5002_v48, 0.0  ;;  %v8154_v16 = vld [vmem:[%s10105_s8 + $0x698] sm:$0xff]   ;;  %v8157_v21 = vld [vmem:[%s10105_s8 + $0x620] sm:$0xff]   ;;  %v8160_v27 = vld [vmem:[%s10105_s8 + $0x6e8] sm:$0xff]  }
0x1db0   :  { %v9824_v30 = vpack.c.bf16 %v5032_v26, %v5016_v54  ;;  %v9826_v32 = vpack.c.bf16 %v5034_v31, %v5018_v50  ;;  %v8158_v23 = vld [vmem:[%s10105_s8 + $0x6a0] sm:$0xff]   ;;  %v8161_v35 = vld [vmem:[%s10105_s8 + $0x628] sm:$0xff]   ;;  %v8163_v29 = vld [vmem:[%s10105_s8 + $0x670] sm:$0xff]  }
0x1db1   :  { %v9828_v61 = vpack.c.bf16 %v5033_v60, %v5017_v56  ;;  %v9830_v59 = vpack.c.bf16 %v5035_v53, %v5019_v58  ;;  %7558 = vmatpush3.bf16.msra.mxu1 %v8129_v51  ;;  %7580 = vmatpush3.bf16.msra.mxu0 %v8130_v52  ;;  %v8162_v28 = vld [vmem:[%s10105_s8 + $0x6a8] sm:$0xff]   ;;  %v8164_v36 = vld [vmem:[%s10105_s8 + $0x6f0] sm:$0xff]   ;;  %v8167_v37 = vld [vmem:[%s10105_s8 + $0x678] sm:$0xff]  }
0x1db2   :  { %7559 = vmatprep.subr.bf16.mxu1 %v8131_v57  ;;  %7581 = vmatprep.subr.bf16.mxu0 %v8132_v49  ;;  %v8165_v39 = vld [vmem:[%s10105_s8 + $0x630] sm:$0xff]   ;;  %v8168_v43 = vld [vmem:[%s10105_s8 + $0x6f8] sm:$0xff]   ;;  %v8171_v10 = vld [vmem:[%s10105_s8 + $0x740] sm:$0xff]  }
0x1db3   :  { %v8166_v25 = vld [vmem:[%s10105_s8 + $0x6b0] sm:$0xff]   ;;  %v8169_v44 = vld [vmem:[%s10105_s8 + $0x638] sm:$0xff]   ;;  %v8172_v48 = vld [vmem:[%s10105_s8 + $0x7c0] sm:$0xff]  }
0x1db4   :  { %v8170_v46 = vld [vmem:[%s10105_s8 + $0x6b8] sm:$0xff]   ;;  %v8173_v51 = vld [vmem:[%s10105_s8 + $0x700] sm:$0xff]   ;;  %v8175_v54 = vld [vmem:[%s10105_s8 + $0x748] sm:$0xff]  }
0x1db5   :  { %7560 = vmatpush3.bf16.msra.mxu1 %v8133_v41  ;;  %7582 = vmatpush3.bf16.msra.mxu0 %v8134_v55  ;;  %v8174_v52 = vld [vmem:[%s10105_s8 + $0x780] sm:$0xff]   ;;  %v8176_v50 = vld [vmem:[%s10105_s8 + $0x7c8] sm:$0xff]   ;;  %v8181_v57 = vld [vmem:[%s10105_s8 + $0x710] sm:$0xff]  }
0x1db6   :  { %7561 = vmatprep.subr.bf16.mxu1 %v8135_v62  ;;  %7583 = vmatprep.subr.bf16.mxu0 %v8136_v63  ;;  %v8177_v26 = vld [vmem:[%s10105_s8 + $0x708] sm:$0xff]   ;;  %v8182_v49 = vld [vmem:[%s10105_s8 + $0x790] sm:$0xff]   ;;  %v8183_v56 = vld [vmem:[%s10105_s8 + $0x758] sm:$0xff]  }
0x1db7   :  { %v8178_v31 = vld [vmem:[%s10105_s8 + $0x788] sm:$0xff]   ;;  %v8184_v58 = vld [vmem:[%s10105_s8 + $0x7d8] sm:$0xff]   ;;  %v8189_v41 = vld [vmem:[%s10105_s8 + $0x720] sm:$0xff]  }
0x1db8   :  { %v8185_v60 = vld [vmem:[%s10105_s8 + $0x718] sm:$0xff]   ;;  %v8190_v55 = vld [vmem:[%s10105_s8 + $0x7a0] sm:$0xff]   ;;  %v8191_v62 = vld [vmem:[%s10105_s8 + $0x768] sm:$0xff]  }
0x1db9   :  { %7562 = vmatpush3.bf16.msra.mxu1 %v8137_v0  ;;  %7584 = vmatpush3.bf16.msra.mxu0 %v8138_v2  ;;  %v8186_v53 = vld [vmem:[%s10105_s8 + $0x798] sm:$0xff]   ;;  %v8192_v63 = vld [vmem:[%s10105_s8 + $0x7e8] sm:$0xff]  }
0x1dba   :  { %7591 = vmatprep.subr.bf16.mxu1 %v8139_v20  ;;  %7613 = vmatprep.subr.bf16.mxu0 %v8140_v14  ;;  %v8193_v0 = vld [vmem:[%s10105_s8 + $0x728] sm:$0xff]   ;;  %v8195_v20 = vld [vmem:[%s10105_s8 + $0x770] sm:$0xff]  }
0x1dbb   :  { %v8194_v2 = vld [vmem:[%s10105_s8 + $0x7a8] sm:$0xff]   ;;  %v8196_v14 = vld [vmem:[%s10105_s8 + $0x7f0] sm:$0xff]  }
0x1dbc   :  { %6196 = vmatmul.mubr.bf16.vlgmr.msra.gmra.mrb[124].mxu1 %v9756_v34  ;;  %6237 = vmatmul.mubr.bf16.vlgmr.msra.gmra.mrb[128].mxu0 %v9758_v42  ;;  %v8147_v34 = vld [vmem:[%s10105_s8 + $0x650] sm:$0xff]  }
0x1dbd   :  { %7592 = vmatpush3.bf16.msra.mxu1 %v8141_v24  ;;  %6277 = vmatprep.mubr.bf16.mxu1 %v9796_v11  ;;  %v8148_v42 = vld [vmem:[%s10105_s8 + $0x6d0] sm:$0xff]   ;;  %v8151_v11 = vld [vmem:[%s10105_s8 + $0x658] sm:$0xff]  }
0x1dbe   :  { %7614 = vmatpush3.bf16.msra.mxu0 %v8142_v47  ;;  %6318 = vmatprep.mubr.bf16.mxu0 %v9798_v15  ;;  %v8152_v15 = vld [vmem:[%s10105_s8 + $0x6d8] sm:$0xff]   ;;  %v8197_v24 = vld [vmem:[%s10105_s8 + $0x730] sm:$0xff]  }
0x1dbf   :  { %7593 = vmatprep.subr.bf16.mxu1 %v8143_v3  ;;  %7615 = vmatprep.subr.bf16.mxu0 %v8144_v6  ;;  %v8198_v47 = vld [vmem:[%s10105_s8 + $0x7b0] sm:$0xff]   ;;  %v8199_v3 = vld [vmem:[%s10105_s8 + $0x778] sm:$0xff]  }
0x1dc0   :  { %v8200_v6 = vld [vmem:[%s10105_s8 + $0x7f8] sm:$0xff]  }
0x1dc1   :  { %7594 = vmatpush3.bf16.msra.mxu1 %v8145_v4  ;;  %v8201_v4 = vld [vmem:[%s10105_s8 + $0x738] sm:$0xff]  }
0x1dc2   :  { %7616 = vmatpush3.bf16.msra.mxu0 %v8146_v45  ;;  %7595 = vmatprep.subr.bf16.mxu1 %v8147_v34  ;;  %v8202_v45 = vld [vmem:[%s10105_s8 + $0x7b8] sm:$0xff]  }
0x1dc3   :  { %7617 = vmatprep.subr.bf16.mxu0 %v8148_v42 }
0x1dc5   :  { %7596 = vmatpush3.bf16.msra.mxu1 %v8149_v7  ;;  %v10058_v7 = vld [vmem:[%s10106_s9 + $0x8] sm:$0x3f] }
0x1dc6   :  { %7618 = vmatpush3.bf16.msra.mxu0 %v8150_v8  ;;  %7597 = vmatprep.subr.bf16.mxu1 %v8151_v11  ;;  %v5312_v8 = vrot.slane %v10058_v7, %v8880_v5 }
0x1dc7   :  { %7619 = vmatprep.subr.bf16.mxu0 %v8152_v15 }
0x1dc9   :  { %7598 = vmatpush3.bf16.msra.mxu1 %v8153_v40 }
0x1dca   :  { %7620 = vmatpush3.bf16.msra.mxu0 %v8154_v16  ;;  %7599 = vmatprep.subr.bf16.mxu1 %v8155_v38 }
0x1dcb   :  { %7621 = vmatprep.subr.bf16.mxu0 %v8156_v19 }
0x1dcd   :  { %7600 = vmatpush3.bf16.msra.mxu1 %v8157_v21 }
0x1dce   :  { %7622 = vmatpush3.bf16.msra.mxu0 %v8158_v23  ;;  %7601 = vmatprep.subr.bf16.mxu1 %v8159_v22 }
0x1dcf   :  { %7623 = vmatprep.subr.bf16.mxu0 %v8160_v27 }
0x1dd1   :  { %7602 = vmatpush3.bf16.msra.mxu1 %v8161_v35 }
0x1dd2   :  { %7624 = vmatpush3.bf16.msra.mxu0 %v8162_v28  ;;  %7603 = vmatprep.subr.bf16.mxu1 %v8163_v29 }
0x1dd3   :  { %7625 = vmatprep.subr.bf16.mxu0 %v8164_v36 }
0x1dd5   :  { %7604 = vmatpush3.bf16.msra.mxu1 %v8165_v39 }
0x1dd6   :  { %7626 = vmatpush3.bf16.msra.mxu0 %v8166_v25  ;;  %7605 = vmatprep.subr.bf16.mxu1 %v8167_v37 }
0x1dd7   :  { %7627 = vmatprep.subr.bf16.mxu0 %v8168_v43 }
0x1dd9   :  { %7606 = vmatpush3.bf16.msra.mxu1 %v8169_v44 }
0x1dda   :  { %7628 = vmatpush3.bf16.msra.mxu0 %v8170_v46  ;;  %7635 = vmatprep.subr.bf16.mxu1 %v8171_v10 }
0x1ddb   :  { %7657 = vmatprep.subr.bf16.mxu0 %v8172_v48 }
0x1ddc   :  { %6278 = vmatmul.mubr.bf16.vlgmr.msra.gmra.mrb[128].mxu1 %v9792_v9  ;;  %v8179_v9 = vld [vmem:[%s10105_s8 + $0x750] sm:$0xff]  }
0x1ddd   :  { %6319 = vmatmul.mubr.bf16.vlgmr.msra.gmra.mrb[132].mxu0 %v9794_v18  ;;  %7636 = vmatpush3.bf16.msra.mxu1 %v8173_v51  ;;  %v8180_v18 = vld [vmem:[%s10105_s8 + $0x7d0] sm:$0xff]  }
0x1dde   :  { %6359 = vmatprep.mubr.bf16.mxu1 %v9828_v61  ;;  %7658 = vmatpush3.bf16.msra.mxu0 %v8174_v52  ;;  %v8187_v61 = vld [vmem:[%s10105_s8 + $0x760] sm:$0xff]  }
0x1ddf   :  { %6400 = vmatprep.mubr.bf16.mxu0 %v9830_v59  ;;  %7637 = vmatprep.subr.bf16.mxu1 %v8175_v54  ;;  %v8188_v59 = vld [vmem:[%s10105_s8 + $0x7e0] sm:$0xff]  }
0x1de0   :  { %7659 = vmatprep.subr.bf16.mxu0 %v8176_v50 }
0x1de1   :  { %7638 = vmatpush3.bf16.msra.mxu1 %v8177_v26 }
0x1de2   :  { %7660 = vmatpush3.bf16.msra.mxu0 %v8178_v31  ;;  %7639 = vmatprep.subr.bf16.mxu1 %v8179_v9 }
0x1de3   :  { %7661 = vmatprep.subr.bf16.mxu0 %v8180_v18 }
0x1de5   :  { %7640 = vmatpush3.bf16.msra.mxu1 %v8181_v57 }
0x1de6   :  { %7662 = vmatpush3.bf16.msra.mxu0 %v8182_v49  ;;  %7641 = vmatprep.subr.bf16.mxu1 %v8183_v56 }
0x1de7   :  { %7663 = vmatprep.subr.bf16.mxu0 %v8184_v58 }
0x1de9   :  { %7642 = vmatpush3.bf16.msra.mxu1 %v8185_v60 }
0x1dea   :  { %7664 = vmatpush3.bf16.msra.mxu0 %v8186_v53  ;;  %7643 = vmatprep.subr.bf16.mxu1 %v8187_v61 }
0x1deb   :  { %7665 = vmatprep.subr.bf16.mxu0 %v8188_v59 }
0x1ded   :  { %7644 = vmatpush3.bf16.msra.mxu1 %v8189_v41 }
0x1dee   :  { %7666 = vmatpush3.bf16.msra.mxu0 %v8190_v55  ;;  %7645 = vmatprep.subr.bf16.mxu1 %v8191_v62 }
0x1def   :  { %7667 = vmatprep.subr.bf16.mxu0 %v8192_v63 }
0x1df1   :  { %7646 = vmatpush3.bf16.msra.mxu1 %v8193_v0 }
0x1df2   :  { %7668 = vmatpush3.bf16.msra.mxu0 %v8194_v2  ;;  %7647 = vmatprep.subr.bf16.mxu1 %v8195_v20 }
0x1df3   :  { %7669 = vmatprep.subr.bf16.mxu0 %v8196_v14 }
0x1df5   :  { %7648 = vmatpush3.bf16.msra.mxu1 %v8197_v24 }
0x1df6   :  { %7670 = vmatpush3.bf16.msra.mxu0 %v8198_v47  ;;  %7649 = vmatprep.subr.bf16.mxu1 %v8199_v3 }
0x1df7   :  { %7671 = vmatprep.subr.bf16.mxu0 %v8200_v6 }
0x1df9   :  { %7650 = vmatpush3.bf16.msra.mxu1 %v8201_v4 }
0x1dfa   :  { %7672 = vmatpush3.bf16.msra.mxu0 %v8202_v45  ;;  %7912 = vmatprep.subr.bf16.mxu1 %v8311_v1 }
0x1dfc   :  { %6360 = vmatmul.mubr.bf16.vlgmr.msra.gmra.mrb[132].mxu1 %v9824_v30 }
0x1dfd   :  { %6401 = vmatmul.mubr.bf16.vlgmr.msra.gmra.mrb[136].mxu0 %v9826_v32  ;;  %7916 = vmatprep.mubr.msk.bf16.mxu1 %vm8312_vm1, %v8311_v1 }
0x1e6f   :  { %v7519_v34 = vpop.f32.mrb[120].mxu1  ;;  %v7541_v42 = vpop.f32.mrb[124].mxu0 }
0x1e70   :  { %v7520_v11 = vpop.f32.mrb[121].mxu1  ;;  %v7542_v15 = vpop.f32.mrb[125].mxu0 }
0x1e71   :  { %v7521_v40 = vadd.f32 %v7520_v11, %v7519_v34  ;;  %v7543_v16 = vadd.f32 %v7542_v15, %v7541_v42  ;;  %v7522_v30 = vpop.f32.mrb[122].mxu1  ;;  %v7544_v38 = vpop.f32.mrb[126].mxu0 }
0x1e72   :  { %v7523_v32 = vpop.f32.mrb[123].mxu1  ;;  %v7545_v19 = vpop.f32.mrb[127].mxu0 }
0x1e73   :  { %v6116_v21 = vadd.f32 %v7521_v40, %v5312_v8  ;;  %v7524_v23 = vadd.f32 %v7523_v32, %v7522_v30  ;;  %v7546_v22 = vadd.f32 %v7545_v19, %v7544_v38 }
0x1e75   :  { %v6157_v27 = vadd.f32 %v7543_v16, %v6116_v21  ;;  %v6119_v35 = vadd.f32 %v7524_v23, %v5312_v8 }
0x1e77   :  { %v6160_v28 = vadd.f32 %v7546_v22, %v6119_v35 }
0x1e8f   :  { %v7563_v29 = vpop.f32.mrb[124].mxu1  ;;  %v7585_v36 = vpop.f32.mrb[128].mxu0 }
0x1e90   :  { %v7564_v39 = vpop.f32.mrb[125].mxu1  ;;  %v7586_v25 = vpop.f32.mrb[129].mxu0 }
0x1e91   :  { %v7565_v37 = vadd.f32 %v7564_v39, %v7563_v29  ;;  %v7587_v5 = vadd.f32 %v7586_v25, %v7585_v36  ;;  %v7566_v43 = vpop.f32.mrb[126].mxu1  ;;  %v7588_v44 = vpop.f32.mrb[130].mxu0 }
0x1e92   :  { %v7567_v46 = vpop.f32.mrb[127].mxu1  ;;  %v7589_v10 = vpop.f32.mrb[131].mxu0 }
0x1e93   :  { %v6198_v48 = vadd.f32 %v7565_v37, %v6157_v27  ;;  %v7568_v51 = vadd.f32 %v7567_v46, %v7566_v43  ;;  %v7590_v52 = vadd.f32 %v7589_v10, %v7588_v44 }
0x1e95   :  { %v6239_v54 = vadd.f32 %v7587_v5, %v6198_v48  ;;  %v6201_v50 = vadd.f32 %v7568_v51, %v6160_v28 }
0x1e97   :  { %v6242_v26 = vadd.f32 %v7590_v52, %v6201_v50  ;;  %v6446_v50 = vrot.slane %v10058_v7, %v8887_v13 }
0x1eaf   :  { %v7607_v31 = vpop.f32.mrb[128].mxu1 }
0x1eb0   :  { %v7629_v9 = vpop.f32.mrb[132].mxu0  ;;  %v7608_v18 = vpop.f32.mrb[129].mxu1 }
0x1eb1   :  { %v7609_v57 = vadd.f32 %v7608_v18, %v7607_v31  ;;  %v7630_v49 = vpop.f32.mrb[133].mxu0  ;;  %v7610_v56 = vpop.f32.mrb[130].mxu1 }
0x1eb2   :  { %v7631_v58 = vadd.f32 %v7630_v49, %v7629_v9  ;;  %v7632_v60 = vpop.f32.mrb[134].mxu0  ;;  %v7611_v53 = vpop.f32.mrb[131].mxu1  ;;  %v6452_v9 = vrot.slane %v10058_v7, %v8893_v17 }
0x1eb3   :  { %v6280_v61 = vadd.f32 %v7609_v57, %v6239_v54  ;;  %v7612_v59 = vadd.f32 %v7611_v53, %v7610_v56  ;;  %v7633_v41 = vpop.f32.mrb[135].mxu0 }
0x1eb4   :  { %v7634_v55 = vadd.f32 %v7633_v41, %v7632_v60 }
0x1eb5   :  { %v6321_v62 = vadd.f32 %v7631_v58, %v6280_v61  ;;  %v6283_v63 = vadd.f32 %v7612_v59, %v6242_v26 }
0x1eb7   :  { %v6324_v0 = vadd.f32 %v7634_v55, %v6283_v63 }
0x1ecf   :  { %v7651_v2 = vpop.f32.mrb[132].mxu1 }
0x1ed0   :  { %v7673_v20 = vpop.f32.mrb[136].mxu0  ;;  %v7652_v14 = vpop.f32.mrb[133].mxu1 }
0x1ed1   :  { %v7653_v24 = vadd.f32 %v7652_v14, %v7651_v2  ;;  %v7674_v47 = vpop.f32.mrb[137].mxu0  ;;  %v7654_v3 = vpop.f32.mrb[134].mxu1 }
0x1ed2   :  { %v7675_v6 = vadd.f32 %v7674_v47, %v7673_v20  ;;  %v7676_v4 = vpop.f32.mrb[138].mxu0  ;;  %v7655_v45 = vpop.f32.mrb[135].mxu1 }
0x1ed3   :  { %v6362_v34 = vadd.f32 %v7653_v24, %v6321_v62  ;;  %v7656_v42 = vadd.f32 %v7655_v45, %v7654_v3  ;;  %v7677_v8 = vpop.f32.mrb[139].mxu0 }
0x1ed4   :  { %v7678_v11 = vadd.f32 %v7677_v8, %v7676_v4 }
0x1ed5   :  { %v6403_v15 = vadd.f32 %v7675_v6, %v6362_v34  ;;  %v6365_v40 = vadd.f32 %v7656_v42, %v6324_v0  ;;  %v7245_v42 = vld [vmem:[%s10108_s11] ss:$0 sm:$0xff] }
0x1ed7   :  { %v6409_v16 = vadd.f32 %v6403_v15, %v9528_v33  ;;  %v6406_v30 = vadd.f32 %v7678_v11, %v6365_v40  ;;  %v8203_v33 = vld [vmem:[%s10107_s10] sm:$0xff]  }
0x1ed8   :  { %7913 = vmatpush3.bf16.msra.mxu1 %v8203_v33 }
0x1ed9   :  { %v6410_v38 = vadd.f32 %v6406_v30, %v9530_v12  ;;  %v6411_v32 = vsel %vm131_vm2, %v6409_v16, 0.0  ;;  %v6417_v19 = vmul.f32 %v6409_v16, %v6409_v16  ;;  %v8204_v12 = vld [vmem:[%s10107_s10 + $0x8] sm:$0xff]   ;;  %7914 = vmatprep.subr.bf16.mxu1 %v8311_v1 }
0x1eda   :  { %6412 = vadd.xlane.f32.xlu1 %v6411_v32 }
0x1edb   :  { %v6414_v21 = vsel %vm131_vm2, %v6410_v38, 0.0  ;;  %v6418_v23 = vmul.f32 %v6410_v38, %v6410_v38  ;;  %v6419_v22 = vsel %vm131_vm2, %v6417_v19, 0.0 }
0x1edc   :  { %6415 = vadd.xlane.f32.xlu0 %v6414_v21  ;;  %7915 = vmatpush3.bf16.msra.mxu1 %v8204_v12 }
0x1edd   :  { %v6422_v27 = vsel %vm131_vm2, %v6418_v23, 0.0 }
0x1ede   :  { %6420 = vadd.xlane.f32.xlu1 %v6419_v22 }
0x1ee0   :  { %6423 = vadd.xlane.f32.xlu0 %v6422_v27 }
0x1f67   :  { %v6413_v35 = vpop.xlane.xlu1 %6412 }
0x1f68   :  { %v6425_v28 = vmul.f32 0.03125, %v6413_v35 }
0x1f69   :  { %v6416_v29 = vpop.xlane.xlu0 %6415 }
0x1f6a   :  { %v6426_v36 = vmul.f32 0.03125, %v6416_v29  ;;  %v6429_v25 = vmul.f32 %v6425_v28, %v6425_v28  ;;  %v6435_v1 = vsub.f32 %v6409_v16, %v6425_v28 }
0x1f6b   :  { %v6421_v39 = vpop.xlane.xlu1 %6420 }
0x1f6c   :  { %v6427_v37 = vmul.f32 0.03125, %v6421_v39  ;;  %v6430_v43 = vmul.f32 %v6426_v36, %v6426_v36  ;;  %v6436_v31 = vsub.f32 %v6410_v38, %v6426_v36 }
0x1f6d   :  { %v6424_v5 = vpop.xlane.xlu0 %6423 }
0x1f6e   :  { %v6431_v44 = vsub.f32 %v6427_v37, %v6429_v25  ;;  %v6428_v46 = vmul.f32 0.03125, %v6424_v5 }
0x1f70   :  { %v6433_v10 = vmax.f32 %v6431_v44, 0.0  ;;  %v6432_v48 = vsub.f32 %v6428_v46, %v6430_v43 }
0x1f72   :  { %v6437_v51 = vadd.f32 1e-05, %v6433_v10  ;;  %v6434_v52 = vmax.f32 %v6432_v48, 0.0 }
0x1f74   :  { %8281 = vrsqrt.f32 %v6437_v51  ;;  %v6438_v54 = vadd.f32 1e-05, %v6434_v52 }
0x1f76   :  { %8283 = vrsqrt.f32 %v6438_v54 }
0x1f7e   :  { %v8282_v26 = vpop.eup %8281 }
0x1f7f   :  { %v6441_v18 = vmul.f32 %v8282_v26, %v6435_v1 }
0x1f80   :  { %v8284_v57 = vpop.eup %8283 }
0x1f81   :  { %v6447_v49 = vmul.f32 %v6446_v50, %v6441_v18  ;;  %v6442_v56 = vmul.f32 %v8284_v57, %v6436_v31 }
0x1f83   :  { %v6453_v58 = vadd.f32 %v6452_v9, %v6447_v49  ;;  %v6448_v60 = vmul.f32 %v6446_v50, %v6442_v56 }
0x1f85   :  { %v6455_v53 = vsel %vm131_vm2, %v6453_v58, -inf  ;;  %v6454_v61 = vadd.f32 %v6452_v9, %v6448_v60 }
0x1f86   :  { %v6456_v59 = vrot.slane %v6455_v53, 4 }
0x1f87   :  { %v6462_v41 = vsel %vm131_vm2, %v6454_v61, -inf }
0x1f88   :  { %v6457_v55 = vmax.f32 %v6455_v53, %v6456_v59  ;;  %v6463_v62 = vrot.slane %v6462_v41, 4 }
0x1f8a   :  { %v6464_v13 = vmax.f32 %v6462_v41, %v6463_v62  ;;  %v6458_v63 = vrot.slane %v6457_v55, 2 }
0x1f8c   :  { %v6459_v0 = vmax.f32 %v6457_v55, %v6458_v63  ;;  %v6465_v2 = vrot.slane %v6464_v13, 2 }
0x1f8e   :  { %v6460_v20 = vrot.slane %v6459_v0, 1  ;;  %v6466_v17 = vmax.f32 %v6464_v13, %v6465_v2 }
0x1f90   :  { %v6461_v7 = vmax.f32 %v6459_v0, %v6460_v20  ;;  %v6467_v14 = vrot.slane %v6466_v17, 1 }
0x1f92   :  { %v6468_v24 = vmax.f32 %v6466_v17, %v6467_v14  ;;  %v6469_v47 = vpack.c.bf16 %v6461_v7, %v6461_v7 }
0x1f94   :  { %v6470_v3 = vpack.c.bf16 %v6468_v24, %v6468_v24  ;;  %v6484_v6 = vunpack.c.l.b16 %v6469_v47 }
0x1f96   :  { %v6485_v4 = vunpack.c.l.b16 %v6470_v3 }
0x1f98   :  { %v6487_v45 = vsel %vm6486_vm8, %v6485_v4, %v6484_v6 }
0x1f99   :  { %v6488_v34 = vpack.c.b16 %v6487_v45, %v6487_v45 }
0x1f9b   :  { %7917 = vmatmul.mubr.msk.bf16.vlgmr.msra.gmra.mrb[136].mxu1 %vm131_vm2, %v6488_v34 }
0x206e   :  { %v6538_v8 = vpop.f32.mrb[136].mxu1 }
0x206f   :  { %v6539_v11 = vadd.f32 %v7245_v42, %v6538_v8  ;;  %v7918_v15 = vpop.f32.mrb[137].mxu1 }
0x2070   :  { %v6541_v40 = vpop.f32.mrb[138].mxu1 }
0x2071   :  { %v7919_v16 = vpop.f32.mrb[139].mxu1  ;;  %6545 = vst.msk [vmem:[#allocation3] sm:$0x3] %vm6544_vm9, %v6539_v11 }
0x2072   :  { %8298 = shalt.err (!%p8295_p4)
}
0x2073   :  { %s8299_s11 = scalar_lea.hbm %s10109_s12, 32 }
0x2074   :  { %p8300_p5 = scmp.ne.s32.totalorder %s10109_s12, %s8299_s11  ;;  %p8303_p6 = scmp.lt.u32.totalorder %s8299_s11, %s10109_s12 }
0x2076   :  { %p8305_p7 = pnand %p8303_p6, %p8300_p5 }
0x2078   :  { %8308 = shalt.err (!%p8305_p7)
}
0x2079   :  { %6555 = dma.vmem_to_hbm [thread:$0]  %s6553_s20, 32, %s10109_s12, [#allocation4]  }
0x207a   :  { %8309 = dma.done.wait [#allocation4], 32  }
0x207b   :  { %8310 = vsyncadd [#allocation4], 4294967264 }
0x207c   :  { %6559 = vsyncpa [#allocation4], 1 }

</bundles_post_ra>
